<compile_context>
chip_gen: v6e
topology: v6e:2x2x1
jax: 0.10.0
libtpu: 0.0.40
codegen_flags: <defaults>
</compile_context>

<pallas_src>
import jax
import jax.numpy as jnp
from jax.experimental import pallas as pl
from jax.experimental.pallas import tpu as pltpu

NUM_HEADS = 8
LN_EPS = 1e-5
LANE = 128

KPARAM_ORDER = (
    "ln1_w", "ln1_b", "w_reduce", "w_qkv", "w_proj", "b_proj",
    "ln2_w", "ln2_b", "w_fc1", "b_fc1", "w_fc2", "b_fc2",
)

# dot_general dims for q @ k^T (contract the last dim of both operands).
_TRANS_B_DIMS = (((1,), (1,)), ((), ()))


def _round_up(x, m):
    return (x + m - 1) // m * m


def _derived_dims(dim):
    C = dim // 2                       # width after `reduce`
    hd = C // NUM_HEADS                # real per-head dim (9 for dim=144)
    hidden = dim // 4                  # MLP hidden
    Cp = _round_up(C, LANE)            # padded reduce width
    hd_pad = _round_up(hd, 16)         # per-head slot; 8 heads * 16 = 128 lanes
    qkv_lanes = NUM_HEADS * hd_pad     # lanes per q / k / v block (mult. of 128)
    Hp = _round_up(hidden, LANE)       # padded MLP hidden width
    return C, hd, hidden, Cp, hd_pad, qkv_lanes, Hp


def _layernorm(x, w, b):
    """Two-pass LayerNorm over the real (unpadded) last dim, f32."""
    mu = jnp.mean(x, axis=-1, keepdims=True)
    xc = x - mu
    var = jnp.mean(xc * xc, axis=-1, keepdims=True)
    return xc * jax.lax.rsqrt(var + LN_EPS) * w + b


def _make_transblock_kernel(n_tokens, hd_pad):
    chunk = n_tokens // 4
    qkv_lanes = NUM_HEADS * hd_pad

    def kernel(x_ref, ln1w_ref, ln1b_ref, wr_ref, wqkv_ref, wp_ref, bp_ref,
               ln2w_ref, ln2b_ref, w1_ref, b1_ref, w2_ref, b2_ref,
               o_ref, qkv_scr, att_scr):
        f32, bf16 = jnp.float32, jnp.bfloat16

        # ---- attention branch: norm1 -> reduce -> qkv over ALL N rows ----
        h = _layernorm(x_ref[0], ln1w_ref[...], ln1b_ref[...])
        r = jnp.dot(h.astype(bf16), wr_ref[...], preferred_element_type=f32)
        qkv = jnp.dot(r.astype(bf16), wqkv_ref[...], preferred_element_type=f32)
        # Route q/k/v through VMEM scratch so the full qkv is never held live
        # across the unrolled chunk/head loops (bounded vreg pressure).
        qkv_scr[0] = qkv[:, 0 * qkv_lanes:1 * qkv_lanes].astype(bf16)  # q (scaled)
        qkv_scr[1] = qkv[:, 1 * qkv_lanes:2 * qkv_lanes].astype(bf16)  # k
        qkv_scr[2] = qkv[:, 2 * qkv_lanes:3 * qkv_lanes].astype(bf16)  # v

        # Block-diagonal attention: 4 independent token chunks x 8 heads.
        # TODO(synk): for much larger N (chunk >= ~512) switch to a kv-tiled
        # online-softmax loop instead of the full (chunk, chunk) score matrix.
        for c in range(4):
            r0 = c * chunk
            q_c = qkv_scr[0, r0:r0 + chunk, :]          # (chunk, 128) bf16
            k_c = qkv_scr[1, r0:r0 + chunk, :]
            v_c = qkv_scr[2, r0:r0 + chunk, :]
            o_parts = []
            for hh in range(NUM_HEADS):
                l0 = hh * hd_pad
                qh = q_c[:, l0:l0 + hd_pad]             # (chunk, 16) bf16
                kh = k_c[:, l0:l0 + hd_pad]
                vh = v_c[:, l0:l0 + hd_pad]
                # softmax scale already folded into the q columns of w_qkv
                s = jax.lax.dot_general(qh, kh, _TRANS_B_DIMS,
                                        preferred_element_type=f32)
                s = s - jnp.max(s, axis=-1, keepdims=True)
                p = jnp.exp(s)
                p = p * pl.reciprocal(jnp.sum(p, axis=-1, keepdims=True),
                                      approx=True)
                o_parts.append(jnp.dot(p.astype(bf16), vh,
                                       preferred_element_type=f32).astype(bf16))
            # pack the 8 head outputs back into one dense 128-lane block
            att_scr[r0:r0 + chunk, :] = jnp.concatenate(o_parts, axis=-1)

        # head-concat + output projection folded into ONE (N,128)@(128,D) matmul
        proj = jnp.dot(att_scr[...], wp_ref[...], preferred_element_type=f32)
        x1 = x_ref[0] + proj + bp_ref[...]

        # ---- MLP branch: x1 + fc2(relu(fc1(norm2(x1)))) ----
        h2 = _layernorm(x1, ln2w_ref[...], ln2b_ref[...])
        m = jnp.dot(h2.astype(bf16), w1_ref[...], preferred_element_type=f32)
        m = jnp.maximum(m + b1_ref[...], 0.0)
        m2 = jnp.dot(m.astype(bf16), w2_ref[...], preferred_element_type=f32)
        o_ref[0] = x1 + m2 + b2_ref[...]

    return kernel


def prepare_kernel_params(params, dim):
    """Pack / zero-pad the natural (PyTorch-layout) params for the kernel."""
    D = dim
    C, hd, hidden, Cp, hd_pad, qkv_lanes, Hp = _derived_dims(D)
    # PyTorch EffAttention: head_dim = dim // num_heads (the FULL dim)
    scale = float(D // NUM_HEADS) ** -0.5
    f32, bf16 = jnp.float32, jnp.bfloat16

    def pad_to(a, shape):
        out = jnp.zeros(shape, f32)
        return out.at[tuple(slice(0, s) for s in a.shape)].set(a.astype(f32))

    # qkv weight: fold softmax scale into the q columns, then place head h of
    # {q,k,v} into its own hd_pad-lane slot so q/k/v each occupy one dense
    # 128-lane block:  cols = [ q_h0..q_h7 | k_h0..k_h7 | v_h0..v_h7 ]
    wqkv = params["w_qkv"].astype(f32)
    wqkv = wqkv.at[:, :C].multiply(scale)
    wqkv_p = jnp.zeros((Cp, 3 * qkv_lanes), f32)
    for t in range(3):                          # q, k, v
        for h in range(NUM_HEADS):
            src = wqkv[:, t * C + h * hd:t * C + (h + 1) * hd]
            c0 = t * qkv_lanes + h * hd_pad
            wqkv_p = wqkv_p.at[:C, c0:c0 + hd].set(src)

    # proj weight packed to the same head-slot layout -> single (128, D) matmul
    wproj_p = jnp.zeros((qkv_lanes, D), f32)
    for h in range(NUM_HEADS):
        wproj_p = wproj_p.at[h * hd_pad:h * hd_pad + hd, :].set(
            params["w_proj"][h * hd:(h + 1) * hd, :].astype(f32))

    return dict(
        ln1_w=params["ln1_w"].astype(f32),
        ln1_b=params["ln1_b"].astype(f32),
        w_reduce=pad_to(params["w_reduce"], (D, Cp)).astype(bf16),
        w_qkv=wqkv_p.astype(bf16),
        w_proj=wproj_p.astype(bf16),
        b_proj=params["b_proj"].astype(f32),
        ln2_w=params["ln2_w"].astype(f32),
        ln2_b=params["ln2_b"].astype(f32),
        w_fc1=pad_to(params["w_fc1"], (D, Hp)).astype(bf16),
        b_fc1=pad_to(params["b_fc1"], (1, Hp)),
        w_fc2=pad_to(params["w_fc2"], (Hp, D)).astype(bf16),
        b_fc2=params["b_fc2"].astype(f32),
    )


def transblock_pallas(x_seq, params):
    """x_seq: (B, N, D) f32 token sequence.  Returns (B, N, D) f32."""
    B, N, D = x_seq.shape
    assert D % 2 == 0 and (D // 2) % NUM_HEADS == 0, "dim must split into 8 heads"
    assert N % 4 == 0 and (N // 4) % 8 == 0, "need N % 32 == 0 (4 chunks, 8-row tiles)"
    C, hd, hidden, Cp, hd_pad, qkv_lanes, Hp = _derived_dims(D)
    chunk = N // 4

    kp = prepare_kernel_params(params, D)
    weights = [kp[k] for k in KPARAM_ORDER]

    def w_spec(w):
        nd = w.ndim
        return pl.BlockSpec(w.shape, lambda b, _nd=nd: (0,) * _nd)

    # Full-extent (1, N, D) activation blocks: no wrapper pad / slice, output
    # stores are one dense 128-lane vreg + one masked tail store per row group.
    in_specs = [pl.BlockSpec((1, N, D), lambda b: (b, 0, 0))]
    in_specs += [w_spec(w) for w in weights]
    out_specs = pl.BlockSpec((1, N, D), lambda b: (b, 0, 0))

    # Advisory cost estimate (matmul flops; one exp per attention score).
    mm_flops = (2 * N * (D * Cp + Cp * 3 * qkv_lanes + qkv_lanes * D
                         + D * Hp + Hp * D)
                + 4 * NUM_HEADS * 4 * chunk * chunk * hd_pad)
    weight_bytes = sum(int(w.size) * w.dtype.itemsize for w in weights)
    cost = pl.CostEstimate(
        flops=B * mm_flops,
        transcendentals=B * 4 * NUM_HEADS * chunk * chunk,
        bytes_accessed=2 * B * N * D * 4 + weight_bytes)

    out = pl.pallas_call(
        _make_transblock_kernel(N, hd_pad),
        out_shape=jax.ShapeDtypeStruct((B, N, D), jnp.float32),
        grid_spec=pltpu.PrefetchScalarGridSpec(
            num_scalar_prefetch=0,
            grid=(B,),                       # >=2 parallel steps when B>=2 (v7x)
            in_specs=in_specs,
            out_specs=out_specs,
            scratch_shapes=[
                pltpu.VMEM((3, N, qkv_lanes), jnp.bfloat16),   # packed q/k/v
                pltpu.VMEM((N, qkv_lanes), jnp.bfloat16),      # packed head outs
            ]),
        compiler_params=pltpu.CompilerParams(
            dimension_semantics=("parallel",)),
        cost_estimate=cost,
    )(x_seq, *weights)
    return out


# ----------------------------- JAX glue --------------------------------------
def extract_image_patches_same(x):
    """torch.nn.Unfold(3, stride=1) with 'same' padding. (B,C,H,W)->(B,C*9,H*W)."""
    B, C, H, W = x.shape
    xp = jnp.pad(x, ((0, 0), (0, 0), (1, 1), (1, 1)))
    cols = []
    for kh in range(3):
        for kw in range(3):
            cols.append(xp[:, :, kh:kh + H, kw:kw + W])
    p = jnp.stack(cols, axis=2)           # (B, C, 9, H, W), [c, kh, kw] ordering
    return p.reshape(B, C * 9, H * W)


def init_params(key, dim):
    C = dim // 2
    hidden = dim // 4
    ks = jax.random.split(key, 8)

    def w(k, shape, s=0.02):
        return s * jax.random.normal(k, shape, dtype=jnp.float32)

    return dict(
        ln1_w=jnp.ones((1, dim), jnp.float32),
        ln1_b=jnp.zeros((1, dim), jnp.float32),
        w_reduce=w(ks[0], (dim, C)),          # Linear(dim, dim//2), no bias
        w_qkv=w(ks[1], (C, 3 * C)),           # Linear(dim//2, 3*dim//2), no bias
        w_proj=w(ks[2], (C, dim)),            # Linear(dim//2, dim)
        b_proj=w(ks[3], (1, dim)),
        ln2_w=jnp.ones((1, dim), jnp.float32),
        ln2_b=jnp.zeros((1, dim), jnp.float32),
        w_fc1=w(ks[4], (dim, hidden)),        # Mlp fc1
        b_fc1=w(ks[5], (1, hidden)),
        w_fc2=w(ks[6], (hidden, dim)),        # Mlp fc2
        b_fc2=w(ks[7], (1, dim)),
    )


# ------------------------- pure-JAX reference --------------------------------
def ref_forward(xs, p):
    B, N, D = xs.shape
    C = D // 2
    hd = C // NUM_HEADS
    scale = float(D // NUM_HEADS) ** -0.5     # EffAttention: head_dim = dim // num_heads
    hi = jax.lax.Precision.HIGHEST

    def ln(v, w, b):
        mu = v.mean(-1, keepdims=True)
        var = ((v - mu) ** 2).mean(-1, keepdims=True)
        return (v - mu) / jnp.sqrt(var + LN_EPS) * w[0] + b[0]

    h = ln(xs, p["ln1_w"], p["ln1_b"])
    r = jnp.einsum("bnd,dc->bnc", h, p["w_reduce"], precision=hi)
    qkv = jnp.einsum("bnc,ce->bne", r, p["w_qkv"], precision=hi)
    qkv = qkv.reshape(B, N, 3, NUM_HEADS, hd).transpose(2, 0, 3, 1, 4)
    q, k, v = qkv[0], qkv[1], qkv[2]
    chunk = N // 4
    outs = []
    for ci in range(4):
        qs = q[:, :, ci * chunk:(ci + 1) * chunk]
        ks = k[:, :, ci * chunk:(ci + 1) * chunk]
        vs = v[:, :, ci * chunk:(ci + 1) * chunk]
        a = jnp.einsum("bhqd,bhkd->bhqk", qs, ks, precision=hi) * scale
        a = jax.nn.softmax(a, axis=-1)
        o = jnp.einsum("bhqk,bhkd->bhqd", a, vs, precision=hi)
        outs.append(o.transpose(0, 2, 1, 3))
    att = jnp.concatenate(outs, axis=1).reshape(B, N, C)
    att = jnp.einsum("bnc,cd->bnd", att, p["w_proj"], precision=hi) + p["b_proj"][0]
    x1 = xs + att
    h2 = ln(x1, p["ln2_w"], p["ln2_b"])
    m = jnp.einsum("bnd,dh->bnh", h2, p["w_fc1"], precision=hi) + p["b_fc1"][0]
    m = jnp.maximum(m, 0.0)
    m = jnp.einsum("bnh,hd->bnd", m, p["w_fc2"], precision=hi) + p["b_fc2"][0]
    return x1 + m


if __name__ == "__main__":
    key = jax.random.PRNGKey(0)
    kx, kp = jax.random.split(key)

    # Small but shape-consistent: channels=16 -> dim = 16*9 = 144 (dim//2
    # divisible by num_heads=8), 8x8 image -> N = 64 tokens (4 chunks of 16).
    B, ch, Himg, Wimg = 2, 16, 8, 8
    dim = ch * 9
    x_img = jax.random.normal(kx, (B, ch, Himg, Wimg), dtype=jnp.float32)
    params = init_params(kp, dim)

    # Glue: NCHW image -> (B, N, D) token sequence (matches x.permute(0,2,1)).
    x_seq = jnp.transpose(extract_image_patches_same(x_img), (0, 2, 1))

    out = transblock_pallas(x_seq, params)
    out = jax.block_until_ready(out)

    ref = ref_forward(x_seq, params)
    assert out.shape == (B, Himg * Wimg, dim)
    err = float(jnp.max(jnp.abs(out - ref)))
    # bf16 MXU operands with f32 accumulation vs f32 HIGHEST reference.
    if not (err == err) or err > 5e-2:   # NaN check + tolerance
        raise SystemExit(f"mismatch: max abs err {err}")
    print("KERNEL_OK")
</pallas_src>

<mosaic_0001>
module attributes {stable_mosaic.version = 11 : i64} {
  func.func @kernel(%arg0: i32, %arg1: memref<1x64x144xf32, #tpu.memory_space<vmem>>, %arg2: memref<1x144xf32, #tpu.memory_space<vmem>>, %arg3: memref<1x144xf32, #tpu.memory_space<vmem>>, %arg4: memref<144x128xbf16, #tpu.memory_space<vmem>>, %arg5: memref<128x384xbf16, #tpu.memory_space<vmem>>, %arg6: memref<128x144xbf16, #tpu.memory_space<vmem>>, %arg7: memref<1x144xf32, #tpu.memory_space<vmem>>, %arg8: memref<1x144xf32, #tpu.memory_space<vmem>>, %arg9: memref<1x144xf32, #tpu.memory_space<vmem>>, %arg10: memref<144x128xbf16, #tpu.memory_space<vmem>>, %arg11: memref<1x128xf32, #tpu.memory_space<vmem>>, %arg12: memref<128x144xbf16, #tpu.memory_space<vmem>>, %arg13: memref<1x144xf32, #tpu.memory_space<vmem>>, %arg14: memref<1x64x144xf32, #tpu.memory_space<vmem>>, %arg15: memref<3x64x128xbf16, #tpu.memory_space<vmem>>, %arg16: memref<64x128xbf16, #tpu.memory_space<vmem>>) attributes {dimension_semantics = [#tpu.dimension_semantics<parallel>], iteration_bounds = array<i64: 2>, scalar_prefetch = 0 : i64, scratch_operands = 2 : i64, tpu.core_type = #tpu.core_type<tc>, window_params = [{transform_indices = @transform_0, window_bounds = array<i64: 1, 64, 144>}, {pipeline_mode = #tpu.pipeline_mode<synchronous>, transform_indices = @transform_1, window_bounds = array<i64: 1, 144>}, {pipeline_mode = #tpu.pipeline_mode<synchronous>, transform_indices = @transform_2, window_bounds = array<i64: 1, 144>}, {pipeline_mode = #tpu.pipeline_mode<synchronous>, transform_indices = @transform_3, window_bounds = array<i64: 144, 128>}, {pipeline_mode = #tpu.pipeline_mode<synchronous>, transform_indices = @transform_4, window_bounds = array<i64: 128, 384>}, {pipeline_mode = #tpu.pipeline_mode<synchronous>, transform_indices = @transform_5, window_bounds = array<i64: 128, 144>}, {pipeline_mode = #tpu.pipeline_mode<synchronous>, transform_indices = @transform_6, window_bounds = array<i64: 1, 144>}, {pipeline_mode = #tpu.pipeline_mode<synchronous>, transform_indices = @transform_7, window_bounds = array<i64: 1, 144>}, {pipeline_mode = #tpu.pipeline_mode<synchronous>, transform_indices = @transform_8, window_bounds = array<i64: 1, 144>}, {pipeline_mode = #tpu.pipeline_mode<synchronous>, transform_indices = @transform_9, window_bounds = array<i64: 144, 128>}, {pipeline_mode = #tpu.pipeline_mode<synchronous>, transform_indices = @transform_10, window_bounds = array<i64: 1, 128>}, {pipeline_mode = #tpu.pipeline_mode<synchronous>, transform_indices = @transform_11, window_bounds = array<i64: 128, 144>}, {pipeline_mode = #tpu.pipeline_mode<synchronous>, transform_indices = @transform_12, window_bounds = array<i64: 1, 144>}, {transform_indices = @transform_13, window_bounds = array<i64: 1, 64, 144>}]} {
    %c0 = arith.constant 0 : index
    %c0_0 = arith.constant 0 : index
    %c0_1 = arith.constant 0 : index
    %0 = vector.load %arg1[%c0, %c0_0, %c0_1] : memref<1x64x144xf32, #tpu.memory_space<vmem>>, vector<1x64x144xf32>
    %1 = vector.shape_cast %0 : vector<1x64x144xf32> to vector<64x144xf32>
    %c0_2 = arith.constant 0 : index
    %c0_3 = arith.constant 0 : index
    %2 = vector.load %arg2[%c0_2, %c0_3] : memref<1x144xf32, #tpu.memory_space<vmem>>, vector<1x144xf32>
    %c0_4 = arith.constant 0 : index
    %c0_5 = arith.constant 0 : index
    %3 = vector.load %arg3[%c0_4, %c0_5] : memref<1x144xf32, #tpu.memory_space<vmem>>, vector<1x144xf32>
    %cst = arith.constant dense<0.000000e+00> : vector<64xf32>
    %4 = vector.multi_reduction <add>, %1, %cst [1] : vector<64x144xf32> to vector<64xf32>
    %5 = vector.shape_cast %4 : vector<64xf32> to vector<64x1xf32>
    %cst_6 = arith.constant 1.440000e+02 : f32
    %6 = vector.broadcast %cst_6 : f32 to vector<64x1xf32>
    %7 = arith.divf %5, %6 : vector<64x1xf32>
    %8 = vector.broadcast %7 : vector<64x1xf32> to vector<64x144xf32>
    %9 = arith.subf %1, %8 : vector<64x144xf32>
    %10 = arith.mulf %9, %9 : vector<64x144xf32>
    %cst_7 = arith.constant dense<0.000000e+00> : vector<64xf32>
    %11 = vector.multi_reduction <add>, %10, %cst_7 [1] : vector<64x144xf32> to vector<64xf32>
    %12 = vector.shape_cast %11 : vector<64xf32> to vector<64x1xf32>
    %cst_8 = arith.constant 1.440000e+02 : f32
    %13 = vector.broadcast %cst_8 : f32 to vector<64x1xf32>
    %14 = arith.divf %12, %13 : vector<64x1xf32>
    %cst_9 = arith.constant 9.99999974E-6 : f32
    %15 = vector.broadcast %cst_9 : f32 to vector<64x1xf32>
    %16 = arith.addf %14, %15 : vector<64x1xf32>
    %17 = math.rsqrt %16 : vector<64x1xf32>
    %18 = vector.broadcast %17 : vector<64x1xf32> to vector<64x144xf32>
    %19 = arith.mulf %9, %18 : vector<64x144xf32>
    %20 = vector.broadcast %2 : vector<1x144xf32> to vector<64x144xf32>
    %21 = arith.mulf %19, %20 : vector<64x144xf32>
    %22 = vector.broadcast %3 : vector<1x144xf32> to vector<64x144xf32>
    %23 = arith.addf %21, %22 : vector<64x144xf32>
    %24 = arith.truncf %23 : vector<64x144xf32> to vector<64x144xbf16>
    %c0_10 = arith.constant 0 : index
    %c0_11 = arith.constant 0 : index
    %25 = vector.load %arg4[%c0_10, %c0_11] : memref<144x128xbf16, #tpu.memory_space<vmem>>, vector<144x128xbf16>
    %cst_12 = arith.constant dense<0.000000e+00> : vector<64x128xf32>
    %26 = tpu.matmul %24, %25, %cst_12 {dimension_numbers = #tpu.dot_dimension_numbers<[1], [0], [0], [1], [0, 0, 1, 1], [], []>} : vector<64x144xbf16>, vector<144x128xbf16>, vector<64x128xf32> -> vector<64x128xf32>
    %27 = arith.truncf %26 : vector<64x128xf32> to vector<64x128xbf16>
    %c0_13 = arith.constant 0 : index
    %c0_14 = arith.constant 0 : index
    %28 = vector.load %arg5[%c0_13, %c0_14] : memref<128x384xbf16, #tpu.memory_space<vmem>>, vector<128x384xbf16>
    %cst_15 = arith.constant dense<0.000000e+00> : vector<64x384xf32>
    %29 = tpu.matmul %27, %28, %cst_15 {dimension_numbers = #tpu.dot_dimension_numbers<[1], [0], [0], [1], [0, 0, 1, 1], [], []>} : vector<64x128xbf16>, vector<128x384xbf16>, vector<64x384xf32> -> vector<64x384xf32>
    %30 = vector.extract_strided_slice %29 {offsets = [0, 0], sizes = [64, 128], strides = [1, 1]} : vector<64x384xf32> to vector<64x128xf32>
    %31 = arith.truncf %30 : vector<64x128xf32> to vector<64x128xbf16>
    %c0_16 = arith.constant 0 : index
    %c0_17 = arith.constant 0 : index
    %c0_18 = arith.constant 0 : index
    %32 = vector.load %arg15[%c0_16, %c0_17, %c0_18] : memref<3x64x128xbf16, #tpu.memory_space<vmem>>, vector<1x64x128xbf16>
    %33 = vector.shape_cast %32 : vector<1x64x128xbf16> to vector<64x128xbf16>
    %34 = vector.shape_cast %31 : vector<64x128xbf16> to vector<1x64x128xbf16>
    tpu.vector_store %arg15[%c0_16, %c0_17, %c0_18], %34 {strides = array<i32>} : memref<3x64x128xbf16, #tpu.memory_space<vmem>>, vector<1x64x128xbf16>,
    %35 = vector.extract_strided_slice %29 {offsets = [0, 128], sizes = [64, 128], strides = [1, 1]} : vector<64x384xf32> to vector<64x128xf32>
    %36 = arith.truncf %35 : vector<64x128xf32> to vector<64x128xbf16>
    %c1 = arith.constant 1 : index
    %c0_19 = arith.constant 0 : index
    %c0_20 = arith.constant 0 : index
    %37 = vector.load %arg15[%c1, %c0_19, %c0_20] : memref<3x64x128xbf16, #tpu.memory_space<vmem>>, vector<1x64x128xbf16>
    %38 = vector.shape_cast %37 : vector<1x64x128xbf16> to vector<64x128xbf16>
    %39 = vector.shape_cast %36 : vector<64x128xbf16> to vector<1x64x128xbf16>
    tpu.vector_store %arg15[%c1, %c0_19, %c0_20], %39 {strides = array<i32>} : memref<3x64x128xbf16, #tpu.memory_space<vmem>>, vector<1x64x128xbf16>,
    %40 = vector.extract_strided_slice %29 {offsets = [0, 256], sizes = [64, 128], strides = [1, 1]} : vector<64x384xf32> to vector<64x128xf32>
    %41 = arith.truncf %40 : vector<64x128xf32> to vector<64x128xbf16>
    %c2 = arith.constant 2 : index
    %c0_21 = arith.constant 0 : index
    %c0_22 = arith.constant 0 : index
    %42 = vector.load %arg15[%c2, %c0_21, %c0_22] : memref<3x64x128xbf16, #tpu.memory_space<vmem>>, vector<1x64x128xbf16>
    %43 = vector.shape_cast %42 : vector<1x64x128xbf16> to vector<64x128xbf16>
    %44 = vector.shape_cast %41 : vector<64x128xbf16> to vector<1x64x128xbf16>
    tpu.vector_store %arg15[%c2, %c0_21, %c0_22], %44 {strides = array<i32>} : memref<3x64x128xbf16, #tpu.memory_space<vmem>>, vector<1x64x128xbf16>,
    %c0_23 = arith.constant 0 : index
    %c0_24 = arith.constant 0 : index
    %c0_25 = arith.constant 0 : index
    %45 = vector.load %arg15[%c0_23, %c0_24, %c0_25] : memref<3x64x128xbf16, #tpu.memory_space<vmem>>, vector<1x16x128xbf16>
    %46 = vector.shape_cast %45 : vector<1x16x128xbf16> to vector<16x128xbf16>
    %c1_26 = arith.constant 1 : index
    %c0_27 = arith.constant 0 : index
    %c0_28 = arith.constant 0 : index
    %47 = vector.load %arg15[%c1_26, %c0_27, %c0_28] : memref<3x64x128xbf16, #tpu.memory_space<vmem>>, vector<1x16x128xbf16>
    %48 = vector.shape_cast %47 : vector<1x16x128xbf16> to vector<16x128xbf16>
    %c2_29 = arith.constant 2 : index
    %c0_30 = arith.constant 0 : index
    %c0_31 = arith.constant 0 : index
    %49 = vector.load %arg15[%c2_29, %c0_30, %c0_31] : memref<3x64x128xbf16, #tpu.memory_space<vmem>>, vector<1x16x128xbf16>
    %50 = vector.shape_cast %49 : vector<1x16x128xbf16> to vector<16x128xbf16>
    %51 = vector.extract_strided_slice %46 {offsets = [0, 0], sizes = [16, 16], strides = [1, 1]} : vector<16x128xbf16> to vector<16x16xbf16>
    %52 = vector.extract_strided_slice %48 {offsets = [0, 0], sizes = [16, 16], strides = [1, 1]} : vector<16x128xbf16> to vector<16x16xbf16>
    %53 = vector.extract_strided_slice %50 {offsets = [0, 0], sizes = [16, 16], strides = [1, 1]} : vector<16x128xbf16> to vector<16x16xbf16>
    %cst_32 = arith.constant dense<0.000000e+00> : vector<16x16xf32>
    %54 = tpu.matmul %51, %52, %cst_32 {dimension_numbers = #tpu.dot_dimension_numbers<[1], [1], [0], [0], [0, 0, 1, 0], [], []>} : vector<16x16xbf16>, vector<16x16xbf16>, vector<16x16xf32> -> vector<16x16xf32>
    %cst_33 = arith.constant dense<0xFF800000> : vector<16xf32>
    %55 = vector.multi_reduction <maximumf>, %54, %cst_33 [1] : vector<16x16xf32> to vector<16xf32>
    %56 = vector.shape_cast %55 : vector<16xf32> to vector<16x1xf32>
    %57 = vector.broadcast %56 : vector<16x1xf32> to vector<16x16xf32>
    %58 = arith.subf %54, %57 : vector<16x16xf32>
    %59 = math.exp %58 : vector<16x16xf32>
    %cst_34 = arith.constant dense<0.000000e+00> : vector<16xf32>
    %60 = vector.multi_reduction <add>, %59, %cst_34 [1] : vector<16x16xf32> to vector<16xf32>
    %61 = vector.shape_cast %60 : vector<16xf32> to vector<16x1xf32>
    %62 = tpu.reciprocal %61 {approx = true} : vector<16x1xf32> -> vector<16x1xf32>
    %63 = vector.broadcast %62 : vector<16x1xf32> to vector<16x16xf32>
    %64 = arith.mulf %59, %63 : vector<16x16xf32>
    %65 = arith.truncf %64 : vector<16x16xf32> to vector<16x16xbf16>
    %cst_35 = arith.constant dense<0.000000e+00> : vector<16x16xf32>
    %66 = tpu.matmul %65, %53, %cst_35 {dimension_numbers = #tpu.dot_dimension_numbers<[1], [0], [0], [1], [0, 0, 1, 1], [], []>} : vector<16x16xbf16>, vector<16x16xbf16>, vector<16x16xf32> -> vector<16x16xf32>
    %67 = arith.truncf %66 : vector<16x16xf32> to vector<16x16xbf16>
    %68 = vector.extract_strided_slice %46 {offsets = [0, 16], sizes = [16, 16], strides = [1, 1]} : vector<16x128xbf16> to vector<16x16xbf16>
    %69 = vector.extract_strided_slice %48 {offsets = [0, 16], sizes = [16, 16], strides = [1, 1]} : vector<16x128xbf16> to vector<16x16xbf16>
    %70 = vector.extract_strided_slice %50 {offsets = [0, 16], sizes = [16, 16], strides = [1, 1]} : vector<16x128xbf16> to vector<16x16xbf16>
    %cst_36 = arith.constant dense<0.000000e+00> : vector<16x16xf32>
    %71 = tpu.matmul %68, %69, %cst_36 {dimension_numbers = #tpu.dot_dimension_numbers<[1], [1], [0], [0], [0, 0, 1, 0], [], []>} : vector<16x16xbf16>, vector<16x16xbf16>, vector<16x16xf32> -> vector<16x16xf32>
    %cst_37 = arith.constant dense<0xFF800000> : vector<16xf32>
    %72 = vector.multi_reduction <maximumf>, %71, %cst_37 [1] : vector<16x16xf32> to vector<16xf32>
    %73 = vector.shape_cast %72 : vector<16xf32> to vector<16x1xf32>
    %74 = vector.broadcast %73 : vector<16x1xf32> to vector<16x16xf32>
    %75 = arith.subf %71, %74 : vector<16x16xf32>
    %76 = math.exp %75 : vector<16x16xf32>
    %cst_38 = arith.constant dense<0.000000e+00> : vector<16xf32>
    %77 = vector.multi_reduction <add>, %76, %cst_38 [1] : vector<16x16xf32> to vector<16xf32>
    %78 = vector.shape_cast %77 : vector<16xf32> to vector<16x1xf32>
    %79 = tpu.reciprocal %78 {approx = true} : vector<16x1xf32> -> vector<16x1xf32>
    %80 = vector.broadcast %79 : vector<16x1xf32> to vector<16x16xf32>
    %81 = arith.mulf %76, %80 : vector<16x16xf32>
    %82 = arith.truncf %81 : vector<16x16xf32> to vector<16x16xbf16>
    %cst_39 = arith.constant dense<0.000000e+00> : vector<16x16xf32>
    %83 = tpu.matmul %82, %70, %cst_39 {dimension_numbers = #tpu.dot_dimension_numbers<[1], [0], [0], [1], [0, 0, 1, 1], [], []>} : vector<16x16xbf16>, vector<16x16xbf16>, vector<16x16xf32> -> vector<16x16xf32>
    %84 = arith.truncf %83 : vector<16x16xf32> to vector<16x16xbf16>
    %85 = vector.extract_strided_slice %46 {offsets = [0, 32], sizes = [16, 16], strides = [1, 1]} : vector<16x128xbf16> to vector<16x16xbf16>
    %86 = vector.extract_strided_slice %48 {offsets = [0, 32], sizes = [16, 16], strides = [1, 1]} : vector<16x128xbf16> to vector<16x16xbf16>
    %87 = vector.extract_strided_slice %50 {offsets = [0, 32], sizes = [16, 16], strides = [1, 1]} : vector<16x128xbf16> to vector<16x16xbf16>
    %cst_40 = arith.constant dense<0.000000e+00> : vector<16x16xf32>
    %88 = tpu.matmul %85, %86, %cst_40 {dimension_numbers = #tpu.dot_dimension_numbers<[1], [1], [0], [0], [0, 0, 1, 0], [], []>} : vector<16x16xbf16>, vector<16x16xbf16>, vector<16x16xf32> -> vector<16x16xf32>
    %cst_41 = arith.constant dense<0xFF800000> : vector<16xf32>
    %89 = vector.multi_reduction <maximumf>, %88, %cst_41 [1] : vector<16x16xf32> to vector<16xf32>
    %90 = vector.shape_cast %89 : vector<16xf32> to vector<16x1xf32>
    %91 = vector.broadcast %90 : vector<16x1xf32> to vector<16x16xf32>
    %92 = arith.subf %88, %91 : vector<16x16xf32>
    %93 = math.exp %92 : vector<16x16xf32>
    %cst_42 = arith.constant dense<0.000000e+00> : vector<16xf32>
    %94 = vector.multi_reduction <add>, %93, %cst_42 [1] : vector<16x16xf32> to vector<16xf32>
    %95 = vector.shape_cast %94 : vector<16xf32> to vector<16x1xf32>
    %96 = tpu.reciprocal %95 {approx = true} : vector<16x1xf32> -> vector<16x1xf32>
    %97 = vector.broadcast %96 : vector<16x1xf32> to vector<16x16xf32>
    %98 = arith.mulf %93, %97 : vector<16x16xf32>
    %99 = arith.truncf %98 : vector<16x16xf32> to vector<16x16xbf16>
    %cst_43 = arith.constant dense<0.000000e+00> : vector<16x16xf32>
    %100 = tpu.matmul %99, %87, %cst_43 {dimension_numbers = #tpu.dot_dimension_numbers<[1], [0], [0], [1], [0, 0, 1, 1], [], []>} : vector<16x16xbf16>, vector<16x16xbf16>, vector<16x16xf32> -> vector<16x16xf32>
    %101 = arith.truncf %100 : vector<16x16xf32> to vector<16x16xbf16>
    %102 = vector.extract_strided_slice %46 {offsets = [0, 48], sizes = [16, 16], strides = [1, 1]} : vector<16x128xbf16> to vector<16x16xbf16>
    %103 = vector.extract_strided_slice %48 {offsets = [0, 48], sizes = [16, 16], strides = [1, 1]} : vector<16x128xbf16> to vector<16x16xbf16>
    %104 = vector.extract_strided_slice %50 {offsets = [0, 48], sizes = [16, 16], strides = [1, 1]} : vector<16x128xbf16> to vector<16x16xbf16>
    %cst_44 = arith.constant dense<0.000000e+00> : vector<16x16xf32>
    %105 = tpu.matmul %102, %103, %cst_44 {dimension_numbers = #tpu.dot_dimension_numbers<[1], [1], [0], [0], [0, 0, 1, 0], [], []>} : vector<16x16xbf16>, vector<16x16xbf16>, vector<16x16xf32> -> vector<16x16xf32>
    %cst_45 = arith.constant dense<0xFF800000> : vector<16xf32>
    %106 = vector.multi_reduction <maximumf>, %105, %cst_45 [1] : vector<16x16xf32> to vector<16xf32>
    %107 = vector.shape_cast %106 : vector<16xf32> to vector<16x1xf32>
    %108 = vector.broadcast %107 : vector<16x1xf32> to vector<16x16xf32>
    %109 = arith.subf %105, %108 : vector<16x16xf32>
    %110 = math.exp %109 : vector<16x16xf32>
    %cst_46 = arith.constant dense<0.000000e+00> : vector<16xf32>
    %111 = vector.multi_reduction <add>, %110, %cst_46 [1] : vector<16x16xf32> to vector<16xf32>
    %112 = vector.shape_cast %111 : vector<16xf32> to vector<16x1xf32>
    %113 = tpu.reciprocal %112 {approx = true} : vector<16x1xf32> -> vector<16x1xf32>
    %114 = vector.broadcast %113 : vector<16x1xf32> to vector<16x16xf32>
    %115 = arith.mulf %110, %114 : vector<16x16xf32>
    %116 = arith.truncf %115 : vector<16x16xf32> to vector<16x16xbf16>
    %cst_47 = arith.constant dense<0.000000e+00> : vector<16x16xf32>
    %117 = tpu.matmul %116, %104, %cst_47 {dimension_numbers = #tpu.dot_dimension_numbers<[1], [0], [0], [1], [0, 0, 1, 1], [], []>} : vector<16x16xbf16>, vector<16x16xbf16>, vector<16x16xf32> -> vector<16x16xf32>
    %118 = arith.truncf %117 : vector<16x16xf32> to vector<16x16xbf16>
    %119 = vector.extract_strided_slice %46 {offsets = [0, 64], sizes = [16, 16], strides = [1, 1]} : vector<16x128xbf16> to vector<16x16xbf16>
    %120 = vector.extract_strided_slice %48 {offsets = [0, 64], sizes = [16, 16], strides = [1, 1]} : vector<16x128xbf16> to vector<16x16xbf16>
    %121 = vector.extract_strided_slice %50 {offsets = [0, 64], sizes = [16, 16], strides = [1, 1]} : vector<16x128xbf16> to vector<16x16xbf16>
    %cst_48 = arith.constant dense<0.000000e+00> : vector<16x16xf32>
    %122 = tpu.matmul %119, %120, %cst_48 {dimension_numbers = #tpu.dot_dimension_numbers<[1], [1], [0], [0], [0, 0, 1, 0], [], []>} : vector<16x16xbf16>, vector<16x16xbf16>, vector<16x16xf32> -> vector<16x16xf32>
    %cst_49 = arith.constant dense<0xFF800000> : vector<16xf32>
    %123 = vector.multi_reduction <maximumf>, %122, %cst_49 [1] : vector<16x16xf32> to vector<16xf32>
    %124 = vector.shape_cast %123 : vector<16xf32> to vector<16x1xf32>
    %125 = vector.broadcast %124 : vector<16x1xf32> to vector<16x16xf32>
    %126 = arith.subf %122, %125 : vector<16x16xf32>
    %127 = math.exp %126 : vector<16x16xf32>
    %cst_50 = arith.constant dense<0.000000e+00> : vector<16xf32>
    %128 = vector.multi_reduction <add>, %127, %cst_50 [1] : vector<16x16xf32> to vector<16xf32>
    %129 = vector.shape_cast %128 : vector<16xf32> to vector<16x1xf32>
    %130 = tpu.reciprocal %129 {approx = true} : vector<16x1xf32> -> vector<16x1xf32>
    %131 = vector.broadcast %130 : vector<16x1xf32> to vector<16x16xf32>
    %132 = arith.mulf %127, %131 : vector<16x16xf32>
    %133 = arith.truncf %132 : vector<16x16xf32> to vector<16x16xbf16>
    %cst_51 = arith.constant dense<0.000000e+00> : vector<16x16xf32>
    %134 = tpu.matmul %133, %121, %cst_51 {dimension_numbers = #tpu.dot_dimension_numbers<[1], [0], [0], [1], [0, 0, 1, 1], [], []>} : vector<16x16xbf16>, vector<16x16xbf16>, vector<16x16xf32> -> vector<16x16xf32>
    %135 = arith.truncf %134 : vector<16x16xf32> to vector<16x16xbf16>
    %136 = vector.extract_strided_slice %46 {offsets = [0, 80], sizes = [16, 16], strides = [1, 1]} : vector<16x128xbf16> to vector<16x16xbf16>
    %137 = vector.extract_strided_slice %48 {offsets = [0, 80], sizes = [16, 16], strides = [1, 1]} : vector<16x128xbf16> to vector<16x16xbf16>
    %138 = vector.extract_strided_slice %50 {offsets = [0, 80], sizes = [16, 16], strides = [1, 1]} : vector<16x128xbf16> to vector<16x16xbf16>
    %cst_52 = arith.constant dense<0.000000e+00> : vector<16x16xf32>
    %139 = tpu.matmul %136, %137, %cst_52 {dimension_numbers = #tpu.dot_dimension_numbers<[1], [1], [0], [0], [0, 0, 1, 0], [], []>} : vector<16x16xbf16>, vector<16x16xbf16>, vector<16x16xf32> -> vector<16x16xf32>
    %cst_53 = arith.constant dense<0xFF800000> : vector<16xf32>
    %140 = vector.multi_reduction <maximumf>, %139, %cst_53 [1] : vector<16x16xf32> to vector<16xf32>
    %141 = vector.shape_cast %140 : vector<16xf32> to vector<16x1xf32>
    %142 = vector.broadcast %141 : vector<16x1xf32> to vector<16x16xf32>
    %143 = arith.subf %139, %142 : vector<16x16xf32>
    %144 = math.exp %143 : vector<16x16xf32>
    %cst_54 = arith.constant dense<0.000000e+00> : vector<16xf32>
    %145 = vector.multi_reduction <add>, %144, %cst_54 [1] : vector<16x16xf32> to vector<16xf32>
    %146 = vector.shape_cast %145 : vector<16xf32> to vector<16x1xf32>
    %147 = tpu.reciprocal %146 {approx = true} : vector<16x1xf32> -> vector<16x1xf32>
    %148 = vector.broadcast %147 : vector<16x1xf32> to vector<16x16xf32>
    %149 = arith.mulf %144, %148 : vector<16x16xf32>
    %150 = arith.truncf %149 : vector<16x16xf32> to vector<16x16xbf16>
    %cst_55 = arith.constant dense<0.000000e+00> : vector<16x16xf32>
    %151 = tpu.matmul %150, %138, %cst_55 {dimension_numbers = #tpu.dot_dimension_numbers<[1], [0], [0], [1], [0, 0, 1, 1], [], []>} : vector<16x16xbf16>, vector<16x16xbf16>, vector<16x16xf32> -> vector<16x16xf32>
    %152 = arith.truncf %151 : vector<16x16xf32> to vector<16x16xbf16>
    %153 = vector.extract_strided_slice %46 {offsets = [0, 96], sizes = [16, 16], strides = [1, 1]} : vector<16x128xbf16> to vector<16x16xbf16>
    %154 = vector.extract_strided_slice %48 {offsets = [0, 96], sizes = [16, 16], strides = [1, 1]} : vector<16x128xbf16> to vector<16x16xbf16>
    %155 = vector.extract_strided_slice %50 {offsets = [0, 96], sizes = [16, 16], strides = [1, 1]} : vector<16x128xbf16> to vector<16x16xbf16>
    %cst_56 = arith.constant dense<0.000000e+00> : vector<16x16xf32>
    %156 = tpu.matmul %153, %154, %cst_56 {dimension_numbers = #tpu.dot_dimension_numbers<[1], [1], [0], [0], [0, 0, 1, 0], [], []>} : vector<16x16xbf16>, vector<16x16xbf16>, vector<16x16xf32> -> vector<16x16xf32>
    %cst_57 = arith.constant dense<0xFF800000> : vector<16xf32>
    %157 = vector.multi_reduction <maximumf>, %156, %cst_57 [1] : vector<16x16xf32> to vector<16xf32>
    %158 = vector.shape_cast %157 : vector<16xf32> to vector<16x1xf32>
    %159 = vector.broadcast %158 : vector<16x1xf32> to vector<16x16xf32>
    %160 = arith.subf %156, %159 : vector<16x16xf32>
    %161 = math.exp %160 : vector<16x16xf32>
    %cst_58 = arith.constant dense<0.000000e+00> : vector<16xf32>
    %162 = vector.multi_reduction <add>, %161, %cst_58 [1] : vector<16x16xf32> to vector<16xf32>
    %163 = vector.shape_cast %162 : vector<16xf32> to vector<16x1xf32>
    %164 = tpu.reciprocal %163 {approx = true} : vector<16x1xf32> -> vector<16x1xf32>
    %165 = vector.broadcast %164 : vector<16x1xf32> to vector<16x16xf32>
    %166 = arith.mulf %161, %165 : vector<16x16xf32>
    %167 = arith.truncf %166 : vector<16x16xf32> to vector<16x16xbf16>
    %cst_59 = arith.constant dense<0.000000e+00> : vector<16x16xf32>
    %168 = tpu.matmul %167, %155, %cst_59 {dimension_numbers = #tpu.dot_dimension_numbers<[1], [0], [0], [1], [0, 0, 1, 1], [], []>} : vector<16x16xbf16>, vector<16x16xbf16>, vector<16x16xf32> -> vector<16x16xf32>
    %169 = arith.truncf %168 : vector<16x16xf32> to vector<16x16xbf16>
    %170 = vector.extract_strided_slice %46 {offsets = [0, 112], sizes = [16, 16], strides = [1, 1]} : vector<16x128xbf16> to vector<16x16xbf16>
    %171 = vector.extract_strided_slice %48 {offsets = [0, 112], sizes = [16, 16], strides = [1, 1]} : vector<16x128xbf16> to vector<16x16xbf16>
    %172 = vector.extract_strided_slice %50 {offsets = [0, 112], sizes = [16, 16], strides = [1, 1]} : vector<16x128xbf16> to vector<16x16xbf16>
    %cst_60 = arith.constant dense<0.000000e+00> : vector<16x16xf32>
    %173 = tpu.matmul %170, %171, %cst_60 {dimension_numbers = #tpu.dot_dimension_numbers<[1], [1], [0], [0], [0, 0, 1, 0], [], []>} : vector<16x16xbf16>, vector<16x16xbf16>, vector<16x16xf32> -> vector<16x16xf32>
    %cst_61 = arith.constant dense<0xFF800000> : vector<16xf32>
    %174 = vector.multi_reduction <maximumf>, %173, %cst_61 [1] : vector<16x16xf32> to vector<16xf32>
    %175 = vector.shape_cast %174 : vector<16xf32> to vector<16x1xf32>
    %176 = vector.broadcast %175 : vector<16x1xf32> to vector<16x16xf32>
    %177 = arith.subf %173, %176 : vector<16x16xf32>
    %178 = math.exp %177 : vector<16x16xf32>
    %cst_62 = arith.constant dense<0.000000e+00> : vector<16xf32>
    %179 = vector.multi_reduction <add>, %178, %cst_62 [1] : vector<16x16xf32> to vector<16xf32>
    %180 = vector.shape_cast %179 : vector<16xf32> to vector<16x1xf32>
    %181 = tpu.reciprocal %180 {approx = true} : vector<16x1xf32> -> vector<16x1xf32>
    %182 = vector.broadcast %181 : vector<16x1xf32> to vector<16x16xf32>
    %183 = arith.mulf %178, %182 : vector<16x16xf32>
    %184 = arith.truncf %183 : vector<16x16xf32> to vector<16x16xbf16>
    %cst_63 = arith.constant dense<0.000000e+00> : vector<16x16xf32>
    %185 = tpu.matmul %184, %172, %cst_63 {dimension_numbers = #tpu.dot_dimension_numbers<[1], [0], [0], [1], [0, 0, 1, 1], [], []>} : vector<16x16xbf16>, vector<16x16xbf16>, vector<16x16xf32> -> vector<16x16xf32>
    %186 = arith.truncf %185 : vector<16x16xf32> to vector<16x16xbf16>
    %187 = tpu.concatenate %67, %84, %101, %118, %135, %152, %169, %186 in 1 : vector<16x16xbf16>, vector<16x16xbf16>, vector<16x16xbf16>, vector<16x16xbf16>, vector<16x16xbf16>, vector<16x16xbf16>, vector<16x16xbf16>, vector<16x16xbf16> -> vector<16x128xbf16>
    %c0_64 = arith.constant 0 : index
    %c0_65 = arith.constant 0 : index
    %188 = vector.load %arg16[%c0_64, %c0_65] : memref<64x128xbf16, #tpu.memory_space<vmem>>, vector<16x128xbf16>
    tpu.vector_store %arg16[%c0_64, %c0_65], %187 {strides = array<i32>} : memref<64x128xbf16, #tpu.memory_space<vmem>>, vector<16x128xbf16>,
    %c0_66 = arith.constant 0 : index
    %c16 = arith.constant 16 : index
    %c0_67 = arith.constant 0 : index
    %189 = vector.load %arg15[%c0_66, %c16, %c0_67] : memref<3x64x128xbf16, #tpu.memory_space<vmem>>, vector<1x16x128xbf16>
    %190 = vector.shape_cast %189 : vector<1x16x128xbf16> to vector<16x128xbf16>
    %c1_68 = arith.constant 1 : index
    %c16_69 = arith.constant 16 : index
    %c0_70 = arith.constant 0 : index
    %191 = vector.load %arg15[%c1_68, %c16_69, %c0_70] : memref<3x64x128xbf16, #tpu.memory_space<vmem>>, vector<1x16x128xbf16>
    %192 = vector.shape_cast %191 : vector<1x16x128xbf16> to vector<16x128xbf16>
    %c2_71 = arith.constant 2 : index
    %c16_72 = arith.constant 16 : index
    %c0_73 = arith.constant 0 : index
    %193 = vector.load %arg15[%c2_71, %c16_72, %c0_73] : memref<3x64x128xbf16, #tpu.memory_space<vmem>>, vector<1x16x128xbf16>
    %194 = vector.shape_cast %193 : vector<1x16x128xbf16> to vector<16x128xbf16>
    %195 = vector.extract_strided_slice %190 {offsets = [0, 0], sizes = [16, 16], strides = [1, 1]} : vector<16x128xbf16> to vector<16x16xbf16>
    %196 = vector.extract_strided_slice %192 {offsets = [0, 0], sizes = [16, 16], strides = [1, 1]} : vector<16x128xbf16> to vector<16x16xbf16>
    %197 = vector.extract_strided_slice %194 {offsets = [0, 0], sizes = [16, 16], strides = [1, 1]} : vector<16x128xbf16> to vector<16x16xbf16>
    %cst_74 = arith.constant dense<0.000000e+00> : vector<16x16xf32>
    %198 = tpu.matmul %195, %196, %cst_74 {dimension_numbers = #tpu.dot_dimension_numbers<[1], [1], [0], [0], [0, 0, 1, 0], [], []>} : vector<16x16xbf16>, vector<16x16xbf16>, vector<16x16xf32> -> vector<16x16xf32>
    %cst_75 = arith.constant dense<0xFF800000> : vector<16xf32>
    %199 = vector.multi_reduction <maximumf>, %198, %cst_75 [1] : vector<16x16xf32> to vector<16xf32>
    %200 = vector.shape_cast %199 : vector<16xf32> to vector<16x1xf32>
    %201 = vector.broadcast %200 : vector<16x1xf32> to vector<16x16xf32>
    %202 = arith.subf %198, %201 : vector<16x16xf32>
    %203 = math.exp %202 : vector<16x16xf32>
    %cst_76 = arith.constant dense<0.000000e+00> : vector<16xf32>
    %204 = vector.multi_reduction <add>, %203, %cst_76 [1] : vector<16x16xf32> to vector<16xf32>
    %205 = vector.shape_cast %204 : vector<16xf32> to vector<16x1xf32>
    %206 = tpu.reciprocal %205 {approx = true} : vector<16x1xf32> -> vector<16x1xf32>
    %207 = vector.broadcast %206 : vector<16x1xf32> to vector<16x16xf32>
    %208 = arith.mulf %203, %207 : vector<16x16xf32>
    %209 = arith.truncf %208 : vector<16x16xf32> to vector<16x16xbf16>
    %cst_77 = arith.constant dense<0.000000e+00> : vector<16x16xf32>
    %210 = tpu.matmul %209, %197, %cst_77 {dimension_numbers = #tpu.dot_dimension_numbers<[1], [0], [0], [1], [0, 0, 1, 1], [], []>} : vector<16x16xbf16>, vector<16x16xbf16>, vector<16x16xf32> -> vector<16x16xf32>
    %211 = arith.truncf %210 : vector<16x16xf32> to vector<16x16xbf16>
    %212 = vector.extract_strided_slice %190 {offsets = [0, 16], sizes = [16, 16], strides = [1, 1]} : vector<16x128xbf16> to vector<16x16xbf16>
    %213 = vector.extract_strided_slice %192 {offsets = [0, 16], sizes = [16, 16], strides = [1, 1]} : vector<16x128xbf16> to vector<16x16xbf16>
    %214 = vector.extract_strided_slice %194 {offsets = [0, 16], sizes = [16, 16], strides = [1, 1]} : vector<16x128xbf16> to vector<16x16xbf16>
    %cst_78 = arith.constant dense<0.000000e+00> : vector<16x16xf32>
    %215 = tpu.matmul %212, %213, %cst_78 {dimension_numbers = #tpu.dot_dimension_numbers<[1], [1], [0], [0], [0, 0, 1, 0], [], []>} : vector<16x16xbf16>, vector<16x16xbf16>, vector<16x16xf32> -> vector<16x16xf32>
    %cst_79 = arith.constant dense<0xFF800000> : vector<16xf32>
    %216 = vector.multi_reduction <maximumf>, %215, %cst_79 [1] : vector<16x16xf32> to vector<16xf32>
    %217 = vector.shape_cast %216 : vector<16xf32> to vector<16x1xf32>
    %218 = vector.broadcast %217 : vector<16x1xf32> to vector<16x16xf32>
    %219 = arith.subf %215, %218 : vector<16x16xf32>
    %220 = math.exp %219 : vector<16x16xf32>
    %cst_80 = arith.constant dense<0.000000e+00> : vector<16xf32>
    %221 = vector.multi_reduction <add>, %220, %cst_80 [1] : vector<16x16xf32> to vector<16xf32>
    %222 = vector.shape_cast %221 : vector<16xf32> to vector<16x1xf32>
    %223 = tpu.reciprocal %222 {approx = true} : vector<16x1xf32> -> vector<16x1xf32>
    %224 = vector.broadcast %223 : vector<16x1xf32> to vector<16x16xf32>
    %225 = arith.mulf %220, %224 : vector<16x16xf32>
    %226 = arith.truncf %225 : vector<16x16xf32> to vector<16x16xbf16>
    %cst_81 = arith.constant dense<0.000000e+00> : vector<16x16xf32>
    %227 = tpu.matmul %226, %214, %cst_81 {dimension_numbers = #tpu.dot_dimension_numbers<[1], [0], [0], [1], [0, 0, 1, 1], [], []>} : vector<16x16xbf16>, vector<16x16xbf16>, vector<16x16xf32> -> vector<16x16xf32>
    %228 = arith.truncf %227 : vector<16x16xf32> to vector<16x16xbf16>
    %229 = vector.extract_strided_slice %190 {offsets = [0, 32], sizes = [16, 16], strides = [1, 1]} : vector<16x128xbf16> to vector<16x16xbf16>
    %230 = vector.extract_strided_slice %192 {offsets = [0, 32], sizes = [16, 16], strides = [1, 1]} : vector<16x128xbf16> to vector<16x16xbf16>
    %231 = vector.extract_strided_slice %194 {offsets = [0, 32], sizes = [16, 16], strides = [1, 1]} : vector<16x128xbf16> to vector<16x16xbf16>
    %cst_82 = arith.constant dense<0.000000e+00> : vector<16x16xf32>
    %232 = tpu.matmul %229, %230, %cst_82 {dimension_numbers = #tpu.dot_dimension_numbers<[1], [1], [0], [0], [0, 0, 1, 0], [], []>} : vector<16x16xbf16>, vector<16x16xbf16>, vector<16x16xf32> -> vector<16x16xf32>
    %cst_83 = arith.constant dense<0xFF800000> : vector<16xf32>
    %233 = vector.multi_reduction <maximumf>, %232, %cst_83 [1] : vector<16x16xf32> to vector<16xf32>
    %234 = vector.shape_cast %233 : vector<16xf32> to vector<16x1xf32>
    %235 = vector.broadcast %234 : vector<16x1xf32> to vector<16x16xf32>
    %236 = arith.subf %232, %235 : vector<16x16xf32>
    %237 = math.exp %236 : vector<16x16xf32>
    %cst_84 = arith.constant dense<0.000000e+00> : vector<16xf32>
    %238 = vector.multi_reduction <add>, %237, %cst_84 [1] : vector<16x16xf32> to vector<16xf32>
    %239 = vector.shape_cast %238 : vector<16xf32> to vector<16x1xf32>
    %240 = tpu.reciprocal %239 {approx = true} : vector<16x1xf32> -> vector<16x1xf32>
    %241 = vector.broadcast %240 : vector<16x1xf32> to vector<16x16xf32>
    %242 = arith.mulf %237, %241 : vector<16x16xf32>
    %243 = arith.truncf %242 : vector<16x16xf32> to vector<16x16xbf16>
    %cst_85 = arith.constant dense<0.000000e+00> : vector<16x16xf32>
    %244 = tpu.matmul %243, %231, %cst_85 {dimension_numbers = #tpu.dot_dimension_numbers<[1], [0], [0], [1], [0, 0, 1, 1], [], []>} : vector<16x16xbf16>, vector<16x16xbf16>, vector<16x16xf32> -> vector<16x16xf32>
    %245 = arith.truncf %244 : vector<16x16xf32> to vector<16x16xbf16>
    %246 = vector.extract_strided_slice %190 {offsets = [0, 48], sizes = [16, 16], strides = [1, 1]} : vector<16x128xbf16> to vector<16x16xbf16>
    %247 = vector.extract_strided_slice %192 {offsets = [0, 48], sizes = [16, 16], strides = [1, 1]} : vector<16x128xbf16> to vector<16x16xbf16>
    %248 = vector.extract_strided_slice %194 {offsets = [0, 48], sizes = [16, 16], strides = [1, 1]} : vector<16x128xbf16> to vector<16x16xbf16>
    %cst_86 = arith.constant dense<0.000000e+00> : vector<16x16xf32>
    %249 = tpu.matmul %246, %247, %cst_86 {dimension_numbers = #tpu.dot_dimension_numbers<[1], [1], [0], [0], [0, 0, 1, 0], [], []>} : vector<16x16xbf16>, vector<16x16xbf16>, vector<16x16xf32> -> vector<16x16xf32>
    %cst_87 = arith.constant dense<0xFF800000> : vector<16xf32>
    %250 = vector.multi_reduction <maximumf>, %249, %cst_87 [1] : vector<16x16xf32> to vector<16xf32>
    %251 = vector.shape_cast %250 : vector<16xf32> to vector<16x1xf32>
    %252 = vector.broadcast %251 : vector<16x1xf32> to vector<16x16xf32>
    %253 = arith.subf %249, %252 : vector<16x16xf32>
    %254 = math.exp %253 : vector<16x16xf32>
    %cst_88 = arith.constant dense<0.000000e+00> : vector<16xf32>
    %255 = vector.multi_reduction <add>, %254, %cst_88 [1] : vector<16x16xf32> to vector<16xf32>
    %256 = vector.shape_cast %255 : vector<16xf32> to vector<16x1xf32>
    %257 = tpu.reciprocal %256 {approx = true} : vector<16x1xf32> -> vector<16x1xf32>
    %258 = vector.broadcast %257 : vector<16x1xf32> to vector<16x16xf32>
    %259 = arith.mulf %254, %258 : vector<16x16xf32>
    %260 = arith.truncf %259 : vector<16x16xf32> to vector<16x16xbf16>
    %cst_89 = arith.constant dense<0.000000e+00> : vector<16x16xf32>
    %261 = tpu.matmul %260, %248, %cst_89 {dimension_numbers = #tpu.dot_dimension_numbers<[1], [0], [0], [1], [0, 0, 1, 1], [], []>} : vector<16x16xbf16>, vector<16x16xbf16>, vector<16x16xf32> -> vector<16x16xf32>
    %262 = arith.truncf %261 : vector<16x16xf32> to vector<16x16xbf16>
    %263 = vector.extract_strided_slice %190 {offsets = [0, 64], sizes = [16, 16], strides = [1, 1]} : vector<16x128xbf16> to vector<16x16xbf16>
    %264 = vector.extract_strided_slice %192 {offsets = [0, 64], sizes = [16, 16], strides = [1, 1]} : vector<16x128xbf16> to vector<16x16xbf16>
    %265 = vector.extract_strided_slice %194 {offsets = [0, 64], sizes = [16, 16], strides = [1, 1]} : vector<16x128xbf16> to vector<16x16xbf16>
    %cst_90 = arith.constant dense<0.000000e+00> : vector<16x16xf32>
    %266 = tpu.matmul %263, %264, %cst_90 {dimension_numbers = #tpu.dot_dimension_numbers<[1], [1], [0], [0], [0, 0, 1, 0], [], []>} : vector<16x16xbf16>, vector<16x16xbf16>, vector<16x16xf32> -> vector<16x16xf32>
    %cst_91 = arith.constant dense<0xFF800000> : vector<16xf32>
    %267 = vector.multi_reduction <maximumf>, %266, %cst_91 [1] : vector<16x16xf32> to vector<16xf32>
    %268 = vector.shape_cast %267 : vector<16xf32> to vector<16x1xf32>
    %269 = vector.broadcast %268 : vector<16x1xf32> to vector<16x16xf32>
    %270 = arith.subf %266, %269 : vector<16x16xf32>
    %271 = math.exp %270 : vector<16x16xf32>
    %cst_92 = arith.constant dense<0.000000e+00> : vector<16xf32>
    %272 = vector.multi_reduction <add>, %271, %cst_92 [1] : vector<16x16xf32> to vector<16xf32>
    %273 = vector.shape_cast %272 : vector<16xf32> to vector<16x1xf32>
    %274 = tpu.reciprocal %273 {approx = true} : vector<16x1xf32> -> vector<16x1xf32>
    %275 = vector.broadcast %274 : vector<16x1xf32> to vector<16x16xf32>
    %276 = arith.mulf %271, %275 : vector<16x16xf32>
    %277 = arith.truncf %276 : vector<16x16xf32> to vector<16x16xbf16>
    %cst_93 = arith.constant dense<0.000000e+00> : vector<16x16xf32>
    %278 = tpu.matmul %277, %265, %cst_93 {dimension_numbers = #tpu.dot_dimension_numbers<[1], [0], [0], [1], [0, 0, 1, 1], [], []>} : vector<16x16xbf16>, vector<16x16xbf16>, vector<16x16xf32> -> vector<16x16xf32>
    %279 = arith.truncf %278 : vector<16x16xf32> to vector<16x16xbf16>
    %280 = vector.extract_strided_slice %190 {offsets = [0, 80], sizes = [16, 16], strides = [1, 1]} : vector<16x128xbf16> to vector<16x16xbf16>
    %281 = vector.extract_strided_slice %192 {offsets = [0, 80], sizes = [16, 16], strides = [1, 1]} : vector<16x128xbf16> to vector<16x16xbf16>
    %282 = vector.extract_strided_slice %194 {offsets = [0, 80], sizes = [16, 16], strides = [1, 1]} : vector<16x128xbf16> to vector<16x16xbf16>
    %cst_94 = arith.constant dense<0.000000e+00> : vector<16x16xf32>
    %283 = tpu.matmul %280, %281, %cst_94 {dimension_numbers = #tpu.dot_dimension_numbers<[1], [1], [0], [0], [0, 0, 1, 0], [], []>} : vector<16x16xbf16>, vector<16x16xbf16>, vector<16x16xf32> -> vector<16x16xf32>
    %cst_95 = arith.constant dense<0xFF800000> : vector<16xf32>
    %284 = vector.multi_reduction <maximumf>, %283, %cst_95 [1] : vector<16x16xf32> to vector<16xf32>
    %285 = vector.shape_cast %284 : vector<16xf32> to vector<16x1xf32>
    %286 = vector.broadcast %285 : vector<16x1xf32> to vector<16x16xf32>
    %287 = arith.subf %283, %286 : vector<16x16xf32>
    %288 = math.exp %287 : vector<16x16xf32>
    %cst_96 = arith.constant dense<0.000000e+00> : vector<16xf32>
    %289 = vector.multi_reduction <add>, %288, %cst_96 [1] : vector<16x16xf32> to vector<16xf32>
    %290 = vector.shape_cast %289 : vector<16xf32> to vector<16x1xf32>
    %291 = tpu.reciprocal %290 {approx = true} : vector<16x1xf32> -> vector<16x1xf32>
    %292 = vector.broadcast %291 : vector<16x1xf32> to vector<16x16xf32>
    %293 = arith.mulf %288, %292 : vector<16x16xf32>
    %294 = arith.truncf %293 : vector<16x16xf32> to vector<16x16xbf16>
    %cst_97 = arith.constant dense<0.000000e+00> : vector<16x16xf32>
    %295 = tpu.matmul %294, %282, %cst_97 {dimension_numbers = #tpu.dot_dimension_numbers<[1], [0], [0], [1], [0, 0, 1, 1], [], []>} : vector<16x16xbf16>, vector<16x16xbf16>, vector<16x16xf32> -> vector<16x16xf32>
    %296 = arith.truncf %295 : vector<16x16xf32> to vector<16x16xbf16>
    %297 = vector.extract_strided_slice %190 {offsets = [0, 96], sizes = [16, 16], strides = [1, 1]} : vector<16x128xbf16> to vector<16x16xbf16>
    %298 = vector.extract_strided_slice %192 {offsets = [0, 96], sizes = [16, 16], strides = [1, 1]} : vector<16x128xbf16> to vector<16x16xbf16>
    %299 = vector.extract_strided_slice %194 {offsets = [0, 96], sizes = [16, 16], strides = [1, 1]} : vector<16x128xbf16> to vector<16x16xbf16>
    %cst_98 = arith.constant dense<0.000000e+00> : vector<16x16xf32>
    %300 = tpu.matmul %297, %298, %cst_98 {dimension_numbers = #tpu.dot_dimension_numbers<[1], [1], [0], [0], [0, 0, 1, 0], [], []>} : vector<16x16xbf16>, vector<16x16xbf16>, vector<16x16xf32> -> vector<16x16xf32>
    %cst_99 = arith.constant dense<0xFF800000> : vector<16xf32>
    %301 = vector.multi_reduction <maximumf>, %300, %cst_99 [1] : vector<16x16xf32> to vector<16xf32>
    %302 = vector.shape_cast %301 : vector<16xf32> to vector<16x1xf32>
    %303 = vector.broadcast %302 : vector<16x1xf32> to vector<16x16xf32>
    %304 = arith.subf %300, %303 : vector<16x16xf32>
    %305 = math.exp %304 : vector<16x16xf32>
    %cst_100 = arith.constant dense<0.000000e+00> : vector<16xf32>
    %306 = vector.multi_reduction <add>, %305, %cst_100 [1] : vector<16x16xf32> to vector<16xf32>
    %307 = vector.shape_cast %306 : vector<16xf32> to vector<16x1xf32>
    %308 = tpu.reciprocal %307 {approx = true} : vector<16x1xf32> -> vector<16x1xf32>
    %309 = vector.broadcast %308 : vector<16x1xf32> to vector<16x16xf32>
    %310 = arith.mulf %305, %309 : vector<16x16xf32>
    %311 = arith.truncf %310 : vector<16x16xf32> to vector<16x16xbf16>
    %cst_101 = arith.constant dense<0.000000e+00> : vector<16x16xf32>
    %312 = tpu.matmul %311, %299, %cst_101 {dimension_numbers = #tpu.dot_dimension_numbers<[1], [0], [0], [1], [0, 0, 1, 1], [], []>} : vector<16x16xbf16>, vector<16x16xbf16>, vector<16x16xf32> -> vector<16x16xf32>
    %313 = arith.truncf %312 : vector<16x16xf32> to vector<16x16xbf16>
    %314 = vector.extract_strided_slice %190 {offsets = [0, 112], sizes = [16, 16], strides = [1, 1]} : vector<16x128xbf16> to vector<16x16xbf16>
    %315 = vector.extract_strided_slice %192 {offsets = [0, 112], sizes = [16, 16], strides = [1, 1]} : vector<16x128xbf16> to vector<16x16xbf16>
    %316 = vector.extract_strided_slice %194 {offsets = [0, 112], sizes = [16, 16], strides = [1, 1]} : vector<16x128xbf16> to vector<16x16xbf16>
    %cst_102 = arith.constant dense<0.000000e+00> : vector<16x16xf32>
    %317 = tpu.matmul %314, %315, %cst_102 {dimension_numbers = #tpu.dot_dimension_numbers<[1], [1], [0], [0], [0, 0, 1, 0], [], []>} : vector<16x16xbf16>, vector<16x16xbf16>, vector<16x16xf32> -> vector<16x16xf32>
    %cst_103 = arith.constant dense<0xFF800000> : vector<16xf32>
    %318 = vector.multi_reduction <maximumf>, %317, %cst_103 [1] : vector<16x16xf32> to vector<16xf32>
    %319 = vector.shape_cast %318 : vector<16xf32> to vector<16x1xf32>
    %320 = vector.broadcast %319 : vector<16x1xf32> to vector<16x16xf32>
    %321 = arith.subf %317, %320 : vector<16x16xf32>
    %322 = math.exp %321 : vector<16x16xf32>
    %cst_104 = arith.constant dense<0.000000e+00> : vector<16xf32>
    %323 = vector.multi_reduction <add>, %322, %cst_104 [1] : vector<16x16xf32> to vector<16xf32>
    %324 = vector.shape_cast %323 : vector<16xf32> to vector<16x1xf32>
    %325 = tpu.reciprocal %324 {approx = true} : vector<16x1xf32> -> vector<16x1xf32>
    %326 = vector.broadcast %325 : vector<16x1xf32> to vector<16x16xf32>
    %327 = arith.mulf %322, %326 : vector<16x16xf32>
    %328 = arith.truncf %327 : vector<16x16xf32> to vector<16x16xbf16>
    %cst_105 = arith.constant dense<0.000000e+00> : vector<16x16xf32>
    %329 = tpu.matmul %328, %316, %cst_105 {dimension_numbers = #tpu.dot_dimension_numbers<[1], [0], [0], [1], [0, 0, 1, 1], [], []>} : vector<16x16xbf16>, vector<16x16xbf16>, vector<16x16xf32> -> vector<16x16xf32>
    %330 = arith.truncf %329 : vector<16x16xf32> to vector<16x16xbf16>
    %331 = tpu.concatenate %211, %228, %245, %262, %279, %296, %313, %330 in 1 : vector<16x16xbf16>, vector<16x16xbf16>, vector<16x16xbf16>, vector<16x16xbf16>, vector<16x16xbf16>, vector<16x16xbf16>, vector<16x16xbf16>, vector<16x16xbf16> -> vector<16x128xbf16>
    %c16_106 = arith.constant 16 : index
    %c0_107 = arith.constant 0 : index
    %332 = vector.load %arg16[%c16_106, %c0_107] : memref<64x128xbf16, #tpu.memory_space<vmem>>, vector<16x128xbf16>
    tpu.vector_store %arg16[%c16_106, %c0_107], %331 {strides = array<i32>} : memref<64x128xbf16, #tpu.memory_space<vmem>>, vector<16x128xbf16>,
    %c0_108 = arith.constant 0 : index
    %c32 = arith.constant 32 : index
    %c0_109 = arith.constant 0 : index
    %333 = vector.load %arg15[%c0_108, %c32, %c0_109] : memref<3x64x128xbf16, #tpu.memory_space<vmem>>, vector<1x16x128xbf16>
    %334 = vector.shape_cast %333 : vector<1x16x128xbf16> to vector<16x128xbf16>
    %c1_110 = arith.constant 1 : index
    %c32_111 = arith.constant 32 : index
    %c0_112 = arith.constant 0 : index
    %335 = vector.load %arg15[%c1_110, %c32_111, %c0_112] : memref<3x64x128xbf16, #tpu.memory_space<vmem>>, vector<1x16x128xbf16>
    %336 = vector.shape_cast %335 : vector<1x16x128xbf16> to vector<16x128xbf16>
    %c2_113 = arith.constant 2 : index
    %c32_114 = arith.constant 32 : index
    %c0_115 = arith.constant 0 : index
    %337 = vector.load %arg15[%c2_113, %c32_114, %c0_115] : memref<3x64x128xbf16, #tpu.memory_space<vmem>>, vector<1x16x128xbf16>
    %338 = vector.shape_cast %337 : vector<1x16x128xbf16> to vector<16x128xbf16>
    %339 = vector.extract_strided_slice %334 {offsets = [0, 0], sizes = [16, 16], strides = [1, 1]} : vector<16x128xbf16> to vector<16x16xbf16>
    %340 = vector.extract_strided_slice %336 {offsets = [0, 0], sizes = [16, 16], strides = [1, 1]} : vector<16x128xbf16> to vector<16x16xbf16>
    %341 = vector.extract_strided_slice %338 {offsets = [0, 0], sizes = [16, 16], strides = [1, 1]} : vector<16x128xbf16> to vector<16x16xbf16>
    %cst_116 = arith.constant dense<0.000000e+00> : vector<16x16xf32>
    %342 = tpu.matmul %339, %340, %cst_116 {dimension_numbers = #tpu.dot_dimension_numbers<[1], [1], [0], [0], [0, 0, 1, 0], [], []>} : vector<16x16xbf16>, vector<16x16xbf16>, vector<16x16xf32> -> vector<16x16xf32>
    %cst_117 = arith.constant dense<0xFF800000> : vector<16xf32>
    %343 = vector.multi_reduction <maximumf>, %342, %cst_117 [1] : vector<16x16xf32> to vector<16xf32>
    %344 = vector.shape_cast %343 : vector<16xf32> to vector<16x1xf32>
    %345 = vector.broadcast %344 : vector<16x1xf32> to vector<16x16xf32>
    %346 = arith.subf %342, %345 : vector<16x16xf32>
    %347 = math.exp %346 : vector<16x16xf32>
    %cst_118 = arith.constant dense<0.000000e+00> : vector<16xf32>
    %348 = vector.multi_reduction <add>, %347, %cst_118 [1] : vector<16x16xf32> to vector<16xf32>
    %349 = vector.shape_cast %348 : vector<16xf32> to vector<16x1xf32>
    %350 = tpu.reciprocal %349 {approx = true} : vector<16x1xf32> -> vector<16x1xf32>
    %351 = vector.broadcast %350 : vector<16x1xf32> to vector<16x16xf32>
    %352 = arith.mulf %347, %351 : vector<16x16xf32>
    %353 = arith.truncf %352 : vector<16x16xf32> to vector<16x16xbf16>
    %cst_119 = arith.constant dense<0.000000e+00> : vector<16x16xf32>
    %354 = tpu.matmul %353, %341, %cst_119 {dimension_numbers = #tpu.dot_dimension_numbers<[1], [0], [0], [1], [0, 0, 1, 1], [], []>} : vector<16x16xbf16>, vector<16x16xbf16>, vector<16x16xf32> -> vector<16x16xf32>
    %355 = arith.truncf %354 : vector<16x16xf32> to vector<16x16xbf16>
    %356 = vector.extract_strided_slice %334 {offsets = [0, 16], sizes = [16, 16], strides = [1, 1]} : vector<16x128xbf16> to vector<16x16xbf16>
    %357 = vector.extract_strided_slice %336 {offsets = [0, 16], sizes = [16, 16], strides = [1, 1]} : vector<16x128xbf16> to vector<16x16xbf16>
    %358 = vector.extract_strided_slice %338 {offsets = [0, 16], sizes = [16, 16], strides = [1, 1]} : vector<16x128xbf16> to vector<16x16xbf16>
    %cst_120 = arith.constant dense<0.000000e+00> : vector<16x16xf32>
    %359 = tpu.matmul %356, %357, %cst_120 {dimension_numbers = #tpu.dot_dimension_numbers<[1], [1], [0], [0], [0, 0, 1, 0], [], []>} : vector<16x16xbf16>, vector<16x16xbf16>, vector<16x16xf32> -> vector<16x16xf32>
    %cst_121 = arith.constant dense<0xFF800000> : vector<16xf32>
    %360 = vector.multi_reduction <maximumf>, %359, %cst_121 [1] : vector<16x16xf32> to vector<16xf32>
    %361 = vector.shape_cast %360 : vector<16xf32> to vector<16x1xf32>
    %362 = vector.broadcast %361 : vector<16x1xf32> to vector<16x16xf32>
    %363 = arith.subf %359, %362 : vector<16x16xf32>
    %364 = math.exp %363 : vector<16x16xf32>
    %cst_122 = arith.constant dense<0.000000e+00> : vector<16xf32>
    %365 = vector.multi_reduction <add>, %364, %cst_122 [1] : vector<16x16xf32> to vector<16xf32>
    %366 = vector.shape_cast %365 : vector<16xf32> to vector<16x1xf32>
    %367 = tpu.reciprocal %366 {approx = true} : vector<16x1xf32> -> vector<16x1xf32>
    %368 = vector.broadcast %367 : vector<16x1xf32> to vector<16x16xf32>
    %369 = arith.mulf %364, %368 : vector<16x16xf32>
    %370 = arith.truncf %369 : vector<16x16xf32> to vector<16x16xbf16>
    %cst_123 = arith.constant dense<0.000000e+00> : vector<16x16xf32>
    %371 = tpu.matmul %370, %358, %cst_123 {dimension_numbers = #tpu.dot_dimension_numbers<[1], [0], [0], [1], [0, 0, 1, 1], [], []>} : vector<16x16xbf16>, vector<16x16xbf16>, vector<16x16xf32> -> vector<16x16xf32>
    %372 = arith.truncf %371 : vector<16x16xf32> to vector<16x16xbf16>
    %373 = vector.extract_strided_slice %334 {offsets = [0, 32], sizes = [16, 16], strides = [1, 1]} : vector<16x128xbf16> to vector<16x16xbf16>
    %374 = vector.extract_strided_slice %336 {offsets = [0, 32], sizes = [16, 16], strides = [1, 1]} : vector<16x128xbf16> to vector<16x16xbf16>
    %375 = vector.extract_strided_slice %338 {offsets = [0, 32], sizes = [16, 16], strides = [1, 1]} : vector<16x128xbf16> to vector<16x16xbf16>
    %cst_124 = arith.constant dense<0.000000e+00> : vector<16x16xf32>
    %376 = tpu.matmul %373, %374, %cst_124 {dimension_numbers = #tpu.dot_dimension_numbers<[1], [1], [0], [0], [0, 0, 1, 0], [], []>} : vector<16x16xbf16>, vector<16x16xbf16>, vector<16x16xf32> -> vector<16x16xf32>
    %cst_125 = arith.constant dense<0xFF800000> : vector<16xf32>
    %377 = vector.multi_reduction <maximumf>, %376, %cst_125 [1] : vector<16x16xf32> to vector<16xf32>
    %378 = vector.shape_cast %377 : vector<16xf32> to vector<16x1xf32>
    %379 = vector.broadcast %378 : vector<16x1xf32> to vector<16x16xf32>
    %380 = arith.subf %376, %379 : vector<16x16xf32>
    %381 = math.exp %380 : vector<16x16xf32>
    %cst_126 = arith.constant dense<0.000000e+00> : vector<16xf32>
    %382 = vector.multi_reduction <add>, %381, %cst_126 [1] : vector<16x16xf32> to vector<16xf32>
    %383 = vector.shape_cast %382 : vector<16xf32> to vector<16x1xf32>
    %384 = tpu.reciprocal %383 {approx = true} : vector<16x1xf32> -> vector<16x1xf32>
    %385 = vector.broadcast %384 : vector<16x1xf32> to vector<16x16xf32>
    %386 = arith.mulf %381, %385 : vector<16x16xf32>
    %387 = arith.truncf %386 : vector<16x16xf32> to vector<16x16xbf16>
    %cst_127 = arith.constant dense<0.000000e+00> : vector<16x16xf32>
    %388 = tpu.matmul %387, %375, %cst_127 {dimension_numbers = #tpu.dot_dimension_numbers<[1], [0], [0], [1], [0, 0, 1, 1], [], []>} : vector<16x16xbf16>, vector<16x16xbf16>, vector<16x16xf32> -> vector<16x16xf32>
    %389 = arith.truncf %388 : vector<16x16xf32> to vector<16x16xbf16>
    %390 = vector.extract_strided_slice %334 {offsets = [0, 48], sizes = [16, 16], strides = [1, 1]} : vector<16x128xbf16> to vector<16x16xbf16>
    %391 = vector.extract_strided_slice %336 {offsets = [0, 48], sizes = [16, 16], strides = [1, 1]} : vector<16x128xbf16> to vector<16x16xbf16>
    %392 = vector.extract_strided_slice %338 {offsets = [0, 48], sizes = [16, 16], strides = [1, 1]} : vector<16x128xbf16> to vector<16x16xbf16>
    %cst_128 = arith.constant dense<0.000000e+00> : vector<16x16xf32>
    %393 = tpu.matmul %390, %391, %cst_128 {dimension_numbers = #tpu.dot_dimension_numbers<[1], [1], [0], [0], [0, 0, 1, 0], [], []>} : vector<16x16xbf16>, vector<16x16xbf16>, vector<16x16xf32> -> vector<16x16xf32>
    %cst_129 = arith.constant dense<0xFF800000> : vector<16xf32>
    %394 = vector.multi_reduction <maximumf>, %393, %cst_129 [1] : vector<16x16xf32> to vector<16xf32>
    %395 = vector.shape_cast %394 : vector<16xf32> to vector<16x1xf32>
    %396 = vector.broadcast %395 : vector<16x1xf32> to vector<16x16xf32>
    %397 = arith.subf %393, %396 : vector<16x16xf32>
    %398 = math.exp %397 : vector<16x16xf32>
    %cst_130 = arith.constant dense<0.000000e+00> : vector<16xf32>
    %399 = vector.multi_reduction <add>, %398, %cst_130 [1] : vector<16x16xf32> to vector<16xf32>
    %400 = vector.shape_cast %399 : vector<16xf32> to vector<16x1xf32>
    %401 = tpu.reciprocal %400 {approx = true} : vector<16x1xf32> -> vector<16x1xf32>
    %402 = vector.broadcast %401 : vector<16x1xf32> to vector<16x16xf32>
    %403 = arith.mulf %398, %402 : vector<16x16xf32>
    %404 = arith.truncf %403 : vector<16x16xf32> to vector<16x16xbf16>
    %cst_131 = arith.constant dense<0.000000e+00> : vector<16x16xf32>
    %405 = tpu.matmul %404, %392, %cst_131 {dimension_numbers = #tpu.dot_dimension_numbers<[1], [0], [0], [1], [0, 0, 1, 1], [], []>} : vector<16x16xbf16>, vector<16x16xbf16>, vector<16x16xf32> -> vector<16x16xf32>
    %406 = arith.truncf %405 : vector<16x16xf32> to vector<16x16xbf16>
    %407 = vector.extract_strided_slice %334 {offsets = [0, 64], sizes = [16, 16], strides = [1, 1]} : vector<16x128xbf16> to vector<16x16xbf16>
    %408 = vector.extract_strided_slice %336 {offsets = [0, 64], sizes = [16, 16], strides = [1, 1]} : vector<16x128xbf16> to vector<16x16xbf16>
    %409 = vector.extract_strided_slice %338 {offsets = [0, 64], sizes = [16, 16], strides = [1, 1]} : vector<16x128xbf16> to vector<16x16xbf16>
    %cst_132 = arith.constant dense<0.000000e+00> : vector<16x16xf32>
    %410 = tpu.matmul %407, %408, %cst_132 {dimension_numbers = #tpu.dot_dimension_numbers<[1], [1], [0], [0], [0, 0, 1, 0], [], []>} : vector<16x16xbf16>, vector<16x16xbf16>, vector<16x16xf32> -> vector<16x16xf32>
    %cst_133 = arith.constant dense<0xFF800000> : vector<16xf32>
    %411 = vector.multi_reduction <maximumf>, %410, %cst_133 [1] : vector<16x16xf32> to vector<16xf32>
    %412 = vector.shape_cast %411 : vector<16xf32> to vector<16x1xf32>
    %413 = vector.broadcast %412 : vector<16x1xf32> to vector<16x16xf32>
    %414 = arith.subf %410, %413 : vector<16x16xf32>
    %415 = math.exp %414 : vector<16x16xf32>
    %cst_134 = arith.constant dense<0.000000e+00> : vector<16xf32>
    %416 = vector.multi_reduction <add>, %415, %cst_134 [1] : vector<16x16xf32> to vector<16xf32>
    %417 = vector.shape_cast %416 : vector<16xf32> to vector<16x1xf32>
    %418 = tpu.reciprocal %417 {approx = true} : vector<16x1xf32> -> vector<16x1xf32>
    %419 = vector.broadcast %418 : vector<16x1xf32> to vector<16x16xf32>
    %420 = arith.mulf %415, %419 : vector<16x16xf32>
    %421 = arith.truncf %420 : vector<16x16xf32> to vector<16x16xbf16>
    %cst_135 = arith.constant dense<0.000000e+00> : vector<16x16xf32>
    %422 = tpu.matmul %421, %409, %cst_135 {dimension_numbers = #tpu.dot_dimension_numbers<[1], [0], [0], [1], [0, 0, 1, 1], [], []>} : vector<16x16xbf16>, vector<16x16xbf16>, vector<16x16xf32> -> vector<16x16xf32>
    %423 = arith.truncf %422 : vector<16x16xf32> to vector<16x16xbf16>
    %424 = vector.extract_strided_slice %334 {offsets = [0, 80], sizes = [16, 16], strides = [1, 1]} : vector<16x128xbf16> to vector<16x16xbf16>
    %425 = vector.extract_strided_slice %336 {offsets = [0, 80], sizes = [16, 16], strides = [1, 1]} : vector<16x128xbf16> to vector<16x16xbf16>
    %426 = vector.extract_strided_slice %338 {offsets = [0, 80], sizes = [16, 16], strides = [1, 1]} : vector<16x128xbf16> to vector<16x16xbf16>
    %cst_136 = arith.constant dense<0.000000e+00> : vector<16x16xf32>
    %427 = tpu.matmul %424, %425, %cst_136 {dimension_numbers = #tpu.dot_dimension_numbers<[1], [1], [0], [0], [0, 0, 1, 0], [], []>} : vector<16x16xbf16>, vector<16x16xbf16>, vector<16x16xf32> -> vector<16x16xf32>
    %cst_137 = arith.constant dense<0xFF800000> : vector<16xf32>
    %428 = vector.multi_reduction <maximumf>, %427, %cst_137 [1] : vector<16x16xf32> to vector<16xf32>
    %429 = vector.shape_cast %428 : vector<16xf32> to vector<16x1xf32>
    %430 = vector.broadcast %429 : vector<16x1xf32> to vector<16x16xf32>
    %431 = arith.subf %427, %430 : vector<16x16xf32>
    %432 = math.exp %431 : vector<16x16xf32>
    %cst_138 = arith.constant dense<0.000000e+00> : vector<16xf32>
    %433 = vector.multi_reduction <add>, %432, %cst_138 [1] : vector<16x16xf32> to vector<16xf32>
    %434 = vector.shape_cast %433 : vector<16xf32> to vector<16x1xf32>
    %435 = tpu.reciprocal %434 {approx = true} : vector<16x1xf32> -> vector<16x1xf32>
    %436 = vector.broadcast %435 : vector<16x1xf32> to vector<16x16xf32>
    %437 = arith.mulf %432, %436 : vector<16x16xf32>
    %438 = arith.truncf %437 : vector<16x16xf32> to vector<16x16xbf16>
    %cst_139 = arith.constant dense<0.000000e+00> : vector<16x16xf32>
    %439 = tpu.matmul %438, %426, %cst_139 {dimension_numbers = #tpu.dot_dimension_numbers<[1], [0], [0], [1], [0, 0, 1, 1], [], []>} : vector<16x16xbf16>, vector<16x16xbf16>, vector<16x16xf32> -> vector<16x16xf32>
    %440 = arith.truncf %439 : vector<16x16xf32> to vector<16x16xbf16>
    %441 = vector.extract_strided_slice %334 {offsets = [0, 96], sizes = [16, 16], strides = [1, 1]} : vector<16x128xbf16> to vector<16x16xbf16>
    %442 = vector.extract_strided_slice %336 {offsets = [0, 96], sizes = [16, 16], strides = [1, 1]} : vector<16x128xbf16> to vector<16x16xbf16>
    %443 = vector.extract_strided_slice %338 {offsets = [0, 96], sizes = [16, 16], strides = [1, 1]} : vector<16x128xbf16> to vector<16x16xbf16>
    %cst_140 = arith.constant dense<0.000000e+00> : vector<16x16xf32>
    %444 = tpu.matmul %441, %442, %cst_140 {dimension_numbers = #tpu.dot_dimension_numbers<[1], [1], [0], [0], [0, 0, 1, 0], [], []>} : vector<16x16xbf16>, vector<16x16xbf16>, vector<16x16xf32> -> vector<16x16xf32>
    %cst_141 = arith.constant dense<0xFF800000> : vector<16xf32>
    %445 = vector.multi_reduction <maximumf>, %444, %cst_141 [1] : vector<16x16xf32> to vector<16xf32>
    %446 = vector.shape_cast %445 : vector<16xf32> to vector<16x1xf32>
    %447 = vector.broadcast %446 : vector<16x1xf32> to vector<16x16xf32>
    %448 = arith.subf %444, %447 : vector<16x16xf32>
    %449 = math.exp %448 : vector<16x16xf32>
    %cst_142 = arith.constant dense<0.000000e+00> : vector<16xf32>
    %450 = vector.multi_reduction <add>, %449, %cst_142 [1] : vector<16x16xf32> to vector<16xf32>
    %451 = vector.shape_cast %450 : vector<16xf32> to vector<16x1xf32>
    %452 = tpu.reciprocal %451 {approx = true} : vector<16x1xf32> -> vector<16x1xf32>
    %453 = vector.broadcast %452 : vector<16x1xf32> to vector<16x16xf32>
    %454 = arith.mulf %449, %453 : vector<16x16xf32>
    %455 = arith.truncf %454 : vector<16x16xf32> to vector<16x16xbf16>
    %cst_143 = arith.constant dense<0.000000e+00> : vector<16x16xf32>
    %456 = tpu.matmul %455, %443, %cst_143 {dimension_numbers = #tpu.dot_dimension_numbers<[1], [0], [0], [1], [0, 0, 1, 1], [], []>} : vector<16x16xbf16>, vector<16x16xbf16>, vector<16x16xf32> -> vector<16x16xf32>
    %457 = arith.truncf %456 : vector<16x16xf32> to vector<16x16xbf16>
    %458 = vector.extract_strided_slice %334 {offsets = [0, 112], sizes = [16, 16], strides = [1, 1]} : vector<16x128xbf16> to vector<16x16xbf16>
    %459 = vector.extract_strided_slice %336 {offsets = [0, 112], sizes = [16, 16], strides = [1, 1]} : vector<16x128xbf16> to vector<16x16xbf16>
    %460 = vector.extract_strided_slice %338 {offsets = [0, 112], sizes = [16, 16], strides = [1, 1]} : vector<16x128xbf16> to vector<16x16xbf16>
    %cst_144 = arith.constant dense<0.000000e+00> : vector<16x16xf32>
    %461 = tpu.matmul %458, %459, %cst_144 {dimension_numbers = #tpu.dot_dimension_numbers<[1], [1], [0], [0], [0, 0, 1, 0], [], []>} : vector<16x16xbf16>, vector<16x16xbf16>, vector<16x16xf32> -> vector<16x16xf32>
    %cst_145 = arith.constant dense<0xFF800000> : vector<16xf32>
    %462 = vector.multi_reduction <maximumf>, %461, %cst_145 [1] : vector<16x16xf32> to vector<16xf32>
    %463 = vector.shape_cast %462 : vector<16xf32> to vector<16x1xf32>
    %464 = vector.broadcast %463 : vector<16x1xf32> to vector<16x16xf32>
    %465 = arith.subf %461, %464 : vector<16x16xf32>
    %466 = math.exp %465 : vector<16x16xf32>
    %cst_146 = arith.constant dense<0.000000e+00> : vector<16xf32>
    %467 = vector.multi_reduction <add>, %466, %cst_146 [1] : vector<16x16xf32> to vector<16xf32>
    %468 = vector.shape_cast %467 : vector<16xf32> to vector<16x1xf32>
    %469 = tpu.reciprocal %468 {approx = true} : vector<16x1xf32> -> vector<16x1xf32>
    %470 = vector.broadcast %469 : vector<16x1xf32> to vector<16x16xf32>
    %471 = arith.mulf %466, %470 : vector<16x16xf32>
    %472 = arith.truncf %471 : vector<16x16xf32> to vector<16x16xbf16>
    %cst_147 = arith.constant dense<0.000000e+00> : vector<16x16xf32>
    %473 = tpu.matmul %472, %460, %cst_147 {dimension_numbers = #tpu.dot_dimension_numbers<[1], [0], [0], [1], [0, 0, 1, 1], [], []>} : vector<16x16xbf16>, vector<16x16xbf16>, vector<16x16xf32> -> vector<16x16xf32>
    %474 = arith.truncf %473 : vector<16x16xf32> to vector<16x16xbf16>
    %475 = tpu.concatenate %355, %372, %389, %406, %423, %440, %457, %474 in 1 : vector<16x16xbf16>, vector<16x16xbf16>, vector<16x16xbf16>, vector<16x16xbf16>, vector<16x16xbf16>, vector<16x16xbf16>, vector<16x16xbf16>, vector<16x16xbf16> -> vector<16x128xbf16>
    %c32_148 = arith.constant 32 : index
    %c0_149 = arith.constant 0 : index
    %476 = vector.load %arg16[%c32_148, %c0_149] : memref<64x128xbf16, #tpu.memory_space<vmem>>, vector<16x128xbf16>
    tpu.vector_store %arg16[%c32_148, %c0_149], %475 {strides = array<i32>} : memref<64x128xbf16, #tpu.memory_space<vmem>>, vector<16x128xbf16>,
    %c0_150 = arith.constant 0 : index
    %c48 = arith.constant 48 : index
    %c0_151 = arith.constant 0 : index
    %477 = vector.load %arg15[%c0_150, %c48, %c0_151] : memref<3x64x128xbf16, #tpu.memory_space<vmem>>, vector<1x16x128xbf16>
    %478 = vector.shape_cast %477 : vector<1x16x128xbf16> to vector<16x128xbf16>
    %c1_152 = arith.constant 1 : index
    %c48_153 = arith.constant 48 : index
    %c0_154 = arith.constant 0 : index
    %479 = vector.load %arg15[%c1_152, %c48_153, %c0_154] : memref<3x64x128xbf16, #tpu.memory_space<vmem>>, vector<1x16x128xbf16>
    %480 = vector.shape_cast %479 : vector<1x16x128xbf16> to vector<16x128xbf16>
    %c2_155 = arith.constant 2 : index
    %c48_156 = arith.constant 48 : index
    %c0_157 = arith.constant 0 : index
    %481 = vector.load %arg15[%c2_155, %c48_156, %c0_157] : memref<3x64x128xbf16, #tpu.memory_space<vmem>>, vector<1x16x128xbf16>
    %482 = vector.shape_cast %481 : vector<1x16x128xbf16> to vector<16x128xbf16>
    %483 = vector.extract_strided_slice %478 {offsets = [0, 0], sizes = [16, 16], strides = [1, 1]} : vector<16x128xbf16> to vector<16x16xbf16>
    %484 = vector.extract_strided_slice %480 {offsets = [0, 0], sizes = [16, 16], strides = [1, 1]} : vector<16x128xbf16> to vector<16x16xbf16>
    %485 = vector.extract_strided_slice %482 {offsets = [0, 0], sizes = [16, 16], strides = [1, 1]} : vector<16x128xbf16> to vector<16x16xbf16>
    %cst_158 = arith.constant dense<0.000000e+00> : vector<16x16xf32>
    %486 = tpu.matmul %483, %484, %cst_158 {dimension_numbers = #tpu.dot_dimension_numbers<[1], [1], [0], [0], [0, 0, 1, 0], [], []>} : vector<16x16xbf16>, vector<16x16xbf16>, vector<16x16xf32> -> vector<16x16xf32>
    %cst_159 = arith.constant dense<0xFF800000> : vector<16xf32>
    %487 = vector.multi_reduction <maximumf>, %486, %cst_159 [1] : vector<16x16xf32> to vector<16xf32>
    %488 = vector.shape_cast %487 : vector<16xf32> to vector<16x1xf32>
    %489 = vector.broadcast %488 : vector<16x1xf32> to vector<16x16xf32>
    %490 = arith.subf %486, %489 : vector<16x16xf32>
    %491 = math.exp %490 : vector<16x16xf32>
    %cst_160 = arith.constant dense<0.000000e+00> : vector<16xf32>
    %492 = vector.multi_reduction <add>, %491, %cst_160 [1] : vector<16x16xf32> to vector<16xf32>
    %493 = vector.shape_cast %492 : vector<16xf32> to vector<16x1xf32>
    %494 = tpu.reciprocal %493 {approx = true} : vector<16x1xf32> -> vector<16x1xf32>
    %495 = vector.broadcast %494 : vector<16x1xf32> to vector<16x16xf32>
    %496 = arith.mulf %491, %495 : vector<16x16xf32>
    %497 = arith.truncf %496 : vector<16x16xf32> to vector<16x16xbf16>
    %cst_161 = arith.constant dense<0.000000e+00> : vector<16x16xf32>
    %498 = tpu.matmul %497, %485, %cst_161 {dimension_numbers = #tpu.dot_dimension_numbers<[1], [0], [0], [1], [0, 0, 1, 1], [], []>} : vector<16x16xbf16>, vector<16x16xbf16>, vector<16x16xf32> -> vector<16x16xf32>
    %499 = arith.truncf %498 : vector<16x16xf32> to vector<16x16xbf16>
    %500 = vector.extract_strided_slice %478 {offsets = [0, 16], sizes = [16, 16], strides = [1, 1]} : vector<16x128xbf16> to vector<16x16xbf16>
    %501 = vector.extract_strided_slice %480 {offsets = [0, 16], sizes = [16, 16], strides = [1, 1]} : vector<16x128xbf16> to vector<16x16xbf16>
    %502 = vector.extract_strided_slice %482 {offsets = [0, 16], sizes = [16, 16], strides = [1, 1]} : vector<16x128xbf16> to vector<16x16xbf16>
    %cst_162 = arith.constant dense<0.000000e+00> : vector<16x16xf32>
    %503 = tpu.matmul %500, %501, %cst_162 {dimension_numbers = #tpu.dot_dimension_numbers<[1], [1], [0], [0], [0, 0, 1, 0], [], []>} : vector<16x16xbf16>, vector<16x16xbf16>, vector<16x16xf32> -> vector<16x16xf32>
    %cst_163 = arith.constant dense<0xFF800000> : vector<16xf32>
    %504 = vector.multi_reduction <maximumf>, %503, %cst_163 [1] : vector<16x16xf32> to vector<16xf32>
    %505 = vector.shape_cast %504 : vector<16xf32> to vector<16x1xf32>
    %506 = vector.broadcast %505 : vector<16x1xf32> to vector<16x16xf32>
    %507 = arith.subf %503, %506 : vector<16x16xf32>
    %508 = math.exp %507 : vector<16x16xf32>
    %cst_164 = arith.constant dense<0.000000e+00> : vector<16xf32>
    %509 = vector.multi_reduction <add>, %508, %cst_164 [1] : vector<16x16xf32> to vector<16xf32>
    %510 = vector.shape_cast %509 : vector<16xf32> to vector<16x1xf32>
    %511 = tpu.reciprocal %510 {approx = true} : vector<16x1xf32> -> vector<16x1xf32>
    %512 = vector.broadcast %511 : vector<16x1xf32> to vector<16x16xf32>
    %513 = arith.mulf %508, %512 : vector<16x16xf32>
    %514 = arith.truncf %513 : vector<16x16xf32> to vector<16x16xbf16>
    %cst_165 = arith.constant dense<0.000000e+00> : vector<16x16xf32>
    %515 = tpu.matmul %514, %502, %cst_165 {dimension_numbers = #tpu.dot_dimension_numbers<[1], [0], [0], [1], [0, 0, 1, 1], [], []>} : vector<16x16xbf16>, vector<16x16xbf16>, vector<16x16xf32> -> vector<16x16xf32>
    %516 = arith.truncf %515 : vector<16x16xf32> to vector<16x16xbf16>
    %517 = vector.extract_strided_slice %478 {offsets = [0, 32], sizes = [16, 16], strides = [1, 1]} : vector<16x128xbf16> to vector<16x16xbf16>
    %518 = vector.extract_strided_slice %480 {offsets = [0, 32], sizes = [16, 16], strides = [1, 1]} : vector<16x128xbf16> to vector<16x16xbf16>
    %519 = vector.extract_strided_slice %482 {offsets = [0, 32], sizes = [16, 16], strides = [1, 1]} : vector<16x128xbf16> to vector<16x16xbf16>
    %cst_166 = arith.constant dense<0.000000e+00> : vector<16x16xf32>
    %520 = tpu.matmul %517, %518, %cst_166 {dimension_numbers = #tpu.dot_dimension_numbers<[1], [1], [0], [0], [0, 0, 1, 0], [], []>} : vector<16x16xbf16>, vector<16x16xbf16>, vector<16x16xf32> -> vector<16x16xf32>
    %cst_167 = arith.constant dense<0xFF800000> : vector<16xf32>
    %521 = vector.multi_reduction <maximumf>, %520, %cst_167 [1] : vector<16x16xf32> to vector<16xf32>
    %522 = vector.shape_cast %521 : vector<16xf32> to vector<16x1xf32>
    %523 = vector.broadcast %522 : vector<16x1xf32> to vector<16x16xf32>
    %524 = arith.subf %520, %523 : vector<16x16xf32>
    %525 = math.exp %524 : vector<16x16xf32>
    %cst_168 = arith.constant dense<0.000000e+00> : vector<16xf32>
    %526 = vector.multi_reduction <add>, %525, %cst_168 [1] : vector<16x16xf32> to vector<16xf32>
    %527 = vector.shape_cast %526 : vector<16xf32> to vector<16x1xf32>
    %528 = tpu.reciprocal %527 {approx = true} : vector<16x1xf32> -> vector<16x1xf32>
    %529 = vector.broadcast %528 : vector<16x1xf32> to vector<16x16xf32>
    %530 = arith.mulf %525, %529 : vector<16x16xf32>
    %531 = arith.truncf %530 : vector<16x16xf32> to vector<16x16xbf16>
    %cst_169 = arith.constant dense<0.000000e+00> : vector<16x16xf32>
    %532 = tpu.matmul %531, %519, %cst_169 {dimension_numbers = #tpu.dot_dimension_numbers<[1], [0], [0], [1], [0, 0, 1, 1], [], []>} : vector<16x16xbf16>, vector<16x16xbf16>, vector<16x16xf32> -> vector<16x16xf32>
    %533 = arith.truncf %532 : vector<16x16xf32> to vector<16x16xbf16>
    %534 = vector.extract_strided_slice %478 {offsets = [0, 48], sizes = [16, 16], strides = [1, 1]} : vector<16x128xbf16> to vector<16x16xbf16>
    %535 = vector.extract_strided_slice %480 {offsets = [0, 48], sizes = [16, 16], strides = [1, 1]} : vector<16x128xbf16> to vector<16x16xbf16>
    %536 = vector.extract_strided_slice %482 {offsets = [0, 48], sizes = [16, 16], strides = [1, 1]} : vector<16x128xbf16> to vector<16x16xbf16>
    %cst_170 = arith.constant dense<0.000000e+00> : vector<16x16xf32>
    %537 = tpu.matmul %534, %535, %cst_170 {dimension_numbers = #tpu.dot_dimension_numbers<[1], [1], [0], [0], [0, 0, 1, 0], [], []>} : vector<16x16xbf16>, vector<16x16xbf16>, vector<16x16xf32> -> vector<16x16xf32>
    %cst_171 = arith.constant dense<0xFF800000> : vector<16xf32>
    %538 = vector.multi_reduction <maximumf>, %537, %cst_171 [1] : vector<16x16xf32> to vector<16xf32>
    %539 = vector.shape_cast %538 : vector<16xf32> to vector<16x1xf32>
    %540 = vector.broadcast %539 : vector<16x1xf32> to vector<16x16xf32>
    %541 = arith.subf %537, %540 : vector<16x16xf32>
    %542 = math.exp %541 : vector<16x16xf32>
    %cst_172 = arith.constant dense<0.000000e+00> : vector<16xf32>
    %543 = vector.multi_reduction <add>, %542, %cst_172 [1] : vector<16x16xf32> to vector<16xf32>
    %544 = vector.shape_cast %543 : vector<16xf32> to vector<16x1xf32>
    %545 = tpu.reciprocal %544 {approx = true} : vector<16x1xf32> -> vector<16x1xf32>
    %546 = vector.broadcast %545 : vector<16x1xf32> to vector<16x16xf32>
    %547 = arith.mulf %542, %546 : vector<16x16xf32>
    %548 = arith.truncf %547 : vector<16x16xf32> to vector<16x16xbf16>
    %cst_173 = arith.constant dense<0.000000e+00> : vector<16x16xf32>
    %549 = tpu.matmul %548, %536, %cst_173 {dimension_numbers = #tpu.dot_dimension_numbers<[1], [0], [0], [1], [0, 0, 1, 1], [], []>} : vector<16x16xbf16>, vector<16x16xbf16>, vector<16x16xf32> -> vector<16x16xf32>
    %550 = arith.truncf %549 : vector<16x16xf32> to vector<16x16xbf16>
    %551 = vector.extract_strided_slice %478 {offsets = [0, 64], sizes = [16, 16], strides = [1, 1]} : vector<16x128xbf16> to vector<16x16xbf16>
    %552 = vector.extract_strided_slice %480 {offsets = [0, 64], sizes = [16, 16], strides = [1, 1]} : vector<16x128xbf16> to vector<16x16xbf16>
    %553 = vector.extract_strided_slice %482 {offsets = [0, 64], sizes = [16, 16], strides = [1, 1]} : vector<16x128xbf16> to vector<16x16xbf16>
    %cst_174 = arith.constant dense<0.000000e+00> : vector<16x16xf32>
    %554 = tpu.matmul %551, %552, %cst_174 {dimension_numbers = #tpu.dot_dimension_numbers<[1], [1], [0], [0], [0, 0, 1, 0], [], []>} : vector<16x16xbf16>, vector<16x16xbf16>, vector<16x16xf32> -> vector<16x16xf32>
    %cst_175 = arith.constant dense<0xFF800000> : vector<16xf32>
    %555 = vector.multi_reduction <maximumf>, %554, %cst_175 [1] : vector<16x16xf32> to vector<16xf32>
    %556 = vector.shape_cast %555 : vector<16xf32> to vector<16x1xf32>
    %557 = vector.broadcast %556 : vector<16x1xf32> to vector<16x16xf32>
    %558 = arith.subf %554, %557 : vector<16x16xf32>
    %559 = math.exp %558 : vector<16x16xf32>
    %cst_176 = arith.constant dense<0.000000e+00> : vector<16xf32>
    %560 = vector.multi_reduction <add>, %559, %cst_176 [1] : vector<16x16xf32> to vector<16xf32>
    %561 = vector.shape_cast %560 : vector<16xf32> to vector<16x1xf32>
    %562 = tpu.reciprocal %561 {approx = true} : vector<16x1xf32> -> vector<16x1xf32>
    %563 = vector.broadcast %562 : vector<16x1xf32> to vector<16x16xf32>
    %564 = arith.mulf %559, %563 : vector<16x16xf32>
    %565 = arith.truncf %564 : vector<16x16xf32> to vector<16x16xbf16>
    %cst_177 = arith.constant dense<0.000000e+00> : vector<16x16xf32>
    %566 = tpu.matmul %565, %553, %cst_177 {dimension_numbers = #tpu.dot_dimension_numbers<[1], [0], [0], [1], [0, 0, 1, 1], [], []>} : vector<16x16xbf16>, vector<16x16xbf16>, vector<16x16xf32> -> vector<16x16xf32>
    %567 = arith.truncf %566 : vector<16x16xf32> to vector<16x16xbf16>
    %568 = vector.extract_strided_slice %478 {offsets = [0, 80], sizes = [16, 16], strides = [1, 1]} : vector<16x128xbf16> to vector<16x16xbf16>
    %569 = vector.extract_strided_slice %480 {offsets = [0, 80], sizes = [16, 16], strides = [1, 1]} : vector<16x128xbf16> to vector<16x16xbf16>
    %570 = vector.extract_strided_slice %482 {offsets = [0, 80], sizes = [16, 16], strides = [1, 1]} : vector<16x128xbf16> to vector<16x16xbf16>
    %cst_178 = arith.constant dense<0.000000e+00> : vector<16x16xf32>
    %571 = tpu.matmul %568, %569, %cst_178 {dimension_numbers = #tpu.dot_dimension_numbers<[1], [1], [0], [0], [0, 0, 1, 0], [], []>} : vector<16x16xbf16>, vector<16x16xbf16>, vector<16x16xf32> -> vector<16x16xf32>
    %cst_179 = arith.constant dense<0xFF800000> : vector<16xf32>
    %572 = vector.multi_reduction <maximumf>, %571, %cst_179 [1] : vector<16x16xf32> to vector<16xf32>
    %573 = vector.shape_cast %572 : vector<16xf32> to vector<16x1xf32>
    %574 = vector.broadcast %573 : vector<16x1xf32> to vector<16x16xf32>
    %575 = arith.subf %571, %574 : vector<16x16xf32>
    %576 = math.exp %575 : vector<16x16xf32>
    %cst_180 = arith.constant dense<0.000000e+00> : vector<16xf32>
    %577 = vector.multi_reduction <add>, %576, %cst_180 [1] : vector<16x16xf32> to vector<16xf32>
    %578 = vector.shape_cast %577 : vector<16xf32> to vector<16x1xf32>
    %579 = tpu.reciprocal %578 {approx = true} : vector<16x1xf32> -> vector<16x1xf32>
    %580 = vector.broadcast %579 : vector<16x1xf32> to vector<16x16xf32>
    %581 = arith.mulf %576, %580 : vector<16x16xf32>
    %582 = arith.truncf %581 : vector<16x16xf32> to vector<16x16xbf16>
    %cst_181 = arith.constant dense<0.000000e+00> : vector<16x16xf32>
    %583 = tpu.matmul %582, %570, %cst_181 {dimension_numbers = #tpu.dot_dimension_numbers<[1], [0], [0], [1], [0, 0, 1, 1], [], []>} : vector<16x16xbf16>, vector<16x16xbf16>, vector<16x16xf32> -> vector<16x16xf32>
    %584 = arith.truncf %583 : vector<16x16xf32> to vector<16x16xbf16>
    %585 = vector.extract_strided_slice %478 {offsets = [0, 96], sizes = [16, 16], strides = [1, 1]} : vector<16x128xbf16> to vector<16x16xbf16>
    %586 = vector.extract_strided_slice %480 {offsets = [0, 96], sizes = [16, 16], strides = [1, 1]} : vector<16x128xbf16> to vector<16x16xbf16>
    %587 = vector.extract_strided_slice %482 {offsets = [0, 96], sizes = [16, 16], strides = [1, 1]} : vector<16x128xbf16> to vector<16x16xbf16>
    %cst_182 = arith.constant dense<0.000000e+00> : vector<16x16xf32>
    %588 = tpu.matmul %585, %586, %cst_182 {dimension_numbers = #tpu.dot_dimension_numbers<[1], [1], [0], [0], [0, 0, 1, 0], [], []>} : vector<16x16xbf16>, vector<16x16xbf16>, vector<16x16xf32> -> vector<16x16xf32>
    %cst_183 = arith.constant dense<0xFF800000> : vector<16xf32>
    %589 = vector.multi_reduction <maximumf>, %588, %cst_183 [1] : vector<16x16xf32> to vector<16xf32>
    %590 = vector.shape_cast %589 : vector<16xf32> to vector<16x1xf32>
    %591 = vector.broadcast %590 : vector<16x1xf32> to vector<16x16xf32>
    %592 = arith.subf %588, %591 : vector<16x16xf32>
    %593 = math.exp %592 : vector<16x16xf32>
    %cst_184 = arith.constant dense<0.000000e+00> : vector<16xf32>
    %594 = vector.multi_reduction <add>, %593, %cst_184 [1] : vector<16x16xf32> to vector<16xf32>
    %595 = vector.shape_cast %594 : vector<16xf32> to vector<16x1xf32>
    %596 = tpu.reciprocal %595 {approx = true} : vector<16x1xf32> -> vector<16x1xf32>
    %597 = vector.broadcast %596 : vector<16x1xf32> to vector<16x16xf32>
    %598 = arith.mulf %593, %597 : vector<16x16xf32>
    %599 = arith.truncf %598 : vector<16x16xf32> to vector<16x16xbf16>
    %cst_185 = arith.constant dense<0.000000e+00> : vector<16x16xf32>
    %600 = tpu.matmul %599, %587, %cst_185 {dimension_numbers = #tpu.dot_dimension_numbers<[1], [0], [0], [1], [0, 0, 1, 1], [], []>} : vector<16x16xbf16>, vector<16x16xbf16>, vector<16x16xf32> -> vector<16x16xf32>
    %601 = arith.truncf %600 : vector<16x16xf32> to vector<16x16xbf16>
    %602 = vector.extract_strided_slice %478 {offsets = [0, 112], sizes = [16, 16], strides = [1, 1]} : vector<16x128xbf16> to vector<16x16xbf16>
    %603 = vector.extract_strided_slice %480 {offsets = [0, 112], sizes = [16, 16], strides = [1, 1]} : vector<16x128xbf16> to vector<16x16xbf16>
    %604 = vector.extract_strided_slice %482 {offsets = [0, 112], sizes = [16, 16], strides = [1, 1]} : vector<16x128xbf16> to vector<16x16xbf16>
    %cst_186 = arith.constant dense<0.000000e+00> : vector<16x16xf32>
    %605 = tpu.matmul %602, %603, %cst_186 {dimension_numbers = #tpu.dot_dimension_numbers<[1], [1], [0], [0], [0, 0, 1, 0], [], []>} : vector<16x16xbf16>, vector<16x16xbf16>, vector<16x16xf32> -> vector<16x16xf32>
    %cst_187 = arith.constant dense<0xFF800000> : vector<16xf32>
    %606 = vector.multi_reduction <maximumf>, %605, %cst_187 [1] : vector<16x16xf32> to vector<16xf32>
    %607 = vector.shape_cast %606 : vector<16xf32> to vector<16x1xf32>
    %608 = vector.broadcast %607 : vector<16x1xf32> to vector<16x16xf32>
    %609 = arith.subf %605, %608 : vector<16x16xf32>
    %610 = math.exp %609 : vector<16x16xf32>
    %cst_188 = arith.constant dense<0.000000e+00> : vector<16xf32>
    %611 = vector.multi_reduction <add>, %610, %cst_188 [1] : vector<16x16xf32> to vector<16xf32>
    %612 = vector.shape_cast %611 : vector<16xf32> to vector<16x1xf32>
    %613 = tpu.reciprocal %612 {approx = true} : vector<16x1xf32> -> vector<16x1xf32>
    %614 = vector.broadcast %613 : vector<16x1xf32> to vector<16x16xf32>
    %615 = arith.mulf %610, %614 : vector<16x16xf32>
    %616 = arith.truncf %615 : vector<16x16xf32> to vector<16x16xbf16>
    %cst_189 = arith.constant dense<0.000000e+00> : vector<16x16xf32>
    %617 = tpu.matmul %616, %604, %cst_189 {dimension_numbers = #tpu.dot_dimension_numbers<[1], [0], [0], [1], [0, 0, 1, 1], [], []>} : vector<16x16xbf16>, vector<16x16xbf16>, vector<16x16xf32> -> vector<16x16xf32>
    %618 = arith.truncf %617 : vector<16x16xf32> to vector<16x16xbf16>
    %619 = tpu.concatenate %499, %516, %533, %550, %567, %584, %601, %618 in 1 : vector<16x16xbf16>, vector<16x16xbf16>, vector<16x16xbf16>, vector<16x16xbf16>, vector<16x16xbf16>, vector<16x16xbf16>, vector<16x16xbf16>, vector<16x16xbf16> -> vector<16x128xbf16>
    %c48_190 = arith.constant 48 : index
    %c0_191 = arith.constant 0 : index
    %620 = vector.load %arg16[%c48_190, %c0_191] : memref<64x128xbf16, #tpu.memory_space<vmem>>, vector<16x128xbf16>
    tpu.vector_store %arg16[%c48_190, %c0_191], %619 {strides = array<i32>} : memref<64x128xbf16, #tpu.memory_space<vmem>>, vector<16x128xbf16>,
    %c0_192 = arith.constant 0 : index
    %c0_193 = arith.constant 0 : index
    %621 = vector.load %arg16[%c0_192, %c0_193] : memref<64x128xbf16, #tpu.memory_space<vmem>>, vector<64x128xbf16>
    %c0_194 = arith.constant 0 : index
    %c0_195 = arith.constant 0 : index
    %622 = vector.load %arg6[%c0_194, %c0_195] : memref<128x144xbf16, #tpu.memory_space<vmem>>, vector<128x144xbf16>
    %cst_196 = arith.constant dense<0.000000e+00> : vector<64x144xf32>
    %623 = tpu.matmul %621, %622, %cst_196 {dimension_numbers = #tpu.dot_dimension_numbers<[1], [0], [0], [1], [0, 0, 1, 1], [], []>} : vector<64x128xbf16>, vector<128x144xbf16>, vector<64x144xf32> -> vector<64x144xf32>
    %c0_197 = arith.constant 0 : index
    %c0_198 = arith.constant 0 : index
    %c0_199 = arith.constant 0 : index
    %624 = vector.load %arg1[%c0_197, %c0_198, %c0_199] : memref<1x64x144xf32, #tpu.memory_space<vmem>>, vector<1x64x144xf32>
    %625 = vector.shape_cast %624 : vector<1x64x144xf32> to vector<64x144xf32>
    %626 = arith.addf %625, %623 : vector<64x144xf32>
    %c0_200 = arith.constant 0 : index
    %c0_201 = arith.constant 0 : index
    %627 = vector.load %arg7[%c0_200, %c0_201] : memref<1x144xf32, #tpu.memory_space<vmem>>, vector<1x144xf32>
    %628 = vector.broadcast %627 : vector<1x144xf32> to vector<64x144xf32>
    %629 = arith.addf %626, %628 : vector<64x144xf32>
    %c0_202 = arith.constant 0 : index
    %c0_203 = arith.constant 0 : index
    %630 = vector.load %arg8[%c0_202, %c0_203] : memref<1x144xf32, #tpu.memory_space<vmem>>, vector<1x144xf32>
    %c0_204 = arith.constant 0 : index
    %c0_205 = arith.constant 0 : index
    %631 = vector.load %arg9[%c0_204, %c0_205] : memref<1x144xf32, #tpu.memory_space<vmem>>, vector<1x144xf32>
    %cst_206 = arith.constant dense<0.000000e+00> : vector<64xf32>
    %632 = vector.multi_reduction <add>, %629, %cst_206 [1] : vector<64x144xf32> to vector<64xf32>
    %633 = vector.shape_cast %632 : vector<64xf32> to vector<64x1xf32>
    %cst_207 = arith.constant 1.440000e+02 : f32
    %634 = vector.broadcast %cst_207 : f32 to vector<64x1xf32>
    %635 = arith.divf %633, %634 : vector<64x1xf32>
    %636 = vector.broadcast %635 : vector<64x1xf32> to vector<64x144xf32>
    %637 = arith.subf %629, %636 : vector<64x144xf32>
    %638 = arith.mulf %637, %637 : vector<64x144xf32>
    %cst_208 = arith.constant dense<0.000000e+00> : vector<64xf32>
    %639 = vector.multi_reduction <add>, %638, %cst_208 [1] : vector<64x144xf32> to vector<64xf32>
    %640 = vector.shape_cast %639 : vector<64xf32> to vector<64x1xf32>
    %cst_209 = arith.constant 1.440000e+02 : f32
    %641 = vector.broadcast %cst_209 : f32 to vector<64x1xf32>
    %642 = arith.divf %640, %641 : vector<64x1xf32>
    %cst_210 = arith.constant 9.99999974E-6 : f32
    %643 = vector.broadcast %cst_210 : f32 to vector<64x1xf32>
    %644 = arith.addf %642, %643 : vector<64x1xf32>
    %645 = math.rsqrt %644 : vector<64x1xf32>
    %646 = vector.broadcast %645 : vector<64x1xf32> to vector<64x144xf32>
    %647 = arith.mulf %637, %646 : vector<64x144xf32>
    %648 = vector.broadcast %630 : vector<1x144xf32> to vector<64x144xf32>
    %649 = arith.mulf %647, %648 : vector<64x144xf32>
    %650 = vector.broadcast %631 : vector<1x144xf32> to vector<64x144xf32>
    %651 = arith.addf %649, %650 : vector<64x144xf32>
    %652 = arith.truncf %651 : vector<64x144xf32> to vector<64x144xbf16>
    %c0_211 = arith.constant 0 : index
    %c0_212 = arith.constant 0 : index
    %653 = vector.load %arg10[%c0_211, %c0_212] : memref<144x128xbf16, #tpu.memory_space<vmem>>, vector<144x128xbf16>
    %cst_213 = arith.constant dense<0.000000e+00> : vector<64x128xf32>
    %654 = tpu.matmul %652, %653, %cst_213 {dimension_numbers = #tpu.dot_dimension_numbers<[1], [0], [0], [1], [0, 0, 1, 1], [], []>} : vector<64x144xbf16>, vector<144x128xbf16>, vector<64x128xf32> -> vector<64x128xf32>
    %c0_214 = arith.constant 0 : index
    %c0_215 = arith.constant 0 : index
    %655 = vector.load %arg11[%c0_214, %c0_215] : memref<1x128xf32, #tpu.memory_space<vmem>>, vector<1x128xf32>
    %656 = vector.broadcast %655 : vector<1x128xf32> to vector<64x128xf32>
    %657 = arith.addf %654, %656 : vector<64x128xf32>
    %cst_216 = arith.constant 0.000000e+00 : f32
    %658 = vector.broadcast %cst_216 : f32 to vector<64x128xf32>
    %659 = arith.maximumf %657, %658 : vector<64x128xf32>
    %660 = arith.truncf %659 : vector<64x128xf32> to vector<64x128xbf16>
    %c0_217 = arith.constant 0 : index
    %c0_218 = arith.constant 0 : index
    %661 = vector.load %arg12[%c0_217, %c0_218] : memref<128x144xbf16, #tpu.memory_space<vmem>>, vector<128x144xbf16>
    %cst_219 = arith.constant dense<0.000000e+00> : vector<64x144xf32>
    %662 = tpu.matmul %660, %661, %cst_219 {dimension_numbers = #tpu.dot_dimension_numbers<[1], [0], [0], [1], [0, 0, 1, 1], [], []>} : vector<64x128xbf16>, vector<128x144xbf16>, vector<64x144xf32> -> vector<64x144xf32>
    %663 = arith.addf %629, %662 : vector<64x144xf32>
    %c0_220 = arith.constant 0 : index
    %c0_221 = arith.constant 0 : index
    %664 = vector.load %arg13[%c0_220, %c0_221] : memref<1x144xf32, #tpu.memory_space<vmem>>, vector<1x144xf32>
    %665 = vector.broadcast %664 : vector<1x144xf32> to vector<64x144xf32>
    %666 = arith.addf %663, %665 : vector<64x144xf32>
    %c0_222 = arith.constant 0 : index
    %c0_223 = arith.constant 0 : index
    %c0_224 = arith.constant 0 : index
    %667 = vector.load %arg14[%c0_222, %c0_223, %c0_224] : memref<1x64x144xf32, #tpu.memory_space<vmem>>, vector<1x64x144xf32>
    %668 = vector.shape_cast %667 : vector<1x64x144xf32> to vector<64x144xf32>
    %669 = vector.shape_cast %666 : vector<64x144xf32> to vector<1x64x144xf32>
    tpu.vector_store %arg14[%c0_222, %c0_223, %c0_224], %669 {strides = array<i32>} : memref<1x64x144xf32, #tpu.memory_space<vmem>>, vector<1x64x144xf32>,
    return
  }
  func.func @transform_0(%arg0: i32) -> (i32, i32, i32) {
    %c0_i32 = arith.constant 0 : i32
    %c0_i32_0 = arith.constant 0 : i32
    %c0_i32_1 = arith.constant 0 : i32
    return %arg0, %c0_i32, %c0_i32_0 : i32, i32, i32
  }
  func.func @transform_1(%arg0: i32) -> (i32, i32) {
    %c0_i32 = arith.constant 0 : i32
    %c0_i32_0 = arith.constant 0 : i32
    %c0_i32_1 = arith.constant 0 : i32
    return %c0_i32, %c0_i32_0 : i32, i32
  }
  func.func @transform_2(%arg0: i32) -> (i32, i32) {
    %c0_i32 = arith.constant 0 : i32
    %c0_i32_0 = arith.constant 0 : i32
    %c0_i32_1 = arith.constant 0 : i32
    return %c0_i32, %c0_i32_0 : i32, i32
  }
  func.func @transform_3(%arg0: i32) -> (i32, i32) {
    %c0_i32 = arith.constant 0 : i32
    %c0_i32_0 = arith.constant 0 : i32
    %c0_i32_1 = arith.constant 0 : i32
    return %c0_i32, %c0_i32_0 : i32, i32
  }
  func.func @transform_4(%arg0: i32) -> (i32, i32) {
    %c0_i32 = arith.constant 0 : i32
    %c0_i32_0 = arith.constant 0 : i32
    %c0_i32_1 = arith.constant 0 : i32
    return %c0_i32, %c0_i32_0 : i32, i32
  }
  func.func @transform_5(%arg0: i32) -> (i32, i32) {
    %c0_i32 = arith.constant 0 : i32
    %c0_i32_0 = arith.constant 0 : i32
    %c0_i32_1 = arith.constant 0 : i32
    return %c0_i32, %c0_i32_0 : i32, i32
  }
  func.func @transform_6(%arg0: i32) -> (i32, i32) {
    %c0_i32 = arith.constant 0 : i32
    %c0_i32_0 = arith.constant 0 : i32
    %c0_i32_1 = arith.constant 0 : i32
    return %c0_i32, %c0_i32_0 : i32, i32
  }
  func.func @transform_7(%arg0: i32) -> (i32, i32) {
    %c0_i32 = arith.constant 0 : i32
    %c0_i32_0 = arith.constant 0 : i32
    %c0_i32_1 = arith.constant 0 : i32
    return %c0_i32, %c0_i32_0 : i32, i32
  }
  func.func @transform_8(%arg0: i32) -> (i32, i32) {
    %c0_i32 = arith.constant 0 : i32
    %c0_i32_0 = arith.constant 0 : i32
    %c0_i32_1 = arith.constant 0 : i32
    return %c0_i32, %c0_i32_0 : i32, i32
  }
  func.func @transform_9(%arg0: i32) -> (i32, i32) {
    %c0_i32 = arith.constant 0 : i32
    %c0_i32_0 = arith.constant 0 : i32
    %c0_i32_1 = arith.constant 0 : i32
    return %c0_i32, %c0_i32_0 : i32, i32
  }
  func.func @transform_10(%arg0: i32) -> (i32, i32) {
    %c0_i32 = arith.constant 0 : i32
    %c0_i32_0 = arith.constant 0 : i32
    %c0_i32_1 = arith.constant 0 : i32
    return %c0_i32, %c0_i32_0 : i32, i32
  }
  func.func @transform_11(%arg0: i32) -> (i32, i32) {
    %c0_i32 = arith.constant 0 : i32
    %c0_i32_0 = arith.constant 0 : i32
    %c0_i32_1 = arith.constant 0 : i32
    return %c0_i32, %c0_i32_0 : i32, i32
  }
  func.func @transform_12(%arg0: i32) -> (i32, i32) {
    %c0_i32 = arith.constant 0 : i32
    %c0_i32_0 = arith.constant 0 : i32
    %c0_i32_1 = arith.constant 0 : i32
    return %c0_i32, %c0_i32_0 : i32, i32
  }
  func.func @transform_13(%arg0: i32) -> (i32, i32, i32) {
    %c0_i32 = arith.constant 0 : i32
    %c0_i32_0 = arith.constant 0 : i32
    %c0_i32_1 = arith.constant 0 : i32
    return %arg0, %c0_i32, %c0_i32_0 : i32, i32, i32
  }
}

</mosaic_0001>

<bundles_post_ra>
// kernel: tpu_custom_call.1
= control target key start
LH: loop header
LB: loop body
LE: loop exit
PB: predicated region body
PF: predicated region fallthrough
CT: control target
= control target key end

     0   :  { %s10142_s0 = inlined_call_operand.vmem [shape: f32[2,64,144], index: 0, kind: input, shape index: {}]   ;;  %s10143_s1 = inlined_call_operand.hbm [shape: f32[1,144], index: 1, kind: input, shape index: {}]   ;;  %s10144_s2 = inlined_call_operand.hbm [shape: f32[1,144], index: 2, kind: input, shape index: {}]   ;;  %s10145_s3 = inlined_call_operand.vmem [shape: bf16[144,128], index: 3, kind: input, shape index: {}]   ;;  %s10146_s4 = inlined_call_operand.hbm [shape: bf16[128,384], index: 4, kind: input, shape index: {}]   ;;  %s10147_s5 = inlined_call_operand.vmem [shape: bf16[128,144], index: 5, kind: input, shape index: {}]   ;;  %s10148_s6 = inlined_call_operand.vmem [shape: f32[1,144], index: 6, kind: input, shape index: {}]   ;;  %s10149_s7 = inlined_call_operand.vmem [shape: f32[1,144], index: 7, kind: input, shape index: {}]   ;;  %s10150_s8 = inlined_call_operand.vmem [shape: f32[1,144], index: 8, kind: input, shape index: {}]   ;;  %s10151_s9 = inlined_call_operand.vmem [shape: bf16[144,128], index: 9, kind: input, shape index: {}]   ;;  %s10152_s10 = inlined_call_operand.vmem [shape: f32[1,128], index: 10, kind: input, shape index: {}]   ;;  %s10153_s11 = inlined_call_operand.vmem [shape: bf16[128,144], index: 11, kind: input, shape index: {}]   ;;  %s10154_s12 = inlined_call_operand.vmem [shape: f32[1,144], index: 12, kind: input, shape index: {}]   ;;  %s10155_s13 = inlined_call_operand.hbm [shape: f32[2,64,144], index: 13, kind: output, shape index: {}]  }
   0x1   :  { %10198 = sst [smem:[#allocation52_spill]] %s10142_s0 }
   0x2   :  { %10199 = sst [smem:[#allocation53_spill]] %s10143_s1 }
   0x3   :  { %18 = vsyncpa [#allocation5], 0 }
   0x4   :  { %19 = vsyncpa [#allocation8], 0 }
   0x5   :  { %20 = vsyncpa [#allocation6], 0 }
   0x6   :  { %22 = vsyncpa [#allocation6 + $0x1], 0  ;;  %s7980_s25 = smov 0   ;;  %s7982_s26 = smov 0  }
   0x7   :  { %s7984_s27 = smov 0   ;;  %s7986_s28 = smov 0  }
   0x8 LB: > { %10200 = sst [smem:[#allocation14_spill]] %s7887_s27  ;;  %s8001_s29 = sadd.s32 4294967295, %s7891_s28   ;;  %s7891_s28 = sphi %s7986_s28, %s10299_s28   ;;  %s7887_s27 = sphi %s7984_s27, %s10296_s27   ;;  %s7883_s26 = sphi %s7982_s26, %s10298_s26   ;;  %s7879_s25 = sphi %s7980_s25, %s10297_s25  }
   0x9   : > { %s6402_s30 = sadd.s32 4294967294, %s7891_s28   ;;  %s8005_s14 = sadd.s32 1, %s7891_s28  }
   0xa   : > { %s313_s15 = sadd.s32 1, %s7887_s27  ;;  %s310_s16 = ssub.s32 %s7891_s28, %s8005_s14 }
   0xb   : > { %p323_p0 = scmp.ne.s32.totalorder %s7887_s27, %s7883_s26  ;;  %p311_p1 = scmp.eq.s32.totalorder %s310_s16, 0 }
   0xc   : > { %p324_p2 = scmp.eq.s32.totalorder %s8001_s29, 1  ;;  %p329_p3 = scmp.ne.s32.totalorder %s7883_s26, %s7879_s25 }
   0xd   : > { %p330_p4 = scmp.eq.s32.totalorder %s6402_s30, 1  ;;  %p6403_p7 = scmp.ge.s32.totalorder %s7891_s28, 1 }
   0xe   : > { %s8016_s17 = scalar_select %p311_p1, %s7887_s27, %s313_s15  }
   0xf   : > { %p8018_p5 = por %p324_p2, %p323_p0  ;;  %p8022_p6 = por %p330_p4, %p329_p3 }
  0x10   : > { %10201 = sst [smem:[#allocation15_spill]] %s8016_s17  ;;  %p337_p8 = scmp.lt.s32.totalorder %s7891_s28, 3 }
  0x11   : > { %s10202_s18 = scalar_select %p8018_p5, 1, 0 }
  0x12   : > { %s10203_s19 = scalar_select %p8022_p6, 1, 0 }
  0x13   : > { %p10156_p9 = scmp.eq.s32.totalorder %s8001_s29, 0  ;;  %p8029_p10 = pnand %p6403_p7, %p337_p8 }
  0x14   : > { %s7893_s21 = smov [#allocation7]   ;;  %s7894_s23 = smov [#allocation4]  }
  0x15   : > { %s10204_s20 = scalar_select %p8029_p10, 1, 0 }
  0x16   : > { %s361_s22 = sshll.u32 %s7893_s21, 4  ;;  %p7272_p11 = pneg %p8029_p10  ;;  %s362_s22 = int_to_ptr.vmem [resolvable:$true] %s361_s22 }
  0x17   : > { %s350_s24 = sshll.u32 %s7894_s23, 4  ;;  %s7895_s15 = smov [#allocation9]   ;;  %s351_s24 = int_to_ptr.vmem [resolvable:$true] %s350_s24 }
  0x18   : > { %p8037_p12 = pnand %p10156_p9, %p7272_p11  ;;  %s374_s16 = sshll.u32 %s7895_s15, 4  ;;  %s8041_s16 = int_to_ptr.vmem [resolvable:$true] %s374_s16 }
  0x19   : > { %s7756_s21 = scalar_lea.vmem %s362_s22, 32  ;;  %p7764_p3 = scmp.lt.s32.totalorder %s362_s22, %s362_s22 }
  0x1a   : > { %p7747_p13 = pneg %p8037_p12  ;;  %p7757_p0 = scmp.ne.s32.totalorder %s362_s22, %s7756_s21 }
  0x1b   : > { %p7765_p4 = scmp.lt.s32.totalorder %s7756_s21, %s7756_s21 }
  0x1c   : > { %p7759_p1 = pnand %p7757_p0, %p7747_p13 }
  0x1d   : > { %p7766_p7 = por %p7765_p4, %p7764_p3 }
  0x1e   : > { %p7760_p2 = pneg %p7759_p1 }
  0x20   : > { %p7767_p8 = pnand %p7766_p7, %p7760_p2 }
  0x22   : > { %7770 = shalt.err (!%p7767_p8)
}
  0x23   : > { %7278 = dma.hbm_to_vmem [thread:$0]  (!%p8037_p12), %s10144_s2, 32, %s362_s22, [#allocation8]  }
  0x24   : > { %s7782_s15 = scalar_lea.vmem %s351_s24, 32  ;;  %p7790_p0 = scmp.lt.s32.totalorder %s351_s24, %s351_s24 }
  0x25   : > { %p7783_p11 = scmp.ne.s32.totalorder %s351_s24, %s7782_s15  ;;  %p7791_p1 = scmp.lt.s32.totalorder %s7782_s15, %s7782_s15 }
  0x27   : > { %p7785_p9 = pnand %p7783_p11, %p7747_p13  ;;  %p7792_p5 = por %p7791_p1, %p7790_p0 }
  0x29   : > { %p7786_p6 = pneg %p7785_p9 }
  0x2b   : > { %p7793_p10 = pnand %p7792_p5, %p7786_p6 }
  0x2d   : > { %7796 = shalt.err (!%p7793_p10)
}
  0x2e   : > { %s10206_s1 = sld [smem:[#allocation53_spill]]  ;;  %s7808_s17 = scalar_lea.vmem %s8041_s16, 3072 }
  0x2f   : > { %p7809_p2 = scmp.ne.s32.totalorder %s8041_s16, %s7808_s17  ;;  %p7816_p4 = scmp.lt.s32.totalorder %s8041_s16, %s8041_s16 }
  0x30   : > { %p7817_p5 = scmp.lt.s32.totalorder %s7808_s17, %s7808_s17 }
  0x31   : > { %p7811_p9 = pnand %p7809_p2, %p7747_p13 }
  0x32   : > { %p7818_p6 = por %p7817_p5, %p7816_p4 }
  0x33   : > { %p7812_p3 = pneg %p7811_p9 }
  0x34   : > { %7275 = dma.hbm_to_vmem [thread:$0]  (!%p8037_p12), %s10206_s1, 32, %s351_s24, [#allocation5]  }
  0x35   : > { %p7819_p10 = pnand %p7818_p6, %p7812_p3 }
  0x37   : > { %7822 = shalt.err (!%p7819_p10)
}
  0x38   : > { %s7896_s22 = smov 192   ;;  %s7897_s27 = smov 12  }
  0x39   : > { %7281 = dma.hbm_to_vmem [thread:$0]  (!%p8037_p12), %s10146_s4, 3072, %s8041_s16, [#allocation8], %s7896_s22, %s7896_s22, %s7897_s27  }
  0x3a   : > { %p10207_p7 = scmp.ne.s32.totalorder %s10204_s20, 0 }
  0x3c   : > { %422 = sbr.rel (%p10207_p7) target bundleno = 3053 (0xbed), region = 72 }
  0x41   : > { %p10208_p13 = scmp.eq.s32.totalorder %s8001_s29, 0 }
  0x43   : > { %7866 = dma.done.wait (%p10208_p13), [#allocation5], 32   ;;  %p10209_p8 = pmov %p10208_p13 }
  0x45   : > { %7868 = vsyncadd (%p10209_p8), [#allocation5], 4294967264  ;;  %p10210_p11 = pmov %p10209_p8 }
  0x46   : > { %p10211_p0 = pmov %p10209_p8 }
  0x47   : > { %7870 = dma.done.wait (%p10210_p11), [#allocation8], 3104  }
  0x48   : > { %7872 = vsyncadd (%p10211_p0), [#allocation8], 4294964192  ;;  %p474_p1 = scmp.lt.s32.totalorder %s8001_s29, 1  ;;  %s10212_s0 = sld [smem:[#allocation52_spill]]  ;;  %vm498_vm0 = vcmask 130048   ;;  %v7341_v16 = vld [vmem:[%s10145_s3 + $0x38] sm:$0xff]  }
  0x49   : > { %v10160_v17 = vmov 0   ;;  %v7342_v63 = vld [vmem:[%s10145_s3 + $0x30] sm:$0xff]   ;;  %vm7900_vm1 = vmmov 0   ;;  %s7901_s17 = smov 112   ;;  %s10186_s22 = smov 96   ;;  %vm2294_vm2 = vcmask 261120  }
  0x4a   : > { %s475_s24 = scalar_select %p474_p1, %s8001_s29, 1  ;;  %790 = vmatprep.subr.bf16.mxu0 %v10160_v17  ;;  %1051 = vmatprep.mubr.bf16.mxu1 %v10160_v17  ;;  %vm2297_vm3 = vcmask 392192   ;;  %vm2300_vm4 = vcmask 523264   ;;  %vm2303_vm5 = vcmask 654336   ;;  %vm2306_vm6 = vcmask 785408  }
  0x4b   : > { %791 = vmatpush1.bf16.msra.mxu0 %v7341_v16  ;;  %s10188_s27 = smov 80   ;;  %s10190_s23 = smov 64   ;;  %vm2309_vm7 = vcmask 916480  }
  0x4c   : > { %s6615_s30 = sshll.u32 %s475_s24, 7  ;;  %792 = vmatprep.subr.bf16.mxu0 %v10160_v17  ;;  %s10192_s15 = smov 48  }
  0x4d   : > { %s10194_s24 = smov 32   ;;  %s10287_s16 = smov 48  }
  0x4e   : > { %s8089_s21 = scalar_lea.vmem %s10212_s0, %s6615_s30  ;;  %s10196_s30 = smov 16  }
  0x4f   : > { %v480_v0 = vld [vmem:[%s8089_s21] sm:$0xff]  ;;  %v481_v1 = vld [vmem:[%s8089_s21 + $0x8] sm:$0xff]  ;;  %v482_v2 = vld [vmem:[%s8089_s21 + $0x10] sm:$0xff]  ;;  %793 = vmatpush1.bf16.msra.mxu0 %v7342_v63  ;;  %s10288_s20 = smov 64   ;;  %p10293_p2 = scmp.ne.s32.totalorder %s10202_s18, 0 }
  0x50   : > { %v499_v3 = vsel %vm498_vm0, %v481_v1, 0.0  ;;  %v483_v4 = vld [vmem:[%s8089_s21 + $0x18] sm:$0xff]  ;;  %v484_v5 = vld [vmem:[%s8089_s21 + $0x20] sm:$0xff]  ;;  %v485_v6 = vld [vmem:[%s8089_s21 + $0x28] sm:$0xff]  ;;  %794 = vmatprep.subr.bf16.mxu0 %v10160_v17 }
  0x51   : > { %v500_v7 = vadd.f32 %v499_v3, %v480_v0  ;;  %v503_v8 = vsel %vm498_vm0, %v483_v4, 0.0  ;;  %v507_v9 = vsel %vm498_vm0, %v485_v6, 0.0  ;;  %v486_v10 = vld [vmem:[%s8089_s21 + $0x30] sm:$0xff]  ;;  %v487_v11 = vld [vmem:[%s8089_s21 + $0x38] sm:$0xff]  ;;  %v8114_v24 = vld [vmem:[%s8089_s21 + $0x48] sm:$0xff] }
  0x52   : > { %v508_v12 = vadd.f32 %v507_v9, %v484_v5  ;;  %v511_v13 = vsel %vm498_vm0, %v487_v11, 0.0  ;;  %v504_v14 = vadd.f32 %v503_v8, %v482_v2  ;;  %v515_v33 = vsel %vm498_vm0, %v8114_v24, 0.0  ;;  %v8132_v37 = vld [vmem:[%s8089_s21 + $0x40] sm:$0xff]  ;;  %v8139_v41 = vld [vmem:[%s8089_s21 + $0x58] sm:$0xff]  ;;  %v8153_v49 = vld [vmem:[%s8089_s21 + $0x50] sm:$0xff] }
  0x53   : > { %501 = vadd.xlane.f32.xlu0 %v500_v7  ;;  %v512_v15 = vadd.f32 %v511_v13, %v486_v10  ;;  %v516_v45 = vadd.f32 %v515_v33, %v8132_v37  ;;  %v519_v50 = vsel %vm498_vm0, %v8139_v41, 0.0  ;;  %v8160_v53 = vld [vmem:[%s8089_s21 + $0x68] sm:$0xff]  ;;  %v8166_v57 = vld [vmem:[%s8089_s21 + $0x60] sm:$0xff]  ;;  %v8172_v60 = vld [vmem:[%s8089_s21 + $0x78] sm:$0xff] }
  0x54   : > { %509 = vadd.xlane.f32.xlu1 %v508_v12  ;;  %v520_v55 = vadd.f32 %v519_v50, %v8153_v49  ;;  %v523_v58 = vsel %vm498_vm0, %v8160_v53, 0.0  ;;  %v7343_v3 = vld [vmem:[%s10145_s3 + $0x28] sm:$0xff]   ;;  %v7348_v8 = vld [vmem:[%s10145_s3] sm:$0xff]  }
  0x55   : > { %v524_v61 = vadd.f32 %v523_v58, %v8166_v57  ;;  %795 = vmatpush1.bf16.msra.mxu0 %v7343_v3  ;;  %v7347_v7 = vld [vmem:[%s10145_s3 + $0x8] sm:$0xff]   ;;  %v7349_v9 = vld [vmem:[%s10145_s3 + $0x40] sm:$0xff]  }
  0x56   : > { %796 = vmatprep.subr.bf16.mxu0 %v10160_v17  ;;  %v497_v3 = vld [vmem:[#allocation7] sm:$0x3] }
  0x57   : > { %505 = vadd.xlane.f32.xlu0 %v504_v14 }
  0x58   : > { %513 = vadd.xlane.f32.xlu1 %v512_v15 }
  0xdc   : > { %v502_v18 = vpop.xlane.xlu0 %501 }
  0xdd   : > { %v532_v19 = vmul.f32 0.0069444445, %v502_v18  ;;  %v510_v20 = vpop.xlane.xlu1 %509  ;;  %v645_v18 = vlaneseq }
  0xde   : > { %v534_v21 = vmul.f32 0.0069444445, %v510_v20 }
  0xdf   : > { %v8109_v22 = vsub.f32 %v480_v0, %v532_v19  ;;  %v8111_v23 = vsub.f32 %v481_v1, %v532_v19  ;;  %v8179_v0 = vld [vmem:[%s8089_s21 + $0x70] sm:$0xff]  ;;  %v527_v1 = vsel %vm498_vm0, %v8172_v60, 0.0  ;;  %v646_v33 = vshrl.u32 %v645_v18, 7 }
  0xe0   : > { %v506_v25 = vpop.xlane.xlu0 %505  ;;  %v8116_v26 = vsub.f32 %v485_v6, %v534_v21  ;;  %v8122_v31 = vsub.f32 %v484_v5, %v534_v21  ;;  %v7345_v5 = vld [vmem:[%s10145_s3 + $0x18] sm:$0xff]   ;;  %v7346_v6 = vld [vmem:[%s10145_s3 + $0x10] sm:$0xff]  }
  0xe1   : > { %v533_v27 = vmul.f32 0.0069444445, %v506_v25  ;;  %v556_v28 = vmul.f32 %v8109_v22, %v8109_v22  ;;  %v557_v29 = vmul.f32 %v8111_v23, %v8111_v23  ;;  %v514_v30 = vpop.xlane.xlu1 %513  ;;  %v8235_v50 = vsub.s32 1, %v646_v33 }
  0xe2   : > { %v535_v32 = vmul.f32 0.0069444445, %v514_v30  ;;  %v561_v38 = vmul.f32 %v8116_v26, %v8116_v26  ;;  %v560_v46 = vmul.f32 %v8122_v31, %v8122_v31 }
  0xe3   : > { %v8126_v34 = vsub.f32 %v482_v2, %v533_v27  ;;  %v8128_v35 = vsub.f32 %v483_v4, %v533_v27  ;;  %v572_v36 = vsel %vm498_vm0, %v557_v29, 0.0  ;;  %v528_v2 = vadd.f32 %v527_v1, %v8179_v0  ;;  %v7344_v4 = vld [vmem:[%s10145_s3 + $0x20] sm:$0xff]   ;;  %10214 = vst [vmem:[#allocation17_spill] sm:$0xff] %v8235_v50 }
  0xe4   : > { %v573_v39 = vadd.f32 %v572_v36, %v556_v28  ;;  %v8136_v40 = vsub.f32 %v487_v11, %v535_v32  ;;  %v8145_v44 = vsub.f32 %v486_v10, %v535_v32  ;;  %v580_v48 = vsel %vm498_vm0, %v561_v38, 0.0  ;;  %797 = vmatpush1.bf16.msra.mxu0 %v7344_v4 }
  0xe5   : > { %v558_v42 = vmul.f32 %v8126_v34, %v8126_v34  ;;  %v559_v43 = vmul.f32 %v8128_v35, %v8128_v35  ;;  %v581_v54 = vadd.f32 %v580_v48, %v560_v46  ;;  %798 = vmatprep.subr.bf16.mxu0 %v10160_v17 }
  0xe6   : > { %574 = vadd.xlane.f32.xlu0 %v573_v39  ;;  %v563_v51 = vmul.f32 %v8136_v40, %v8136_v40  ;;  %v562_v56 = vmul.f32 %v8145_v44, %v8145_v44 }
  0xe7   : > { %v576_v47 = vsel %vm498_vm0, %v559_v43, 0.0 }
  0xe8   : > { %v577_v52 = vadd.f32 %v576_v47, %v558_v42  ;;  %v584_v59 = vsel %vm498_vm0, %v563_v51, 0.0  ;;  %799 = vmatpush1.bf16.msra.mxu0 %v7345_v5 }
  0xe9   : > { %v585_v62 = vadd.f32 %v584_v59, %v562_v56  ;;  %800 = vmatprep.subr.bf16.mxu0 %v10160_v17 }
  0xea   : > { %517 = vadd.xlane.f32.xlu0 %v516_v45  ;;  %578 = vadd.xlane.f32.xlu1 %v577_v52 }
  0xec   : > { %801 = vmatpush1.bf16.msra.mxu0 %v7346_v6 }
  0xed   : > { %802 = vmatprep.subr.bf16.mxu0 %v10160_v17 }
  0xee   : > { %582 = vadd.xlane.f32.xlu0 %v581_v54  ;;  %521 = vadd.xlane.f32.xlu1 %v520_v55  ;;  %v496_v54 = vld [vmem:[#allocation4] sm:$0x3] }
  0xf0   : > { %803 = vmatpush1.bf16.msra.mxu0 %v7347_v7 }
  0xf1   : > { %804 = vmatprep.subr.bf16.mxu0 %v10160_v17 }
  0xf2   : > { %525 = vadd.xlane.f32.xlu0 %v524_v61  ;;  %586 = vadd.xlane.f32.xlu1 %v585_v62 }
  0xf4   : > { %805 = vmatpush1.bf16.msra.mxu0 %v7348_v8 }
  0xf5   : > { %820 = vmatprep.subr.bf16.mxu0 %v10160_v17 }
  0xf6   : > { %529 = vadd.xlane.f32.xlu1 %v528_v2 }
  0xf8   : > { %821 = vmatpush2.bf16.msra.mxu0 %v7349_v9 }
 0x16f   : > { %v575_v10 = vpop.xlane.xlu0 %574 }
 0x170   : > { %v604_v11 = vmul.f32 0.0069444445, %v575_v10 }
 0x172   : > { %v612_v12 = vadd.f32 1e-05, %v604_v11  ;;  %v8272_v11 = vrot.slane %v497_v3, %v8235_v50 }
 0x173   : > { %v579_v13 = vpop.xlane.xlu1 %578  ;;  %v518_v14 = vpop.xlane.xlu0 %517 }
 0x174   : > { %7455 = vrsqrt.f32 %v612_v12  ;;  %v605_v15 = vmul.f32 0.0069444445, %v579_v13  ;;  %v536_v16 = vmul.f32 0.0069444445, %v518_v14 }
 0x176   : > { %v613_v19 = vadd.f32 1e-05, %v605_v15  ;;  %v8213_v20 = vsub.f32 %v8132_v37, %v536_v16  ;;  %v8216_v21 = vsub.f32 %v8114_v24, %v536_v16 }
 0x177   : > { %v522_v25 = vpop.xlane.xlu1 %521  ;;  %v583_v27 = vpop.xlane.xlu0 %582 }
 0x178   : > { %7457 = vrsqrt.f32 %v613_v19  ;;  %v537_v28 = vmul.f32 0.0069444445, %v522_v25  ;;  %v606_v29 = vmul.f32 0.0069444445, %v583_v27  ;;  %v564_v30 = vmul.f32 %v8213_v20, %v8213_v20 }
 0x179   : > { %v565_v32 = vmul.f32 %v8216_v21, %v8216_v21 }
 0x17a   : > { %v8223_v36 = vsub.f32 %v8153_v49, %v537_v28  ;;  %v8226_v37 = vsub.f32 %v8139_v41, %v537_v28  ;;  %v614_v24 = vadd.f32 1e-05, %v606_v29  ;;  %v8233_v49 = vsub.s32 0, %v646_v33 }
 0x17b   : > { %v587_v38 = vpop.xlane.xlu1 %586  ;;  %v526_v39 = vpop.xlane.xlu0 %525  ;;  %v588_v42 = vsel %vm498_vm0, %v565_v32, 0.0 }
 0x17c   : > { %7459 = vrsqrt.f32 %v614_v24  ;;  %v607_v43 = vmul.f32 0.0069444445, %v587_v38  ;;  %v538_v45 = vmul.f32 0.0069444445, %v526_v39  ;;  %v589_v46 = vadd.f32 %v588_v42, %v564_v30  ;;  %10213 = vst [vmem:[#allocation16_spill] sm:$0xff] %v8233_v49 }
 0x17d   : > { %v566_v47 = vmul.f32 %v8223_v36, %v8223_v36  ;;  %v567_v48 = vmul.f32 %v8226_v37, %v8226_v37 }
 0x17e   : > { %v615_v41 = vadd.f32 1e-05, %v607_v43  ;;  %v8238_v51 = vsub.f32 %v8166_v57, %v538_v45  ;;  %v8241_v52 = vsub.f32 %v8160_v53, %v538_v45  ;;  %590 = vadd.xlane.f32.xlu0 %v589_v46  ;;  %v8249_v57 = vrot.slane %v496_v54, %v8233_v49 }
 0x17f   : > { %v530_v55 = vpop.xlane.xlu1 %529  ;;  %v592_v56 = vsel %vm498_vm0, %v567_v48, 0.0  ;;  %v8252_v53 = vrot.slane %v496_v54, %v8235_v50  ;;  %v7352_v48 = vld [vmem:[#allocation9 + $0xa8] ss:$12 sps:$4 sm:$0xff]   ;;  %v7358_v54 = vld [vmem:[#allocation9 + $0xb0] ss:$12 sps:$4 sm:$0xff]  }
 0x180   : > { %7461 = vrsqrt.f32 %v615_v41  ;;  %v539_v58 = vmul.f32 0.0069444445, %v530_v55  ;;  %v593_v59 = vadd.f32 %v592_v56, %v566_v47  ;;  %v568_v61 = vmul.f32 %v8238_v51, %v8238_v51  ;;  %v7353_v41 = vld [vmem:[#allocation9 + $0x94] ss:$12 sps:$4 sm:$0xff]   ;;  %v7362_v55 = vld [vmem:[#allocation9 + $0x98] ss:$12 sps:$4 sm:$0xff]   ;;  %6850 = vmatprep.subr.bf16.mxu0 %v7358_v54 }
 0x181   : > { %v7456_v62 = vpop.eup %7455  ;;  %v569_v63 = vmul.f32 %v8241_v52, %v8241_v52  ;;  %v7355_v56 = vld [vmem:[#allocation9 + $0x90] ss:$12 sps:$4 sm:$0xff]  }
 0x182   : > { %v8255_v1 = vsub.f32 %v8179_v0, %v539_v58  ;;  %v8258_v2 = vsub.f32 %v8172_v60, %v539_v58  ;;  %594 = vadd.xlane.f32.xlu1 %v593_v59  ;;  %v629_v4 = vmul.f32 %v7456_v62, %v8111_v23  ;;  %v628_v5 = vmul.f32 %v7456_v62, %v8109_v22  ;;  %v7356_v58 = vld [vmem:[#allocation9 + $0x7c] ss:$12 sps:$4 sm:$0xff]   ;;  %v7366_v59 = vld [vmem:[#allocation9 + $0x80] ss:$12 sps:$4 sm:$0xff]   ;;  %v7360_v62 = vld [vmem:[#allocation9 + $0x64] ss:$12 sps:$4 sm:$0xff]  }
 0x183   : > { %v596_v6 = vsel %vm498_vm0, %v569_v63, 0.0  ;;  %v8269_v60 = vrot.slane %v497_v3, %v8233_v49  ;;  %v7370_v63 = vld [vmem:[#allocation9 + $0x68] ss:$12 sps:$4 sm:$0xff]   ;;  %v7363_v3 = vld [vmem:[#allocation9 + $0x60] ss:$12 sps:$4 sm:$0xff]  }
 0x184   : > { %v597_v7 = vadd.f32 %v596_v6, %v568_v61  ;;  %v570_v8 = vmul.f32 %v8255_v1, %v8255_v1  ;;  %v571_v9 = vmul.f32 %v8258_v2, %v8258_v2  ;;  %v656_v10 = vmul.f32 %v8252_v53, %v629_v4  ;;  %v7359_v61 = vld [vmem:[#allocation9 + $0x78] ss:$12 sps:$4 sm:$0xff]   ;;  %v7367_v6 = vld [vmem:[#allocation9 + $0x48] ss:$12 sps:$4 sm:$0xff]  }
 0x185   : > { %v7458_v0 = vpop.eup %7457  ;;  %v655_v22 = vmul.f32 %v8249_v57, %v628_v5  ;;  %v7364_v4 = vld [vmem:[#allocation9 + $0x4c] ss:$12 sps:$4 sm:$0xff]   ;;  %v7374_v5 = vld [vmem:[#allocation9 + $0x50] ss:$12 sps:$4 sm:$0xff]  }
 0x186   : > { %598 = vadd.xlane.f32.xlu0 %v597_v7  ;;  %v600_v23 = vsel %vm498_vm0, %v571_v9, 0.0  ;;  %v631_v12 = vmul.f32 %v7458_v0, %v8128_v35  ;;  %v630_v13 = vmul.f32 %v7458_v0, %v8126_v34  ;;  %v683_v19 = vadd.f32 %v8272_v11, %v656_v10  ;;  %v7368_v7 = vld [vmem:[#allocation9 + $0x34] ss:$12 sps:$4 sm:$0xff]   ;;  %v7372_v9 = vld [vmem:[#allocation9 + $0x1c] ss:$12 sps:$4 sm:$0xff]  }
 0x187   : > { %v601_v14 = vadd.f32 %v600_v23, %v570_v8  ;;  %v682_v25 = vadd.f32 %v8269_v60, %v655_v22  ;;  %v7371_v8 = vld [vmem:[#allocation9 + $0x30] ss:$12 sps:$4 sm:$0xff]   ;;  %v7375_v0 = vld [vmem:[#allocation9 + $0x18] ss:$12 sps:$4 sm:$0xff]   ;;  %v7379_v23 = vld [vmem:[#allocation9] ss:$12 sps:$4 sm:$0xff]  }
 0x188   : > { %v658_v15 = vmul.f32 %v8252_v53, %v631_v12  ;;  %v657_v16 = vmul.f32 %v8249_v57, %v630_v13  ;;  %v7376_v10 = vld [vmem:[#allocation9 + $0x4] ss:$12 sps:$4 sm:$0xff]   ;;  %v7380_v12 = vld [vmem:[#allocation9 + $0x20] ss:$12 sps:$4 sm:$0xff]   ;;  %v7381_v13 = vld [vmem:[#allocation9 + $0x8] ss:$12 sps:$4 sm:$0xff]  }
 0x189   : > { %v7460_v18 = vpop.eup %7459  ;;  %602 = vadd.xlane.f32.xlu1 %v601_v14  ;;  %v7378_v22 = vld [vmem:[#allocation9 + $0x38] ss:$12 sps:$4 sm:$0xff]  }
 0x18a   : > { %v685_v27 = vadd.f32 %v8272_v11, %v658_v15  ;;  %v684_v28 = vadd.f32 %v8269_v60, %v657_v16  ;;  %v633_v29 = vmul.f32 %v7460_v18, %v8116_v26  ;;  %v632_v35 = vmul.f32 %v7460_v18, %v8122_v31 }
 0x18c   : > { %v699_v34 = vpack.c.bf16 %v685_v27, %v683_v19  ;;  %v698_v30 = vpack.c.bf16 %v684_v28, %v682_v25  ;;  %v660_v24 = vmul.f32 %v8252_v53, %v633_v29  ;;  %v659_v39 = vmul.f32 %v8249_v57, %v632_v35 }
 0x18d   : > { %v7462_v32 = vpop.eup %7461 }
 0x18e   : > { %6424 = vmatprep.mubr.msk.bf16.mxu0 %vm498_vm0, %v699_v34  ;;  %v635_v33 = vmul.f32 %v7462_v32, %v8136_v40  ;;  %v634_v38 = vmul.f32 %v7462_v32, %v8145_v44  ;;  %v687_v31 = vadd.f32 %v8272_v11, %v660_v24  ;;  %v686_v45 = vadd.f32 %v8269_v60, %v659_v39  ;;  %v7350_v44 = vld [vmem:[#allocation9 + $0xac] ss:$12 sps:$4 sm:$0xff]  }
 0x18f   : > { %823 = vmatmul.mubr.bf16.vlgmr.msra.gmra.mxu0 %v698_v30  ;;  %1019 = vmatprep.subr.bf16.mxu1 %v7350_v44 }
 0x190   : > { %v662_v42 = vmul.f32 %v8252_v53, %v635_v33  ;;  %v661_v26 = vmul.f32 %v8249_v57, %v634_v38  ;;  %1020 = vmatpush1.bf16.msra.mxu1 %v7352_v48  ;;  %6851 = vmatpush3.bf16.msra.mxu0 %v7358_v54 }
 0x191   : > { %1021 = vmatprep.subr.bf16.mxu1 %v7353_v41  ;;  %6852 = vmatprep.subr.bf16.mxu0 %v7362_v55 }
 0x192   : > { %v689_v43 = vadd.f32 %v8272_v11, %v662_v42  ;;  %v688_v46 = vadd.f32 %v8269_v60, %v661_v26 }
 0x194   : > { %v701_v40 = vpack.c.bf16 %v689_v43, %v687_v31  ;;  %v700_v47 = vpack.c.bf16 %v688_v46, %v686_v45  ;;  %1022 = vmatpush1.bf16.msra.mxu1 %v7355_v56  ;;  %6853 = vmatpush3.bf16.msra.mxu0 %v7362_v55 }
 0x195   : > { %1023 = vmatprep.subr.bf16.mxu1 %v7356_v58  ;;  %6854 = vmatprep.subr.bf16.mxu0 %v7366_v59 }
 0x196   : > { %6425 = vmatprep.mubr.msk.bf16.mxu0 %vm498_vm0, %v701_v40 }
 0x197   : > { %831 = vmatmul.mubr.bf16.gmra.mxu0 %v700_v47 }
 0x198   : > { %1024 = vmatpush1.bf16.msra.mxu1 %v7359_v61  ;;  %6855 = vmatpush3.bf16.msra.mxu0 %v7366_v59 }
 0x199   : > { %1025 = vmatprep.subr.bf16.mxu1 %v7360_v62  ;;  %6856 = vmatprep.subr.bf16.mxu0 %v7370_v63 }
 0x19c   : > { %1026 = vmatpush1.bf16.msra.mxu1 %v7363_v3  ;;  %6857 = vmatpush3.bf16.msra.mxu0 %v7370_v63 }
 0x19d   : > { %1027 = vmatprep.subr.bf16.mxu1 %v7364_v4  ;;  %6858 = vmatprep.subr.bf16.mxu0 %v7374_v5 }
 0x1a0   : > { %1028 = vmatpush1.bf16.msra.mxu1 %v7367_v6  ;;  %6859 = vmatpush3.bf16.msra.mxu0 %v7374_v5 }
 0x1a1   : > { %1029 = vmatprep.subr.bf16.mxu1 %v7368_v7  ;;  %6860 = vmatprep.subr.bf16.mxu0 %v7378_v22 }
 0x1a4   : > { %1030 = vmatpush1.bf16.msra.mxu1 %v7371_v8  ;;  %6861 = vmatpush3.bf16.msra.mxu0 %v7378_v22 }
 0x1a5   : > { %1031 = vmatprep.subr.bf16.mxu1 %v7372_v9  ;;  %6862 = vmatprep.subr.bf16.mxu0 %v7380_v12 }
 0x1a8   : > { %1032 = vmatpush1.bf16.msra.mxu1 %v7375_v0  ;;  %6863 = vmatpush3.bf16.msra.mxu0 %v7380_v12 }
 0x1a9   : > { %1033 = vmatprep.subr.bf16.mxu1 %v7376_v10  ;;  %6864 = vmatprep.subr.bf16.mxu0 %v7381_v13 }
 0x1ac   : > { %1034 = vmatpush1.bf16.msra.mxu1 %v7379_v23  ;;  %6865 = vmatpush3.bf16.msra.mxu0 %v7381_v13 }
 0x207   : > { %v591_v14 = vpop.xlane.xlu0 %590 }
 0x208   : > { %v608_v15 = vmul.f32 0.0069444445, %v591_v14 }
 0x20a   : > { %v616_v16 = vadd.f32 1e-05, %v608_v15 }
 0x20b   : > { %v595_v18 = vpop.xlane.xlu1 %594 }
 0x20c   : > { %7463 = vrsqrt.f32 %v616_v16  ;;  %v609_v19 = vmul.f32 0.0069444445, %v595_v18 }
 0x20e   : > { %v617_v25 = vadd.f32 1e-05, %v609_v19 }
 0x20f   : > { %v599_v27 = vpop.xlane.xlu0 %598 }
 0x210   : > { %7465 = vrsqrt.f32 %v617_v25  ;;  %v610_v28 = vmul.f32 0.0069444445, %v599_v27 }
 0x212   : > { %v618_v29 = vadd.f32 1e-05, %v610_v28  ;;  %v603_v35 = vpop.xlane.xlu1 %602 }
 0x213   : > { %v611_v34 = vmul.f32 0.0069444445, %v603_v35 }
 0x214   : > { %7467 = vrsqrt.f32 %v618_v29 }
 0x215   : > { %v619_v30 = vadd.f32 1e-05, %v611_v34 }
 0x217   : > { %7469 = vrsqrt.f32 %v619_v30 }
 0x219   : > { %v7464_v32 = vpop.eup %7463 }
 0x21a   : > { %v637_v33 = vmul.f32 %v7464_v32, %v8216_v21  ;;  %v636_v24 = vmul.f32 %v7464_v32, %v8213_v20 }
 0x21c   : > { %v664_v39 = vmul.f32 %v8252_v53, %v637_v33  ;;  %v663_v42 = vmul.f32 %v8249_v57, %v636_v24 }
 0x21d   : > { %v7466_v38 = vpop.eup %7465 }
 0x21e   : > { %v639_v26 = vmul.f32 %v7466_v38, %v8226_v37  ;;  %v638_v31 = vmul.f32 %v7466_v38, %v8223_v36  ;;  %v691_v40 = vadd.f32 %v8272_v11, %v664_v39  ;;  %v690_v21 = vadd.f32 %v8269_v60, %v663_v42 }
 0x220   : > { %v666_v43 = vmul.f32 %v8252_v53, %v639_v26  ;;  %v665_v45 = vmul.f32 %v8249_v57, %v638_v31 }
 0x221   : > { %v7468_v46 = vpop.eup %7467 }
 0x222   : > { %v693_v20 = vadd.f32 %v8272_v11, %v666_v43  ;;  %v692_v47 = vadd.f32 %v8269_v60, %v665_v45  ;;  %v641_v44 = vmul.f32 %v7468_v46, %v8241_v52  ;;  %v640_v48 = vmul.f32 %v7468_v46, %v8238_v51 }
 0x224   : > { %v7470_v37 = vpop.eup %7469  ;;  %v703_v41 = vpack.c.bf16 %v693_v20, %v691_v40  ;;  %v702_v36 = vpack.c.bf16 %v692_v47, %v690_v21  ;;  %v668_v55 = vmul.f32 %v8252_v53, %v641_v44  ;;  %v667_v58 = vmul.f32 %v8249_v57, %v640_v48 }
 0x225   : > { %v643_v54 = vmul.f32 %v7470_v37, %v8258_v2  ;;  %v642_v56 = vmul.f32 %v7470_v37, %v8255_v1 }
 0x226   : > { %6426 = vmatprep.mubr.msk.bf16.mxu0 %vm498_vm0, %v703_v41  ;;  %v695_v51 = vadd.f32 %v8272_v11, %v668_v55  ;;  %v694_v62 = vadd.f32 %v8269_v60, %v667_v58 }
 0x227   : > { %839 = vmatmul.mubr.bf16.gmra.mxu0 %v702_v36  ;;  %v670_v59 = vmul.f32 %v8252_v53, %v643_v54  ;;  %v669_v52 = vmul.f32 %v8249_v57, %v642_v56 }
 0x229   : > { %v697_v61 = vadd.f32 %v8272_v11, %v670_v59  ;;  %v696_v2 = vadd.f32 %v8269_v60, %v669_v52  ;;  %v10162_v60 = vmov 0.0  }
 0x22a   : > { %6874 = vmatprep.subr.bf16.mxu0 %v10162_v60  ;;  %6886 = vmatprep.subr.bf16.mxu1 %v10162_v60 }
 0x22b   : > { %v705_v63 = vpack.c.bf16 %v697_v61, %v695_v51  ;;  %v704_v3 = vpack.c.bf16 %v696_v2, %v694_v62 }
 0x22d   : > { %6427 = vmatprep.mubr.msk.bf16.mxu0 %vm498_vm0, %v705_v63 }
 0x22f   : > { %847 = vmatmul.mubr.bf16.gmra.mxu0 %v704_v3 }
 0x24f   : > { %v824_v1 = vpop.f32.mrf.mxu0 }
 0x251   : > { %v826_v4 = vpop.f32.mrf.mxu0 }
 0x253   : > { %v827_v5 = vpop.f32.mrf.mxu0 }
 0x254   : > { %v855_v6 = vpack.c.bf16 %v827_v5, %v824_v1 }
 0x255   : > { %v829_v53 = vpop.f32.mrf.mxu0 }
 0x256   : > { %1052 = vmatmul.mubr.bf16.vlgmr.msra.gmra.mxu1 %v855_v6  ;;  %6866 = vmatprep.mubr.bf16.mxu0 %v855_v6 }
 0x257   : > { %v832_v57 = vpop.f32.mrf.mxu0  ;;  %1061 = vmatprep.mubr.bf16.mxu1 %v10160_v17 }
 0x259   : > { %v834_v11 = vpop.f32.mrf.mxu0 }
 0x25b   : > { %v835_v7 = vpop.f32.mrf.mxu0 }
 0x25c   : > { %v856_v8 = vpack.c.bf16 %v835_v7, %v832_v57 }
 0x25d   : > { %v837_v9 = vpop.f32.mrf.mxu0 }
 0x25e   : > { %1062 = vmatmul.mubr.bf16.gmra.mxu1 %v856_v8  ;;  %6867 = vmatmul.mubr.bf16.vlgmr.msra.gmra.mxu0 %v856_v8 }
 0x25f   : > { %1071 = vmatprep.mubr.bf16.mxu1 %v10160_v17 }
 0x2e7   : > { %v840_v0 = vpop.f32.mrf.mxu0 }
 0x2e9   : > { %v842_v10 = vpop.f32.mrf.mxu0 }
 0x2eb   : > { %v843_v22 = vpop.f32.mrf.mxu0 }
 0x2ec   : > { %v857_v23 = vpack.c.bf16 %v843_v22, %v840_v0 }
 0x2ed   : > { %v845_v12 = vpop.f32.mrf.mxu0 }
 0x2ee   : > { %1072 = vmatmul.mubr.bf16.gmra.mxu1 %v857_v23  ;;  %6870 = vmatprep.mubr.bf16.mxu0 %v857_v23 }
 0x2ef   : > { %v848_v13 = vpop.f32.mrf.mxu0  ;;  %1081 = vmatprep.mubr.bf16.mxu1 %v10160_v17 }
 0x2f1   : > { %v850_v14 = vpop.f32.mrf.mxu0 }
 0x2f3   : > { %v851_v15 = vpop.f32.mrf.mxu0 }
 0x2f4   : > { %v858_v16 = vpack.c.bf16 %v851_v15, %v848_v13 }
 0x2f5   : > { %v853_v18 = vpop.f32.mrf.mxu0 }
 0x2f6   : > { %1082 = vmatmul.mubr.bf16.gmra.mxu1 %v858_v16  ;;  %6871 = vmatmul.mubr.bf16.gmra.mxu0 %v858_v16 }
 0x2f7   : > { %6876 = vmatprep.mubr.msk.bf16.mxu0 %vm7900_vm1, %v10162_v60  ;;  %6888 = vmatprep.mubr.msk.bf16.mxu1 %vm7900_vm1, %v10162_v60 }
 0x316   : > { %v1053_v19 = vpop.f32.mrf.mxu1 }
 0x318   : > { %v1055_v25 = vpop.f32.mrf.mxu1 }
 0x31a   : > { %v1057_v27 = vpop.f32.mrf.mxu1 }
 0x31b   : > { %v6644_v28 = vpack.c.bf16 %v1057_v27, %v1053_v19 }
 0x31c   : > { %v1059_v29 = vpop.f32.mrf.mxu1 }
 0x31d   : > { %6645 = vst [vmem:[#allocation2] sm:$0xff] %v6644_v28   ;;  %v6664_v35 = vpack.c.bf16 %v1059_v29, %v1055_v25 }
 0x31e   : > { %v1063_v34 = vpop.f32.mrf.mxu1  ;;  %v6868_v30 = vpop.f32.mrf.mxu0 }
 0x31f   : > { %6665 = vst [vmem:[#allocation2 + $0x20] sm:$0xff] %v6664_v35  }
 0x320   : > { %v1065_v32 = vpop.f32.mrf.mxu1  ;;  %v1126_v33 = vpop.f32.mrf.mxu0 }
 0x322   : > { %v1067_v24 = vpop.f32.mrf.mxu1  ;;  %v6869_v38 = vpop.f32.mrf.mxu0 }
 0x323   : > { %v6649_v39 = vpack.c.bf16 %v1067_v24, %v1063_v34  ;;  %v6689_v42 = vpack.c.bf16 %v6869_v38, %v6868_v30 }
 0x324   : > { %v1069_v26 = vpop.f32.mrf.mxu1  ;;  %v1129_v31 = vpop.f32.mrf.mxu0  ;;  %v7382_v43 = vld [vmem:[#allocation2] sm:$0xff]  }
 0x325   : > { %6701 = vst [vmem:[#allocation2 + $0x8] sm:$0xff] %v6649_v39   ;;  %6707 = vst [vmem:[#allocation2 + $0x48] sm:$0xff] %v6689_v42   ;;  %v6669_v45 = vpack.c.bf16 %v1069_v26, %v1065_v32  ;;  %v6684_v46 = vpack.c.bf16 %v1129_v31, %v1126_v33  ;;  %1416 = vrot.lane.b32.xlu1 %v7382_v43, %s7901_s17 }
 0x326   : > { %v7383_v40 = vld [vmem:[#allocation2 + $0x20] sm:$0xff]  }
 0x327   : > { %6704 = vst [vmem:[#allocation2 + $0x28] sm:$0xff] %v6669_v45   ;;  %6685 = vst [vmem:[#allocation2 + $0x40] sm:$0xff] %v6684_v46   ;;  %1418 = vrot.lane.b32.xlu0 %v7383_v40, %s7901_s17  ;;  %v1299_v21 = vsel %vm498_vm0, %v7383_v40, 0 }
 0x328   : > { %6875 = vmatpush3.bf16.xpose.msra.mxu0 %v1299_v21 }
 0x329   : > { %1540 = vrot.lane.b32.xlu1 %v7383_v40, %s10186_s22  ;;  %6880 = vmatprep.subr.bf16.mxu0 %v10162_v60 }
 0x32b   : > { %1662 = vrot.lane.b32.xlu0 %v7383_v40, %s10188_s27 }
 0x32c   : > { %v8362_v44 = vld [vmem:[#allocation2 + $0x8] sm:$0xff]  }
 0x32d   : > { %1538 = vrot.lane.b32.xlu1 %v7382_v43, %s10186_s22  ;;  %v7389_v28 = vld [vmem:[#allocation2 + $0x48] sm:$0xff]  }
 0x32e   : > { %v8340_v20 = vld [vmem:[#allocation2 + $0x40] sm:$0xff]   ;;  %v8355_v47 = vld [vmem:[#allocation2 + $0x28] sm:$0xff]  }
 0x32f   : > { %1784 = vrot.lane.b32.xlu0 %v7383_v40, %s10190_s23  ;;  %6877 = vmatmul.mubr.msk.bf16.vlgmr.msra.gmra.mxu0 %vm498_vm0, %v7382_v43  ;;  %v2341_v34 = vsel %vm498_vm0, %v8355_v47, 0 }
 0x330   : > { %6881 = vmatpush3.bf16.msra.mxu0 %v8340_v20  ;;  %6882 = vmatprep.mubr.msk.bf16.mxu0 %vm7900_vm1, %v10162_v60 }
 0x331   : > { %1660 = vrot.lane.b32.xlu1 %v7382_v43, %s10188_s27  ;;  %6892 = vmatprep.subr.bf16.mxu0 %v10162_v60 }
 0x333   : > { %1906 = vrot.lane.b32.xlu0 %v7383_v40, %s10192_s15 }
 0x335   : > { %1782 = vrot.lane.b32.xlu1 %v7382_v43, %s10190_s23 }
 0x337   : > { %2028 = vrot.lane.b32.xlu0 %v7383_v40, %s10194_s24 }
 0x339   : > { %1904 = vrot.lane.b32.xlu1 %v7382_v43, %s10192_s15 }
 0x33b   : > { %2150 = vrot.lane.b32.xlu0 %v7383_v40, %s10196_s30 }
 0x33d   : > { %2026 = vrot.lane.b32.xlu1 %v7382_v43, %s10194_s24 }
 0x33f   : > { %2460 = vrot.lane.b32.xlu0 %v8355_v47, %s7901_s17 }
 0x341   : > { %2148 = vrot.lane.b32.xlu1 %v7382_v43, %s10196_s30 }
 0x343   : > { %2582 = vrot.lane.b32.xlu0 %v8355_v47, %s10186_s22 }
 0x345   : > { %2458 = vrot.lane.b32.xlu1 %v8362_v44, %s7901_s17 }
 0x347   : > { %2704 = vrot.lane.b32.xlu0 %v8355_v47, %s10188_s27 }
 0x349   : > { %2580 = vrot.lane.b32.xlu1 %v8362_v44, %s10186_s22 }
 0x34b   : > { %2826 = vrot.lane.b32.xlu0 %v8355_v47, %s10190_s23 }
 0x34d   : > { %2702 = vrot.lane.b32.xlu1 %v8362_v44, %s10188_s27 }
 0x34f   : > { %2948 = vrot.lane.b32.xlu0 %v8355_v47, %s10192_s15 }
 0x351   : > { %2824 = vrot.lane.b32.xlu1 %v8362_v44, %s10190_s23 }
 0x353   : > { %3070 = vrot.lane.b32.xlu0 %v8355_v47, %s10194_s24 }
 0x355   : > { %2946 = vrot.lane.b32.xlu1 %v8362_v44, %s10192_s15 }
 0x357   : > { %3192 = vrot.lane.b32.xlu0 %v8355_v47, %s10196_s30 }
 0x359   : > { %3068 = vrot.lane.b32.xlu1 %v8362_v44, %s10194_s24 }
 0x35b   : > { %1490 = vrot.lane.b32.xlu0 %v8340_v20, %s7901_s17 }
 0x35d   : > { %3190 = vrot.lane.b32.xlu1 %v8362_v44, %s10196_s30 }
 0x35f   : > { %1734 = vrot.lane.b32.xlu0 %v8340_v20, %s10188_s27 }
 0x361   : > { %1612 = vrot.lane.b32.xlu1 %v8340_v20, %s10186_s22 }
 0x363   : > { %1856 = vrot.lane.b32.xlu0 %v8340_v20, %s10190_s23 }
 0x365   : > { %1978 = vrot.lane.b32.xlu1 %v8340_v20, %s10192_s15 }
 0x397   : > { %v1417_v48 = vpop.permute.xlu1 %1416 }
 0x399   : > { %v1419_v37 = vpop.permute.xlu0 %1418 }
 0x39a   : > { %v1424_v41 = vsel %vm498_vm0, %v1419_v37, 0 }
 0x39b   : > { %6887 = vmatpush3.bf16.xpose.msra.mxu1 %v1424_v41  ;;  %v1541_v36 = vpop.permute.xlu1 %1540 }
 0x39c   : > { %6898 = vmatprep.subr.bf16.mxu1 %v10162_v60  ;;  %v1546_v54 = vsel %vm498_vm0, %v1541_v36, 0 }
 0x39d   : > { %v1663_v55 = vpop.permute.xlu0 %1662 }
 0x39e   : > { %v1668_v58 = vsel %vm498_vm0, %v1663_v55, 0 }
 0x39f   : > { %v1539_v56 = vpop.permute.xlu1 %1538 }
 0x3a1   : > { %v1785_v52 = vpop.permute.xlu0 %1784 }
 0x3a2   : > { %6889 = vmatmul.mubr.msk.bf16.vlgmr.msra.gmra.mxu1 %vm498_vm0, %v1417_v48  ;;  %v1790_v2 = vsel %vm498_vm0, %v1785_v52, 0 }
 0x3a3   : > { %6899 = vmatpush3.bf16.xpose.msra.mxu1 %v1546_v54  ;;  %6900 = vmatprep.mubr.msk.bf16.mxu1 %vm7900_vm1, %v10162_v60  ;;  %v1661_v61 = vpop.permute.xlu1 %1660 }
 0x3a4   : > { %6910 = vmatprep.subr.bf16.mxu1 %v10162_v60 }
 0x3a5   : > { %v1907_v6 = vpop.permute.xlu0 %1906 }
 0x3a6   : > { %v1912_v9 = vsel %vm498_vm0, %v1907_v6, 0 }
 0x3a7   : > { %v1783_v11 = vpop.permute.xlu1 %1782 }
 0x3a9   : > { %v2029_v16 = vpop.permute.xlu0 %2028 }
 0x3aa   : > { %6901 = vmatmul.mubr.msk.bf16.vlgmr.msra.gmra.mxu1 %vm498_vm0, %v1539_v56  ;;  %v2034_v19 = vsel %vm498_vm0, %v2029_v16, 0 }
 0x3ab   : > { %6911 = vmatpush3.bf16.xpose.msra.mxu1 %v1668_v58  ;;  %6912 = vmatprep.mubr.msk.bf16.mxu1 %vm7900_vm1, %v10162_v60  ;;  %v1905_v18 = vpop.permute.xlu1 %1904 }
 0x3ac   : > { %6922 = vmatprep.subr.bf16.mxu1 %v10162_v60 }
 0x3ad   : > { %v2151_v25 = vpop.permute.xlu0 %2150 }
 0x3ae   : > { %v1073_v59 = vpop.f32.mrf.mxu1  ;;  %v2156_v29 = vsel %vm498_vm0, %v2151_v25, 0 }
 0x3af   : > { %v2027_v27 = vpop.permute.xlu1 %2026 }
 0x3b0   : > { %v1075_v51 = vpop.f32.mrf.mxu1 }
 0x3b1   : > { %v2461_v30 = vpop.permute.xlu0 %2460 }
 0x3b2   : > { %v1077_v62 = vpop.f32.mrf.mxu1  ;;  %6913 = vmatmul.mubr.msk.bf16.vlgmr.msra.gmra.mxu1 %vm498_vm0, %v1661_v61  ;;  %v2466_v32 = vsel %vm498_vm0, %v2461_v30, 0 }
 0x3b3   : > { %v6654_v63 = vpack.c.bf16 %v1077_v62, %v1073_v59  ;;  %6923 = vmatpush3.bf16.xpose.msra.mxu1 %v1790_v2  ;;  %6924 = vmatprep.mubr.msk.bf16.mxu1 %vm7900_vm1, %v10162_v60  ;;  %v2149_v35 = vpop.permute.xlu1 %2148 }
 0x3b4   : > { %v1079_v3 = vpop.f32.mrf.mxu1  ;;  %6934 = vmatprep.subr.bf16.mxu1 %v10162_v60 }
 0x3b5   : > { %6702 = vst [vmem:[#allocation2 + $0x10] sm:$0xff] %v6654_v63   ;;  %v6674_v1 = vpack.c.bf16 %v1079_v3, %v1075_v51  ;;  %v2583_v33 = vpop.permute.xlu0 %2582 }
 0x3b6   : > { %v1083_v4 = vpop.f32.mrf.mxu1  ;;  %v6872_v5 = vpop.f32.mrf.mxu0  ;;  %v2588_v38 = vsel %vm498_vm0, %v2583_v33, 0 }
 0x3b7   : > { %6705 = vst [vmem:[#allocation2 + $0x30] sm:$0xff] %v6674_v1   ;;  %v2459_v24 = vpop.permute.xlu1 %2458 }
 0x3b8   : > { %v1085_v53 = vpop.f32.mrf.mxu1  ;;  %v1142_v57 = vpop.f32.mrf.mxu0 }
 0x3b9   : > { %v2705_v39 = vpop.permute.xlu0 %2704 }
 0x3ba   : > { %v1087_v7 = vpop.f32.mrf.mxu1  ;;  %v6873_v8 = vpop.f32.mrf.mxu0  ;;  %6925 = vmatmul.mubr.msk.bf16.vlgmr.msra.gmra.mxu1 %vm498_vm0, %v1783_v11  ;;  %v2710_v31 = vsel %vm498_vm0, %v2705_v39, 0 }
 0x3bb   : > { %v6659_v0 = vpack.c.bf16 %v1087_v7, %v1083_v4  ;;  %v6699_v10 = vpack.c.bf16 %v6873_v8, %v6872_v5  ;;  %6935 = vmatpush3.bf16.xpose.msra.mxu1 %v1912_v9  ;;  %6936 = vmatprep.mubr.msk.bf16.mxu1 %vm7900_vm1, %v10162_v60  ;;  %v2581_v26 = vpop.permute.xlu1 %2580 }
 0x3bc   : > { %v1089_v22 = vpop.f32.mrf.mxu1  ;;  %v1145_v23 = vpop.f32.mrf.mxu0  ;;  %v8417_v12 = vld [vmem:[#allocation2 + $0x10] sm:$0xff]   ;;  %6946 = vmatprep.subr.bf16.mxu1 %v10162_v60 }
 0x3bd   : > { %6703 = vst [vmem:[#allocation2 + $0x18] sm:$0xff] %v6659_v0   ;;  %6709 = vst [vmem:[#allocation2 + $0x58] sm:$0xff] %v6699_v10   ;;  %v6679_v13 = vpack.c.bf16 %v1089_v22, %v1085_v53  ;;  %v6694_v14 = vpack.c.bf16 %v1145_v23, %v1142_v57  ;;  %3494 = vrot.lane.b32.xlu1 %v8417_v12, %s7901_s17  ;;  %v2827_v45 = vpop.permute.xlu0 %2826 }
 0x3be   : > { %v8424_v15 = vld [vmem:[#allocation2 + $0x30] sm:$0xff]  }
 0x3bf   : > { %6706 = vst [vmem:[#allocation2 + $0x38] sm:$0xff] %v6679_v13   ;;  %6708 = vst [vmem:[#allocation2 + $0x50] sm:$0xff] %v6694_v14   ;;  %3496 = vrot.lane.b32.xlu0 %v8424_v15, %s7901_s17  ;;  %v2703_v40 = vpop.permute.xlu1 %2702  ;;  %v3377_v61 = vsel %vm498_vm0, %v8424_v15, 0 }
 0x3c1   : > { %3616 = vrot.lane.b32.xlu1 %v8417_v12, %s10186_s22  ;;  %v2949_v48 = vpop.permute.xlu0 %2948 }
 0x3c2   : > { %6937 = vmatmul.mubr.msk.bf16.vlgmr.msra.gmra.mxu1 %vm498_vm0, %v1905_v18  ;;  %v2954_v41 = vsel %vm498_vm0, %v2949_v48, 0 }
 0x3c3   : > { %2100 = vrot.lane.b32.xlu0 %v8340_v20, %s10194_s24  ;;  %6947 = vmatpush3.bf16.xpose.msra.mxu1 %v2034_v19  ;;  %v2825_v37 = vpop.permute.xlu1 %2824 }
 0x3c4   : > { %6948 = vmatprep.mubr.msk.bf16.mxu1 %vm7900_vm1, %v10162_v60  ;;  %6958 = vmatprep.subr.bf16.mxu1 %v10162_v60  ;;  %v8488_v42 = vld [vmem:[#allocation2 + $0x18] sm:$0xff]  }
 0x3c5   : > { %3738 = vrot.lane.b32.xlu1 %v8417_v12, %s10188_s27  ;;  %v3071_v36 = vpop.permute.xlu0 %3070 }
 0x3c6   : > { %v8501_v43 = vld [vmem:[#allocation2 + $0x38] sm:$0xff]   ;;  %v3076_v55 = vsel %vm498_vm0, %v3071_v36, 0  ;;  %v8541_v56 = vld [vmem:[#allocation2 + $0x50] sm:$0xff]  }
 0x3c7   : > { %3618 = vrot.lane.b32.xlu0 %v8424_v15, %s10186_s22  ;;  %v2947_v54 = vpop.permute.xlu1 %2946 }
 0x3c9   : > { %3860 = vrot.lane.b32.xlu1 %v8417_v12, %s10190_s23  ;;  %v3193_v58 = vpop.permute.xlu0 %3192 }
 0x3ca   : > { %6949 = vmatmul.mubr.msk.bf16.vlgmr.msra.gmra.mxu1 %vm498_vm0, %v2027_v27  ;;  %v3198_v52 = vsel %vm498_vm0, %v3193_v58, 0 }
 0x3cb   : > { %2532 = vrot.lane.b32.xlu0 %v7389_v28, %s7901_s17  ;;  %6959 = vmatpush3.bf16.xpose.msra.mxu1 %v2156_v29  ;;  %v3069_v59 = vpop.permute.xlu1 %3068 }
 0x3cc   : > { %6960 = vmatprep.mubr.msk.bf16.mxu1 %vm7900_vm1, %v10162_v60  ;;  %6970 = vmatprep.subr.bf16.mxu1 %v10162_v60 }
 0x3cd   : > { %3982 = vrot.lane.b32.xlu1 %v8417_v12, %s10192_s15  ;;  %v8575_v62 = vpop.permute.xlu0 %1490 }
 0x3cf   : > { %3740 = vrot.lane.b32.xlu0 %v8424_v15, %s10188_s27  ;;  %v3191_v51 = vpop.permute.xlu1 %3190 }
 0x3d1   : > { %4104 = vrot.lane.b32.xlu1 %v8417_v12, %s10194_s24  ;;  %v8577_v2 = vpop.permute.xlu0 %1734 }
 0x3d2   : > { %6961 = vmatmul.mubr.msk.bf16.vlgmr.msra.gmra.mxu1 %vm498_vm0, %v2149_v35 }
 0x3d3   : > { %2776 = vrot.lane.b32.xlu0 %v7389_v28, %s10188_s27  ;;  %6971 = vmatpush3.bf16.xpose.msra.mxu1 %v2341_v34  ;;  %v8579_v63 = vpop.permute.xlu1 %1612 }
 0x3d4   : > { %6972 = vmatprep.mubr.msk.bf16.mxu1 %vm7900_vm1, %v10162_v60  ;;  %6982 = vmatprep.subr.bf16.mxu1 %v10162_v60 }
 0x3d5   : > { %4226 = vrot.lane.b32.xlu1 %v8417_v12, %s10196_s30  ;;  %v8581_v3 = vpop.permute.xlu0 %1856 }
 0x3d7   : > { %3862 = vrot.lane.b32.xlu0 %v8424_v15, %s10190_s23  ;;  %v8586_v6 = vpop.permute.xlu1 %1978 }
 0x3d8   : > { %10215 = vst [vmem:[#allocation18_spill] sm:$0xff] %v8586_v6 }
 0x3d9   : > { %2222 = vrot.lane.b32.xlu1 %v8340_v20, %s10196_s30  ;;  %v2832_v20 = vsel %vm498_vm0, %v2827_v45, 0 }
 0x3da   : > { %6973 = vmatmul.mubr.msk.bf16.vlgmr.msra.gmra.mxu1 %vm498_vm0, %v8362_v44 }
 0x3db   : > { %3020 = vrot.lane.b32.xlu0 %v7389_v28, %s10192_s15  ;;  %6983 = vmatpush3.bf16.xpose.msra.mxu1 %v2466_v32 }
 0x3dc   : > { %6984 = vmatprep.mubr.msk.bf16.mxu1 %vm7900_vm1, %v10162_v60  ;;  %6994 = vmatprep.subr.bf16.mxu1 %v10162_v60 }
 0x3dd   : > { %2654 = vrot.lane.b32.xlu1 %v7389_v28, %s10186_s22 }
 0x3df   : > { %3984 = vrot.lane.b32.xlu0 %v8424_v15, %s10192_s15 }
 0x3e1   : > { %2898 = vrot.lane.b32.xlu1 %v7389_v28, %s10190_s23 }
 0x3e2   : > { %6985 = vmatmul.mubr.msk.bf16.vlgmr.msra.gmra.mxu1 %vm498_vm0, %v2459_v24 }
 0x3e3   : > { %3264 = vrot.lane.b32.xlu0 %v7389_v28, %s10196_s30  ;;  %6995 = vmatpush3.bf16.xpose.msra.mxu1 %v2588_v38 }
 0x3e4   : > { %6996 = vmatprep.mubr.msk.bf16.mxu1 %vm7900_vm1, %v10162_v60  ;;  %7006 = vmatprep.subr.bf16.mxu1 %v10162_v60 }
 0x3e5   : > { %3142 = vrot.lane.b32.xlu1 %v7389_v28, %s10194_s24 }
 0x3e7   : > { %4106 = vrot.lane.b32.xlu0 %v8424_v15, %s10194_s24 }
 0x3e9   : > { %4530 = vrot.lane.b32.xlu1 %v8488_v42, %s7901_s17 }
 0x3ea   : > { %6997 = vmatmul.mubr.msk.bf16.vlgmr.msra.gmra.mxu1 %vm498_vm0, %v2581_v26 }
 0x3eb   : > { %4228 = vrot.lane.b32.xlu0 %v8424_v15, %s10196_s30  ;;  %7007 = vmatpush3.bf16.xpose.msra.mxu1 %v2710_v31 }
 0x3ec   : > { %7008 = vmatprep.mubr.msk.bf16.mxu1 %vm7900_vm1, %v10162_v60  ;;  %7018 = vmatprep.subr.bf16.mxu1 %v10162_v60 }
 0x3ed   : > { %4652 = vrot.lane.b32.xlu1 %v8488_v42, %s10186_s22 }
 0x3ef   : > { %4532 = vrot.lane.b32.xlu0 %v8501_v43, %s7901_s17  ;;  %v8505_v46 = vpop.f32.mrf.mxu0 }
 0x3f0   : > { %v1342_v1 = vsel %vm498_vm0, %v8505_v46, -inf }
 0x3f1   : > { %4774 = vrot.lane.b32.xlu1 %v8488_v42, %s10188_s27  ;;  %v6878_v21 = vpop.f32.mrf.mxu0 }
 0x3f2   : > { %7009 = vmatmul.mubr.msk.bf16.vlgmr.msra.gmra.mxu1 %vm498_vm0, %v2703_v40 }
 0x3f3   : > { %4654 = vrot.lane.b32.xlu0 %v8501_v43, %s10186_s22  ;;  %v8513_v47 = vpop.f32.mrf.mxu0  ;;  %7019 = vmatpush3.bf16.xpose.msra.mxu1 %v2832_v20  ;;  %v4413_v20 = vsel %vm498_vm0, %v8501_v43, 0 }
 0x3f4   : > { %7020 = vmatprep.mubr.msk.bf16.mxu1 %vm7900_vm1, %v10162_v60  ;;  %7030 = vmatprep.subr.bf16.mxu1 %v10162_v60  ;;  %v1345_v53 = vsel %vm498_vm0, %v8513_v47, -inf }
 0x3f5   : > { %4896 = vrot.lane.b32.xlu1 %v8488_v42, %s10190_s23  ;;  %v6879_v44 = vpop.f32.mrf.mxu0 }
 0x3f7   : > { %4776 = vrot.lane.b32.xlu0 %v8501_v43, %s10188_s27 }
 0x3f9   : > { %5018 = vrot.lane.b32.xlu1 %v8488_v42, %s10192_s15 }
 0x3fa   : > { %7021 = vmatmul.mubr.msk.bf16.vlgmr.msra.gmra.mxu1 %vm498_vm0, %v2825_v37 }
 0x3fb   : > { %4898 = vrot.lane.b32.xlu0 %v8501_v43, %s10190_s23  ;;  %7031 = vmatpush3.bf16.xpose.msra.mxu1 %v2954_v41 }
 0x3fc   : > { %7032 = vmatprep.mubr.msk.bf16.mxu1 %vm7900_vm1, %v10162_v60  ;;  %7042 = vmatprep.subr.bf16.mxu1 %v10162_v60 }
 0x3fd   : > { %5140 = vrot.lane.b32.xlu1 %v8488_v42, %s10194_s24 }
 0x3ff   : > { %5020 = vrot.lane.b32.xlu0 %v8501_v43, %s10192_s15 }
 0x401   : > { %5262 = vrot.lane.b32.xlu1 %v8488_v42, %s10196_s30 }
 0x402   : > { %7033 = vmatmul.mubr.msk.bf16.vlgmr.msra.gmra.mxu1 %vm498_vm0, %v2947_v54 }
 0x403   : > { %5142 = vrot.lane.b32.xlu0 %v8501_v43, %s10194_s24  ;;  %7043 = vmatpush3.bf16.xpose.msra.mxu1 %v3076_v55 }
 0x404   : > { %7044 = vmatprep.mubr.msk.bf16.mxu1 %vm7900_vm1, %v10162_v60  ;;  %7054 = vmatprep.subr.bf16.mxu1 %v10162_v60 }
 0x405   : > { %3568 = vrot.lane.b32.xlu1 %v8541_v56, %s7901_s17 }
 0x407   : > { %5264 = vrot.lane.b32.xlu0 %v8501_v43, %s10196_s30 }
 0x409   : > { %3690 = vrot.lane.b32.xlu1 %v8541_v56, %s10186_s22 }
 0x40a   : > { %7045 = vmatmul.mubr.msk.bf16.vlgmr.msra.gmra.mxu1 %vm498_vm0, %v3069_v59 }
 0x40b   : > { %3812 = vrot.lane.b32.xlu0 %v8541_v56, %s10188_s27  ;;  %7055 = vmatpush3.bf16.xpose.msra.mxu1 %v3198_v52 }
 0x40c   : > { %7056 = vmatprep.mubr.msk.bf16.mxu1 %vm7900_vm1, %v10162_v60  ;;  %7066 = vmatprep.subr.bf16.mxu1 %v10162_v60 }
 0x40d   : > { %3934 = vrot.lane.b32.xlu1 %v8541_v56, %s10190_s23 }
 0x40f   : > { %4056 = vrot.lane.b32.xlu0 %v8541_v56, %s10192_s15 }
 0x411   : > { %4178 = vrot.lane.b32.xlu1 %v8541_v56, %s10194_s24 }
 0x412   : > { %7057 = vmatmul.mubr.msk.bf16.vlgmr.msra.gmra.mxu1 %vm498_vm0, %v3191_v51 }
 0x413   : > { %7067 = vmatpush3.bf16.xpose.msra.mxu1 %v3377_v61  ;;  %7068 = vmatprep.mubr.msk.bf16.mxu1 %vm7900_vm1, %v10162_v60 }
 0x414   : > { %7078 = vmatprep.subr.bf16.mxu1 %v10162_v60 }
 0x41a   : > { %7069 = vmatmul.mubr.msk.bf16.vlgmr.msra.gmra.mxu1 %vm498_vm0, %v8417_v12 }
 0x41b   : > { %7080 = vmatprep.mubr.msk.bf16.mxu1 %vm7900_vm1, %v10162_v60 }
 0x42e   : > { %1343 = vmax.xlane.f32.xlu0 %v1342_v1 }
 0x42f   : > { %v3495_v11 = vpop.permute.xlu1 %3494 }
 0x431   : > { %v3497_v4 = vpop.permute.xlu0 %3496 }
 0x432   : > { %v3502_v5 = vsel %vm498_vm0, %v3497_v4, 0 }
 0x433   : > { %7079 = vmatpush3.bf16.xpose.msra.mxu1 %v3502_v5  ;;  %v3617_v9 = vpop.permute.xlu1 %3616 }
 0x434   : > { %7090 = vmatprep.subr.bf16.mxu1 %v10162_v60 }
 0x435   : > { %1346 = vmax.xlane.f32.xlu1 %v1345_v53  ;;  %v8591_v57 = vpop.permute.xlu0 %2100 }
 0x436   : > { %10216 = vst [vmem:[#allocation19_spill] sm:$0xff] %v8591_v57 }
 0x437   : > { %v3739_v23 = vpop.permute.xlu1 %3738 }
 0x439   : > { %v3619_v7 = vpop.permute.xlu0 %3618 }
 0x43a   : > { %v3624_v8 = vsel %vm498_vm0, %v3619_v7, 0  ;;  %7081 = vmatmul.mubr.msk.bf16.vlgmr.msra.gmra.mxu1 %vm498_vm0, %v3495_v11 }
 0x43b   : > { %7091 = vmatpush3.bf16.xpose.msra.mxu1 %v3624_v8  ;;  %7092 = vmatprep.mubr.msk.bf16.mxu1 %vm7900_vm1, %v10162_v60  ;;  %v3861_v13 = vpop.permute.xlu1 %3860 }
 0x43c   : > { %7102 = vmatprep.subr.bf16.mxu1 %v10162_v60 }
 0x43d   : > { %v8598_v0 = vpop.permute.xlu0 %2532 }
 0x43e   : > { %10217 = vst [vmem:[#allocation20_spill] sm:$0xff] %v8598_v0 }
 0x43f   : > { %v3983_v18 = vpop.permute.xlu1 %3982 }
 0x441   : > { %v3741_v10 = vpop.permute.xlu0 %3740 }
 0x442   : > { %v3746_v22 = vsel %vm498_vm0, %v3741_v10, 0  ;;  %7093 = vmatmul.mubr.msk.bf16.vlgmr.msra.gmra.mxu1 %vm498_vm0, %v3617_v9 }
 0x443   : > { %7103 = vmatpush3.bf16.xpose.msra.mxu1 %v3746_v22  ;;  %7104 = vmatprep.mubr.msk.bf16.mxu1 %vm7900_vm1, %v10162_v60  ;;  %v4105_v27 = vpop.permute.xlu1 %4104 }
 0x444   : > { %7114 = vmatprep.subr.bf16.mxu1 %v10162_v60 }
 0x445   : > { %v8605_v12 = vpop.permute.xlu0 %2776 }
 0x446   : > { %10218 = vst [vmem:[#allocation21_spill] sm:$0xff] %v8605_v12 }
 0x447   : > { %v4227_v34 = vpop.permute.xlu1 %4226 }
 0x449   : > { %v3863_v14 = vpop.permute.xlu0 %3862 }
 0x44a   : > { %v3868_v15 = vsel %vm498_vm0, %v3863_v14, 0  ;;  %7105 = vmatmul.mubr.msk.bf16.vlgmr.msra.gmra.mxu1 %vm498_vm0, %v3739_v23 }
 0x44b   : > { %7115 = vmatpush3.bf16.xpose.msra.mxu1 %v3868_v15  ;;  %7116 = vmatprep.mubr.msk.bf16.mxu1 %vm7900_vm1, %v10162_v60  ;;  %v8626_v32 = vpop.permute.xlu1 %2222 }
 0x44c   : > { %7126 = vmatprep.subr.bf16.mxu1 %v10162_v60  ;;  %10221 = vst [vmem:[#allocation24_spill] sm:$0xff] %v8626_v32 }
 0x44d   : > { %v8612_v16 = vpop.permute.xlu0 %3020 }
 0x44e   : > { %10219 = vst [vmem:[#allocation22_spill] sm:$0xff] %v8612_v16 }
 0x44f   : > { %v8639_v31 = vpop.permute.xlu1 %2654 }
 0x450   : > { %10222 = vst [vmem:[#allocation25_spill] sm:$0xff] %v8639_v31 }
 0x451   : > { %v3985_v19 = vpop.permute.xlu0 %3984 }
 0x452   : > { %v3990_v25 = vsel %vm498_vm0, %v3985_v19, 0  ;;  %7117 = vmatmul.mubr.msk.bf16.vlgmr.msra.gmra.mxu1 %vm498_vm0, %v3861_v13 }
 0x453   : > { %7127 = vmatpush3.bf16.xpose.msra.mxu1 %v3990_v25  ;;  %7128 = vmatprep.mubr.msk.bf16.mxu1 %vm7900_vm1, %v10162_v60  ;;  %v8653_v37 = vpop.permute.xlu1 %2898 }
 0x454   : > { %7138 = vmatprep.subr.bf16.mxu1 %v10162_v60  ;;  %10223 = vst [vmem:[#allocation26_spill] sm:$0xff] %v8653_v37 }
 0x455   : > { %v8619_v28 = vpop.permute.xlu0 %3264 }
 0x456   : > { %10220 = vst [vmem:[#allocation23_spill] sm:$0xff] %v8619_v28 }
 0x457   : > { %v8664_v59 = vpop.permute.xlu1 %3142 }
 0x458   : > { %10224 = vst [vmem:[#allocation27_spill] sm:$0xff] %v8664_v59 }
 0x459   : > { %v4107_v29 = vpop.permute.xlu0 %4106 }
 0x45a   : > { %v4112_v35 = vsel %vm498_vm0, %v4107_v29, 0  ;;  %7129 = vmatmul.mubr.msk.bf16.vlgmr.msra.gmra.mxu1 %vm498_vm0, %v3983_v18 }
 0x45b   : > { %7139 = vmatpush3.bf16.xpose.msra.mxu1 %v4112_v35  ;;  %7140 = vmatprep.mubr.msk.bf16.mxu1 %vm7900_vm1, %v10162_v60  ;;  %v4531_v5 = vpop.permute.xlu1 %4530 }
 0x45c   : > { %7150 = vmatprep.subr.bf16.mxu1 %v10162_v60 }
 0x45d   : > { %v4229_v30 = vpop.permute.xlu0 %4228 }
 0x45e   : > { %v4234_v33 = vsel %vm498_vm0, %v4229_v30, 0 }
 0x45f   : > { %v4653_v13 = vpop.permute.xlu1 %4652 }
 0x461   : > { %v4533_v36 = vpop.permute.xlu0 %4532 }
 0x462   : > { %7141 = vmatmul.mubr.msk.bf16.vlgmr.msra.gmra.mxu1 %vm498_vm0, %v4105_v27  ;;  %v8630_v24 = vpop.f32.mrf.mxu1  ;;  %v4538_v55 = vsel %vm498_vm0, %v4533_v36, 0 }
 0x463   : > { %7151 = vmatpush3.bf16.xpose.msra.mxu1 %v4234_v33  ;;  %v1467_v38 = vsel %vm498_vm0, %v8630_v24, -inf  ;;  %7152 = vmatprep.mubr.msk.bf16.mxu1 %vm7900_vm1, %v10162_v60 }
 0x464   : > { %1468 = vmax.xlane.f32.xlu0 %v1467_v38  ;;  %v6890_v39 = vpop.f32.mrf.mxu1  ;;  %7162 = vmatprep.subr.bf16.mxu1 %v10162_v60 }
 0x465   : > { %v4655_v1 = vpop.permute.xlu0 %4654 }
 0x466   : > { %v8637_v26 = vpop.f32.mrf.mxu1  ;;  %v4660_v53 = vsel %vm498_vm0, %v4655_v1, 0 }
 0x467   : > { %v1470_v45 = vsel %vm498_vm0, %v8637_v26, -inf }
 0x468   : > { %1471 = vmax.xlane.f32.xlu0 %v1470_v45  ;;  %v6891_v40 = vpop.f32.mrf.mxu1 }
 0x469   : > { %v4777_v10 = vpop.permute.xlu0 %4776 }
 0x46a   : > { %7153 = vmatmul.mubr.msk.bf16.vlgmr.msra.gmra.mxu1 %vm498_vm0, %v4227_v34  ;;  %v8644_v21 = vpop.f32.mrf.mxu1  ;;  %v4782_v14 = vsel %vm498_vm0, %v4777_v10, 0  ;;  %v4775_v34 = vpop.permute.xlu1 %4774 }
 0x46b   : > { %7163 = vmatpush3.bf16.xpose.msra.mxu1 %v4413_v20  ;;  %v1589_v44 = vsel %vm498_vm0, %v8644_v21, -inf  ;;  %7164 = vmatprep.mubr.msk.bf16.mxu1 %vm7900_vm1, %v10162_v60 }
 0x46c   : > { %1590 = vmax.xlane.f32.xlu0 %v1589_v44  ;;  %v6902_v48 = vpop.f32.mrf.mxu1  ;;  %7174 = vmatprep.subr.bf16.mxu1 %v10162_v60 }
 0x46d   : > { %v4899_v27 = vpop.permute.xlu0 %4898 }
 0x46e   : > { %v8655_v41 = vpop.f32.mrf.mxu1  ;;  %v4904_v30 = vsel %vm498_vm0, %v4899_v27, 0  ;;  %v4897_v44 = vpop.permute.xlu1 %4896 }
 0x46f   : > { %v1592_v54 = vsel %vm498_vm0, %v8655_v41, -inf }
 0x470   : > { %1593 = vmax.xlane.f32.xlu1 %v1592_v54  ;;  %v6903_v43 = vpop.f32.mrf.mxu1 }
 0x471   : > { %v5021_v40 = vpop.permute.xlu0 %5020 }
 0x472   : > { %7165 = vmatmul.mubr.msk.bf16.vlgmr.msra.gmra.mxu1 %vm498_vm0, %v8488_v42  ;;  %v8662_v58 = vpop.f32.mrf.mxu1  ;;  %v5026_v36 = vsel %vm498_vm0, %v5021_v40, 0 }
 0x473   : > { %7175 = vmatpush3.bf16.xpose.msra.mxu1 %v4538_v55  ;;  %v1711_v52 = vsel %vm498_vm0, %v8662_v58, -inf  ;;  %7176 = vmatprep.mubr.msk.bf16.mxu1 %vm7900_vm1, %v10162_v60  ;;  %v5019_v55 = vpop.permute.xlu1 %5018 }
 0x474   : > { %1712 = vmax.xlane.f32.xlu0 %v1711_v52  ;;  %v6914_v51 = vpop.f32.mrf.mxu1  ;;  %7186 = vmatprep.subr.bf16.mxu1 %v10162_v60 }
 0x475   : > { %v5143_v51 = vpop.permute.xlu0 %5142 }
 0x476   : > { %v8671_v61 = vpop.f32.mrf.mxu1 }
 0x477   : > { %v1714_v42 = vsel %vm498_vm0, %v8671_v61, -inf }
 0x478   : > { %1715 = vmax.xlane.f32.xlu1 %v1714_v42  ;;  %v6915_v4 = vpop.f32.mrf.mxu1  ;;  %v5148_v42 = vsel %vm498_vm0, %v5143_v51, 0 }
 0x47a   : > { %7177 = vmatmul.mubr.msk.bf16.vlgmr.msra.gmra.mxu1 %vm498_vm0, %v4531_v5  ;;  %v8677_v11 = vpop.f32.mrf.mxu1  ;;  %v5141_v5 = vpop.permute.xlu1 %5140 }
 0x47b   : > { %7187 = vmatpush3.bf16.xpose.msra.mxu1 %v4660_v53  ;;  %v1833_v7 = vsel %vm498_vm0, %v8677_v11, -inf  ;;  %7188 = vmatprep.mubr.msk.bf16.mxu1 %vm7900_vm1, %v10162_v60 }
 0x47c   : > { %1834 = vmax.xlane.f32.xlu0 %v1833_v7  ;;  %v6926_v8 = vpop.f32.mrf.mxu1  ;;  %7198 = vmatprep.subr.bf16.mxu1 %v10162_v60 }
 0x47d   : > { %v5265_v8 = vpop.permute.xlu0 %5264 }
 0x47e   : > { %v8684_v9 = vpop.f32.mrf.mxu1 }
 0x47f   : > { %v1836_v22 = vsel %vm498_vm0, %v8684_v9, -inf }
 0x480   : > { %1837 = vmax.xlane.f32.xlu1 %v1836_v22  ;;  %v6927_v23 = vpop.f32.mrf.mxu1  ;;  %v5263_v22 = vpop.permute.xlu1 %5262 }
 0x481   : > { %v5270_v23 = vsel %vm498_vm0, %v5265_v8, 0 }
 0x482   : > { %7189 = vmatmul.mubr.msk.bf16.vlgmr.msra.gmra.mxu1 %vm498_vm0, %v4653_v13  ;;  %v8690_v15 = vpop.f32.mrf.mxu1 }
 0x483   : > { %7199 = vmatpush3.bf16.xpose.msra.mxu1 %v4782_v14  ;;  %v1955_v18 = vsel %vm498_vm0, %v8690_v15, -inf  ;;  %7200 = vmatprep.mubr.msk.bf16.mxu1 %vm7900_vm1, %v10162_v60 }
 0x484   : > { %1956 = vmax.xlane.f32.xlu0 %v1955_v18  ;;  %v6938_v19 = vpop.f32.mrf.mxu1  ;;  %7210 = vmatprep.subr.bf16.mxu1 %v10162_v60 }
 0x485   : > { %v8740_v19 = vpop.permute.xlu1 %3568 }
 0x486   : > { %v8697_v25 = vpop.f32.mrf.mxu1  ;;  %10225 = vst [vmem:[#allocation28_spill] sm:$0xff] %v8740_v19 }
 0x487   : > { %v1958_v29 = vsel %vm498_vm0, %v8697_v25, -inf }
 0x488   : > { %1959 = vmax.xlane.f32.xlu1 %v1958_v29  ;;  %v6939_v35 = vpop.f32.mrf.mxu1 }
 0x48a   : > { %7201 = vmatmul.mubr.msk.bf16.vlgmr.msra.gmra.mxu1 %vm498_vm0, %v4775_v34  ;;  %v8703_v33 = vpop.f32.mrf.mxu1  ;;  %v8746_v34 = vpop.permute.xlu0 %3812 }
 0x48b   : > { %7211 = vmatpush3.bf16.xpose.msra.mxu1 %v4904_v30  ;;  %v2077_v38 = vsel %vm498_vm0, %v8703_v33, -inf  ;;  %7212 = vmatprep.mubr.msk.bf16.mxu1 %vm7900_vm1, %v10162_v60  ;;  %10226 = vst [vmem:[#allocation29_spill] sm:$0xff] %v8746_v34  ;;  %v8748_v30 = vpop.permute.xlu1 %3690 }
 0x48c   : > { %2078 = vmax.xlane.f32.xlu0 %v2077_v38  ;;  %v6950_v39 = vpop.f32.mrf.mxu1  ;;  %7222 = vmatprep.subr.bf16.mxu1 %v10162_v60  ;;  %10227 = vst [vmem:[#allocation30_spill] sm:$0xff] %v8748_v30 }
 0x48e   : > { %v8710_v45 = vpop.f32.mrf.mxu1 }
 0x48f   : > { %v2080_v20 = vsel %vm498_vm0, %v8710_v45, -inf }
 0x490   : > { %2081 = vmax.xlane.f32.xlu1 %v2080_v20  ;;  %v6951_v48 = vpop.f32.mrf.mxu1  ;;  %v8754_v20 = vpop.permute.xlu0 %4056 }
 0x491   : > { %10228 = vst [vmem:[#allocation31_spill] sm:$0xff] %v8754_v20 }
 0x492   : > { %7213 = vmatmul.mubr.msk.bf16.vlgmr.msra.gmra.mxu1 %vm498_vm0, %v4897_v44  ;;  %v8716_v54 = vpop.f32.mrf.mxu1  ;;  %v8756_v44 = vpop.permute.xlu1 %3934 }
 0x493   : > { %7223 = vmatpush3.bf16.xpose.msra.mxu1 %v5026_v36  ;;  %7224 = vmatprep.mubr.msk.bf16.mxu1 %vm7900_vm1, %v10162_v60  ;;  %10229 = vst [vmem:[#allocation32_spill] sm:$0xff] %v8756_v44 }
 0x494   : > { %v6962_v43 = vpop.f32.mrf.mxu1  ;;  %7234 = vmatprep.subr.bf16.mxu1 %v10162_v60 }
 0x496   : > { %v8721_v52 = vpop.f32.mrf.mxu1 }
 0x498   : > { %v6963_v1 = vpop.f32.mrf.mxu1 }
 0x499   : > { %v8761_v1 = vpop.permute.xlu1 %4178 }
 0x49a   : > { %7225 = vmatmul.mubr.msk.bf16.vlgmr.msra.gmra.mxu1 %vm498_vm0, %v5019_v55  ;;  %v8725_v4 = vpop.f32.mrf.mxu1  ;;  %10230 = vst [vmem:[#allocation33_spill] sm:$0xff] %v8761_v1 }
 0x49b   : > { %7235 = vmatpush3.bf16.xpose.msra.mxu1 %v5148_v42  ;;  %7236 = vmatprep.mubr.msk.bf16.mxu1 %vm7900_vm1, %v10162_v60 }
 0x49c   : > { %v6974_v53 = vpop.f32.mrf.mxu1  ;;  %7246 = vmatprep.subr.bf16.mxu1 %v10162_v60 }
 0x49e   : > { %v8730_v7 = vpop.f32.mrf.mxu1 }
 0x4a0   : > { %v6975_v10 = vpop.f32.mrf.mxu1 }
 0x4a2   : > { %7237 = vmatmul.mubr.msk.bf16.vlgmr.msra.gmra.mxu1 %vm498_vm0, %v5141_v5  ;;  %v8734_v13 = vpop.f32.mrf.mxu1 }
 0x4a3   : > { %7247 = vmatpush3.bf16.xpose.msra.mxu1 %v5270_v23  ;;  %7248 = vmatprep.mubr.msk.bf16.mxu1 %vm7900_vm1, %v10162_v60 }
 0x4a4   : > { %v6986_v14 = vpop.f32.mrf.mxu1 }
 0x4a6   : > { %v8738_v18 = vpop.f32.mrf.mxu1 }
 0x4a8   : > { %v6987_v27 = vpop.f32.mrf.mxu1 }
 0x4aa   : > { %7249 = vmatmul.mubr.msk.bf16.vlgmr.msra.gmra.mxu1 %vm498_vm0, %v5263_v22  ;;  %v8743_v29 = vpop.f32.mrf.mxu1 }
 0x4ab   : > { %5589 = vmatprep.mubr.bf16.mxu1 %v10160_v17 }
 0x4ac   : > { %v6998_v35 = vpop.f32.mrf.mxu1 }
 0x4ae   : > { %v8750_v38 = vpop.f32.mrf.mxu1 }
 0x4b0   : > { %v6999_v39 = vpop.f32.mrf.mxu1 }
 0x4b2   : > { %v8752_v40 = vpop.f32.mrf.mxu1 }
 0x4b4   : > { %v7010_v48 = vpop.f32.mrf.mxu1 }
 0x4b6   : > { %v8758_v36 = vpop.f32.mrf.mxu1 }
 0x4b7   : > { %v1344_v43 = vpop.xlane.xlu0 %1343 }
 0x4b8   : > { %v1348_v55 = vsub.f32 %v8505_v46, %v1344_v43  ;;  %v7011_v51 = vpop.f32.mrf.mxu1 }
 0x4ba   : > { %v1350_v42 = vmul.f32 1.442695, %v1348_v55  ;;  %v8763_v5 = vpop.f32.mrf.mxu1 }
 0x4bb   : > { %v2875_v60 = vsel %vm498_vm0, %v8763_v5, -inf }
 0x4bc   : > { %7471 = vpow2.f32 %v1350_v42  ;;  %v7022_v53 = vpop.f32.mrf.mxu1 }
 0x4be   : > { %v1347_v8 = vpop.xlane.xlu1 %1346  ;;  %v8765_v10 = vpop.f32.mrf.mxu1 }
 0x4bf   : > { %v1349_v22 = vsub.f32 %v8513_v47, %v1347_v8  ;;  %v2199_v47 = vsel %vm498_vm0, %v8716_v54, -inf }
 0x4c0   : > { %v7023_v23 = vpop.f32.mrf.mxu1 }
 0x4c1   : > { %v1352_v14 = vmul.f32 1.442695, %v1349_v22 }
 0x4c2   : > { %v8768_v27 = vpop.f32.mrf.mxu1 }
 0x4c3   : > { %7473 = vpow2.f32 %v1352_v14  ;;  %v2384_v14 = vsel %vm498_vm0, %v8725_v4, -inf }
 0x4c4   : > { %v7034_v35 = vpop.f32.mrf.mxu1 }
 0x4c6   : > { %v8770_v46 = vpop.f32.mrf.mxu1 }
 0x4c8   : > { %v7035_v39 = vpop.f32.mrf.mxu1 }
 0x4c9   : > { %v8772_v48 = vpop.eup %7471  ;;  %v2202_v39 = vsel %vm498_vm0, %v8721_v52, -inf }
 0x4ca   : > { %v8774_v43 = vpop.f32.mrf.mxu1  ;;  %v1354_v55 = vsel %vm498_vm0, %v8772_v48, 0.0 }
 0x4cb   : > { %1355 = vadd.xlane.f32.xlu0 %v1354_v55 }
 0x4cc   : > { %v7046_v51 = vpop.f32.mrf.mxu1 }
 0x4cd   : > { %v2509_v51 = vsel %vm498_vm0, %v8734_v13, -inf }
 0x4ce   : > { %v8778_v42 = vpop.f32.mrf.mxu1 }
 0x4cf   : > { %2200 = vmax.xlane.f32.xlu0 %v2199_v47 }
 0x4d0   : > { %v8782_v53 = vpop.eup %7473  ;;  %v7047_v8 = vpop.f32.mrf.mxu1 }
 0x4d1   : > { %v1357_v22 = vsel %vm498_vm0, %v8782_v53, 0.0  ;;  %v2387_v8 = vsel %vm498_vm0, %v8730_v7, -inf }
 0x4d2   : > { %1358 = vadd.xlane.f32.xlu1 %v1357_v22  ;;  %v8786_v23 = vpop.f32.mrf.mxu1 }
 0x4d3   : > { %2385 = vmax.xlane.f32.xlu0 %v2384_v14  ;;  %v2631_v14 = vsel %vm498_vm0, %v8743_v29, -inf }
 0x4d4   : > { %v7058_v35 = vpop.f32.mrf.mxu1 }
 0x4d6   : > { %2203 = vmax.xlane.f32.xlu1 %v2202_v39  ;;  %v8792_v55 = vpop.f32.mrf.mxu1  ;;  %v2512_v39 = vsel %vm498_vm0, %v8738_v18, -inf }
 0x4d7   : > { %2510 = vmax.xlane.f32.xlu0 %v2509_v51  ;;  %v2753_v51 = vsel %vm498_vm0, %v8752_v40, -inf }
 0x4d8   : > { %v7059_v47 = vpop.f32.mrf.mxu1 }
 0x4da   : > { %2388 = vmax.xlane.f32.xlu1 %v2387_v8  ;;  %v8798_v22 = vpop.f32.mrf.mxu1  ;;  %v2634_v8 = vsel %vm498_vm0, %v8750_v38, -inf }
 0x4db   : > { %2632 = vmax.xlane.f32.xlu0 %v2631_v14  ;;  %v2756_v14 = vsel %vm498_vm0, %v8758_v36, -inf }
 0x4dc   : > { %v7070_v35 = vpop.f32.mrf.mxu1 }
 0x4dd   : > { %v2997_v35 = vsel %vm498_vm0, %v8768_v27, -inf }
 0x4de   : > { %2513 = vmax.xlane.f32.xlu1 %v2512_v39  ;;  %v8804_v17 = vpop.f32.mrf.mxu1  ;;  %v2878_v39 = vsel %vm498_vm0, %v8765_v10, -inf }
 0x4df   : > { %2754 = vmax.xlane.f32.xlu0 %v2753_v51  ;;  %v3119_v51 = vsel %vm498_vm0, %v8774_v43, -inf }
 0x4e0   : > { %v7071_v47 = vpop.f32.mrf.mxu1 }
 0x4e1   : > { %v3000_v47 = vsel %vm498_vm0, %v8770_v46, -inf }
 0x4e2   : > { %2635 = vmax.xlane.f32.xlu1 %v2634_v8  ;;  %v3122_v8 = vsel %vm498_vm0, %v8778_v42, -inf }
 0x4e3   : > { %2876 = vmax.xlane.f32.xlu0 %v2875_v60  ;;  %v3241_v60 = vsel %vm498_vm0, %v8786_v23, -inf }
 0x4e6   : > { %2757 = vmax.xlane.f32.xlu1 %v2756_v14  ;;  %v3244_v14 = vsel %vm498_vm0, %v8792_v55, -inf }
 0x4e7   : > { %2998 = vmax.xlane.f32.xlu0 %v2997_v35  ;;  %v3420_v35 = vsel %vm498_vm0, %v8798_v22, -inf }
 0x4ea   : > { %2879 = vmax.xlane.f32.xlu1 %v2878_v39 }
 0x4eb   : > { %3120 = vmax.xlane.f32.xlu0 %v3119_v51 }
 0x4ee   : > { %3001 = vmax.xlane.f32.xlu1 %v3000_v47  ;;  %v1469_v47 = vpop.xlane.xlu0 %1468 }
 0x4ef   : > { %3242 = vmax.xlane.f32.xlu0 %v3241_v60  ;;  %v3423_v60 = vsel %vm498_vm0, %v8804_v17, -inf  ;;  %v1473_v20 = vsub.f32 %v8630_v24, %v1469_v47 }
 0x4f2   : > { %3123 = vmax.xlane.f32.xlu1 %v3122_v8  ;;  %v1472_v1 = vpop.xlane.xlu0 %1471 }
 0x4f3   : > { %v1474_v34 = vsub.f32 %v8637_v26, %v1472_v1 }
 0x4f5   : > { %v1477_v24 = vmul.f32 1.442695, %v1474_v34 }
 0x4f6   : > { %3245 = vmax.xlane.f32.xlu1 %v3244_v14 }
 0x4f9   : > { %v1594_v47 = vpop.xlane.xlu1 %1593 }
 0x4fa   : > { %3421 = vmax.xlane.f32.xlu1 %v3420_v35  ;;  %v8830_v39 = vpop.f32.mrf.mxu1 }
 0x4fb   : > { %v3545_v51 = vsel %vm498_vm0, %v8830_v39, -inf }
 0x4fc   : > { %v7082_v49 = vpop.f32.mrf.mxu1  ;;  %3546 = vmax.xlane.f32.xlu0 %v3545_v51 }
 0x4fe   : > { %3424 = vmax.xlane.f32.xlu1 %v3423_v60  ;;  %v8836_v8 = vpop.f32.mrf.mxu1  ;;  %v1475_v60 = vmul.f32 1.442695, %v1473_v20 }
 0x4ff   : > { %v3548_v14 = vsel %vm498_vm0, %v8836_v8, -inf }
 0x500   : > { %v7083_v50 = vpop.f32.mrf.mxu1  ;;  %7475 = vpow2.f32 %v1475_v60 }
 0x501   : > { %v1591_v50 = vpop.xlane.xlu0 %1590  ;;  %7477 = vpow2.f32 %v1477_v24  ;;  %v1716_v60 = vpop.xlane.xlu1 %1715 }
 0x502   : > { %3549 = vmax.xlane.f32.xlu1 %v3548_v14  ;;  %v8840_v35 = vpop.f32.mrf.mxu1 }
 0x503   : > { %v3667_v49 = vsel %vm498_vm0, %v8840_v35, -inf }
 0x504   : > { %v7094_v44 = vpop.f32.mrf.mxu1 }
 0x505   : > { %v1595_v44 = vsub.f32 %v8644_v21, %v1591_v50  ;;  %v1713_v1 = vpop.xlane.xlu0 %1712 }
 0x506   : > { %3668 = vmax.xlane.f32.xlu1 %v3667_v49  ;;  %v8845_v51 = vpop.f32.mrf.mxu1  ;;  %v1717_v21 = vsub.f32 %v8662_v58, %v1713_v1 }
 0x507   : > { %v3670_v19 = vsel %vm498_vm0, %v8845_v51, -inf  ;;  %v1597_v26 = vmul.f32 1.442695, %v1595_v44 }
 0x508   : > { %v7095_v30 = vpop.f32.mrf.mxu1  ;;  %v1719_v44 = vmul.f32 1.442695, %v1717_v21 }
 0x509   : > { %v1596_v30 = vsub.f32 %v8655_v41, %v1594_v47  ;;  %7479 = vpow2.f32 %v1597_v26  ;;  %v1838_v21 = vpop.xlane.xlu1 %1837 }
 0x50a   : > { %3671 = vmax.xlane.f32.xlu1 %v3670_v19  ;;  %v8850_v14 = vpop.f32.mrf.mxu1 }
 0x50b   : > { %v3789_v49 = vsel %vm498_vm0, %v8850_v14, -inf  ;;  %v1599_v50 = vmul.f32 1.442695, %v1596_v30 }
 0x50c   : > { %v7106_v28 = vpop.f32.mrf.mxu1 }
 0x50d   : > { %7481 = vpow2.f32 %v1599_v50  ;;  %v8870_v58 = vpop.eup %7475 }
 0x50e   : > { %3790 = vmax.xlane.f32.xlu1 %v3789_v49  ;;  %v8855_v20 = vpop.f32.mrf.mxu1  ;;  %v1718_v49 = vsub.f32 %v8671_v61, %v1716_v60  ;;  %7483 = vpow2.f32 %v1719_v44  ;;  %v1835_v61 = vpop.xlane.xlu0 %1834  ;;  %v1479_v60 = vsel %vm498_vm0, %v8870_v58, 0.0 }
 0x50f   : > { %v3792_v19 = vsel %vm498_vm0, %v8855_v20, -inf }
 0x510   : > { %v7107_v34 = vpop.f32.mrf.mxu1  ;;  %3793 = vmax.xlane.f32.xlu0 %v3792_v19  ;;  %v1721_v59 = vmul.f32 1.442695, %v1718_v49  ;;  %v1839_v49 = vsub.f32 %v8677_v11, %v1835_v61 }
 0x511   : > { %v8878_v34 = vpop.eup %7477  ;;  %v1960_v61 = vpop.xlane.xlu1 %1959 }
 0x512   : > { %v8861_v28 = vpop.f32.mrf.mxu1  ;;  %7485 = vpow2.f32 %v1721_v59  ;;  %v1482_v44 = vsel %vm498_vm0, %v8878_v34, 0.0 }
 0x513   : > { %10231 = vst [vmem:[#allocation34_spill] sm:$0xff] %v8861_v28  ;;  %v3911_v24 = vsel %vm498_vm0, %v8861_v28, -inf }
 0x514   : > { %3912 = vmax.xlane.f32.xlu1 %v3911_v24  ;;  %v7118_v41 = vpop.f32.mrf.mxu1 }
 0x515   : > { %v1840_v41 = vsub.f32 %v8684_v9, %v1838_v21 }
 0x516   : > { %v8866_v47 = vpop.f32.mrf.mxu1 }
 0x517   : > { %10232 = vst [vmem:[#allocation35_spill] sm:$0xff] %v8866_v47  ;;  %v3914_v19 = vsel %vm498_vm0, %v8866_v47, -inf  ;;  %v1843_v11 = vmul.f32 1.442695, %v1840_v41 }
 0x518   : > { %v7119_v1 = vpop.f32.mrf.mxu1  ;;  %3915 = vmax.xlane.f32.xlu0 %v3914_v19  ;;  %v8888_v19 = vpop.eup %7479 }
 0x519   : > { %v1957_v1 = vpop.xlane.xlu0 %1956  ;;  %v1601_v21 = vsel %vm498_vm0, %v8888_v19, 0.0 }
 0x51a   : > { %v8872_v26 = vpop.f32.mrf.mxu1 }
 0x51b   : > { %v4033_v30 = vsel %vm498_vm0, %v8872_v26, -inf }
 0x51c   : > { %4034 = vmax.xlane.f32.xlu1 %v4033_v30  ;;  %v7130_v50 = vpop.f32.mrf.mxu1  ;;  %1480 = vadd.xlane.f32.xlu0 %v1479_v60  ;;  %v1841_v30 = vmul.f32 1.442695, %v1839_v49 }
 0x51d   : > { %v8896_v50 = vpop.eup %7481  ;;  %v2079_v37 = vpop.xlane.xlu0 %2078 }
 0x51e   : > { %v8881_v24 = vpop.f32.mrf.mxu1  ;;  %7487 = vpow2.f32 %v1841_v30  ;;  %v2083_v41 = vsub.f32 %v8703_v33, %v2079_v37 }
 0x51f   : > { %v4036_v59 = vsel %vm498_vm0, %v8881_v24, -inf  ;;  %7489 = vpow2.f32 %v1843_v11 }
 0x520   : > { %v7131_v16 = vpop.f32.mrf.mxu1  ;;  %4037 = vmax.xlane.f32.xlu0 %v4036_v59  ;;  %1483 = vadd.xlane.f32.xlu1 %v1482_v44  ;;  %v8901_v59 = vpop.eup %7483  ;;  %v1604_v44 = vsel %vm498_vm0, %v8896_v50, 0.0  ;;  %v2085_v11 = vmul.f32 1.442695, %v2083_v41 }
 0x521   : > { %v1961_v16 = vsub.f32 %v8690_v15, %v1957_v1  ;;  %v8908_v0 = vpop.eup %7485  ;;  %v1962_v1 = vsub.f32 %v8697_v25, %v1960_v61 }
 0x522   : > { %v8890_v60 = vpop.f32.mrf.mxu1  ;;  %v1726_v33 = vsel %vm498_vm0, %v8908_v0, 0.0 }
 0x523   : > { %v4155_v9 = vsel %vm498_vm0, %v8890_v60, -inf  ;;  %v1963_v15 = vmul.f32 1.442695, %v1961_v16 }
 0x524   : > { %v7142_v12 = vpop.f32.mrf.mxu1  ;;  %4156 = vmax.xlane.f32.xlu1 %v4155_v9  ;;  %1602 = vadd.xlane.f32.xlu0 %v1601_v21  ;;  %v1723_v21 = vsel %vm498_vm0, %v8901_v59, 0.0 }
 0x525   : > { %v2082_v12 = vpop.xlane.xlu1 %2081  ;;  %7491 = vpow2.f32 %v1963_v15 }
 0x526   : > { %v8899_v49 = vpop.f32.mrf.mxu1  ;;  %v2084_v37 = vsub.f32 %v8710_v45, %v2082_v12  ;;  %7493 = vpow2.f32 %v2085_v11 }
 0x527   : > { %10233 = vst [vmem:[#allocation36_spill] sm:$0xff] %v8899_v49  ;;  %v4158_v31 = vsel %vm498_vm0, %v8899_v49, -inf }
 0x528   : > { %v7143_v9 = vpop.f32.mrf.mxu1  ;;  %1605 = vadd.xlane.f32.xlu1 %v1604_v44  ;;  %4159 = vmax.xlane.f32.xlu0 %v4158_v31  ;;  %v1965_v44 = vmul.f32 1.442695, %v1962_v1  ;;  %v2087_v25 = vmul.f32 1.442695, %v2084_v37 }
 0x52a   : > { %v8911_v30 = vpop.f32.mrf.mxu1  ;;  %7495 = vpow2.f32 %v1965_v44 }
 0x52b   : > { %v4277_v61 = vsel %vm498_vm0, %v8911_v30, -inf  ;;  %v8924_v41 = vpop.eup %7487  ;;  %7497 = vpow2.f32 %v2087_v25 }
 0x52c   : > { %v7154_v32 = vpop.f32.mrf.mxu1  ;;  %1727 = vadd.xlane.f32.xlu1 %v1726_v33  ;;  %1724 = vadd.xlane.f32.xlu0 %v1723_v21  ;;  %10236 = vst [vmem:[#allocation39_spill] sm:$0xff] %v8924_v41  ;;  %v8930_v9 = vpop.eup %7489  ;;  %v1845_v37 = vsel %vm498_vm0, %v8924_v41, 0.0 }
 0x52d   : > { %10237 = vst [vmem:[#allocation40_spill] sm:$0xff] %v8930_v9  ;;  %v1848_v11 = vsel %vm498_vm0, %v8930_v9, 0.0 }
 0x52e   : > { %v8918_v31 = vpop.f32.mrf.mxu1 }
 0x52f   : > { %10234 = vst [vmem:[#allocation37_spill] sm:$0xff] %v8918_v31  ;;  %v4280_v12 = vsel %vm498_vm0, %v8918_v31, -inf }
 0x530   : > { %v7155_v16 = vpop.f32.mrf.mxu1  ;;  %4278 = vmax.xlane.f32.xlu0 %v4277_v61 }
 0x532   : > { %v8922_v45 = vpop.f32.mrf.mxu1  ;;  %v8940_v44 = vpop.eup %7491 }
 0x533   : > { %10235 = vst [vmem:[#allocation38_spill] sm:$0xff] %v8922_v45  ;;  %v4456_v32 = vsel %vm498_vm0, %v8922_v45, -inf  ;;  %10240 = vst [vmem:[#allocation43_spill] sm:$0xff] %v8940_v44  ;;  %v8946_v16 = vpop.eup %7493 }
 0x534   : > { %v7166_v15 = vpop.f32.mrf.mxu1  ;;  %4457 = vmax.xlane.f32.xlu1 %v4456_v32  ;;  %4281 = vmax.xlane.f32.xlu0 %v4280_v12  ;;  %10241 = vst [vmem:[#allocation44_spill] sm:$0xff] %v8946_v16 }
 0x536   : > { %v8932_v1 = vpop.f32.mrf.mxu1 }
 0x537   : > { %10238 = vst [vmem:[#allocation41_spill] sm:$0xff] %v8932_v1  ;;  %v4459_v25 = vsel %vm498_vm0, %v8932_v1, -inf  ;;  %v8950_v15 = vpop.eup %7495 }
 0x538   : > { %v7167_v33 = vpop.f32.mrf.mxu1  ;;  %1849 = vadd.xlane.f32.xlu1 %v1848_v11  ;;  %1846 = vadd.xlane.f32.xlu0 %v1845_v37  ;;  %10243 = vst [vmem:[#allocation46_spill] sm:$0xff] %v8950_v15  ;;  %v1967_v11 = vsel %vm498_vm0, %v8940_v44, 0.0  ;;  %v2089_v37 = vsel %vm498_vm0, %v8946_v16, 0.0 }
 0x539   : > { %v8956_v33 = vpop.eup %7497 }
 0x53a   : > { %v8938_v21 = vpop.f32.mrf.mxu1  ;;  %10244 = vst [vmem:[#allocation47_spill] sm:$0xff] %v8956_v33 }
 0x53b   : > { %10239 = vst [vmem:[#allocation42_spill] sm:$0xff] %v8938_v21  ;;  %v4581_v61 = vsel %vm498_vm0, %v8938_v21, -inf }
 0x53c   : > { %v7178_v32 = vpop.f32.mrf.mxu1  ;;  %4460 = vmax.xlane.f32.xlu1 %v4459_v25  ;;  %4582 = vmax.xlane.f32.xlu0 %v4581_v61  ;;  %v1970_v25 = vsel %vm498_vm0, %v8950_v15, 0.0  ;;  %v2092_v61 = vsel %vm498_vm0, %v8956_v33, 0.0 }
 0x53e   : > { %v8948_v12 = vpop.f32.mrf.mxu1 }
 0x53f   : > { %10242 = vst [vmem:[#allocation45_spill] sm:$0xff] %v8948_v12  ;;  %v4584_v16 = vsel %vm498_vm0, %v8948_v12, -inf }
 0x540   : > { %v7179_v45 = vpop.f32.mrf.mxu1  ;;  %1968 = vadd.xlane.f32.xlu1 %v1967_v11  ;;  %2090 = vadd.xlane.f32.xlu0 %v2089_v37 }
 0x542   : > { %v8958_v21 = vpop.f32.mrf.mxu1 }
 0x543   : > { %10245 = vst [vmem:[#allocation48_spill] sm:$0xff] %v8958_v21  ;;  %v4703_v11 = vsel %vm498_vm0, %v8958_v21, -inf }
 0x544   : > { %v7190_v32 = vpop.f32.mrf.mxu1  ;;  %1971 = vadd.xlane.f32.xlu1 %v1970_v25  ;;  %2093 = vadd.xlane.f32.xlu0 %v2092_v61 }
 0x546   : > { %v8964_v57 = vpop.f32.mrf.mxu1 }
 0x547   : > { %10246 = vst [vmem:[#allocation49_spill] sm:$0xff] %v8964_v57  ;;  %v4706_v25 = vsel %vm498_vm0, %v8964_v57, -inf }
 0x548   : > { %v7191_v1 = vpop.f32.mrf.mxu1  ;;  %4585 = vmax.xlane.f32.xlu1 %v4584_v16 }
 0x54a   : > { %v8968_v45 = vpop.f32.mrf.mxu1 }
 0x54c   : > { %v7202_v37 = vpop.f32.mrf.mxu1  ;;  %4704 = vmax.xlane.f32.xlu1 %v4703_v11 }
 0x54e   : > { %v8972_v15 = vpop.f32.mrf.mxu1 }
 0x550   : > { %v7203_v61 = vpop.f32.mrf.mxu1  ;;  %4707 = vmax.xlane.f32.xlu1 %v4706_v25 }
 0x552   : > { %v8976_v32 = vpop.f32.mrf.mxu1 }
 0x554   : > { %v7214_v33 = vpop.f32.mrf.mxu1  ;;  %v1356_v12 = vpop.xlane.xlu0 %1355 }
 0x555   : > { %7499 = vrcp.f32 %v1356_v12 }
 0x556   : > { %v8978_v1 = vpop.f32.mrf.mxu1 }
 0x558   : > { %v7215_v16 = vpop.f32.mrf.mxu1  ;;  %v2201_v44 = vpop.xlane.xlu0 %2200 }
 0x559   : > { %v2205_v31 = vsub.f32 %v8716_v54, %v2201_v44 }
 0x55a   : > { %v8981_v37 = vpop.f32.mrf.mxu1  ;;  %4300 = vrot.lane.b32.xlu0 %v8541_v56, %s10196_s30 }
 0x55b   : > { %v2207_v11 = vmul.f32 1.442695, %v2205_v31  ;;  %v1359_v21 = vpop.xlane.xlu1 %1358 }
 0x55c   : > { %7501 = vrcp.f32 %v1359_v21  ;;  %v7226_v25 = vpop.f32.mrf.mxu1  ;;  %v2386_v61 = vpop.xlane.xlu0 %2385 }
 0x55d   : > { %7503 = vpow2.f32 %v2207_v11  ;;  %v2390_v57 = vsub.f32 %v8725_v4, %v2386_v61 }
 0x55e   : > { %v8985_v33 = vpop.f32.mrf.mxu1 }
 0x55f   : > { %v2204_v16 = vpop.xlane.xlu1 %2203  ;;  %v2392_v41 = vmul.f32 1.442695, %v2390_v57 }
 0x560   : > { %v2206_v6 = vsub.f32 %v8721_v52, %v2204_v16  ;;  %v7227_v54 = vpop.f32.mrf.mxu1  ;;  %v2511_v44 = vpop.xlane.xlu0 %2510 }
 0x561   : > { %v2515_v31 = vsub.f32 %v8734_v13, %v2511_v44 }
 0x562   : > { %v2209_v12 = vmul.f32 1.442695, %v2206_v6  ;;  %v8989_v49 = vpop.f32.mrf.mxu1  ;;  %v7500_v47 = vpop.eup %7499 }
 0x563   : > { %v2389_v56 = vpop.xlane.xlu1 %2388  ;;  %v2517_v52 = vmul.f32 1.442695, %v2515_v31  ;;  %v1362_v13 = vmul.f32 %v7500_v47, %v8772_v48  ;;  %v10247_v47 = vmov 0.0  }
 0x564   : > { %7505 = vpow2.f32 %v2209_v12  ;;  %v7238_v21 = vpop.f32.mrf.mxu1  ;;  %v2633_v25 = vpop.xlane.xlu0 %2632  ;;  %v2391_v4 = vsub.f32 %v8730_v7, %v2389_v56 }
 0x565   : > { %7507 = vpow2.f32 %v2392_v41 }
 0x566   : > { %v8992_v11 = vpop.f32.mrf.mxu1  ;;  %v2394_v12 = vmul.f32 1.442695, %v2391_v4  ;;  %7509 = vpow2.f32 %v2517_v52 }
 0x567   : > { %v2514_v61 = vpop.xlane.xlu1 %2513 }
 0x568   : > { %v2516_v16 = vsub.f32 %v8738_v18, %v2514_v61  ;;  %v7239_v6 = vpop.f32.mrf.mxu1  ;;  %v2755_v21 = vpop.xlane.xlu0 %2754  ;;  %7511 = vpow2.f32 %v2394_v12 }
 0x569   : > { %v7502_v54 = vpop.eup %7501  ;;  %v2759_v4 = vsub.f32 %v8752_v40, %v2755_v21  ;;  %v2637_v6 = vsub.f32 %v8743_v29, %v2633_v25  ;;  %v4828_v29 = vsel %vm498_vm0, %v8972_v15, -inf }
 0x56a   : > { %v8996_v9 = vpop.eup %7503  ;;  %v8998_v57 = vpop.f32.mrf.mxu1  ;;  %v1363_v44 = vmul.f32 %v7502_v54, %v8782_v53  ;;  %v2519_v41 = vmul.f32 1.442695, %v2516_v16  ;;  %v4825_v53 = vsel %vm498_vm0, %v8968_v45, -inf }
 0x56b   : > { %v2636_v28 = vpop.xlane.xlu1 %2635  ;;  %v2211_v7 = vsel %vm498_vm0, %v8996_v9, 0.0  ;;  %v2639_v40 = vmul.f32 1.442695, %v2637_v6 }
 0x56c   : > { %v7250_v56 = vpop.f32.mrf.mxu1  ;;  %2212 = vadd.xlane.f32.xlu1 %v2211_v7  ;;  %v1364_v18 = vpack.c.bf16 %v1363_v44, %v1362_v13  ;;  %7513 = vpow2.f32 %v2519_v41  ;;  %v2877_v16 = vpop.xlane.xlu0 %2876  ;;  %v2761_v44 = vmul.f32 1.442695, %v2759_v4 }
 0x56d   : > { %v2881_v56 = vsub.f32 %v8763_v5, %v2877_v16 }
 0x56e   : > { %6883 = vmatmul.mubr.msk.bf16.vlgmr.msra.gmra.mxu0 %vm498_vm0, %v1364_v18  ;;  %v9005_v31 = vpop.f32.mrf.mxu1  ;;  %7515 = vpow2.f32 %v2761_v44 }
 0x56f   : > { %6893 = vmatpush3.bf16.msra.mxu0 %v8575_v62  ;;  %v2758_v48 = vpop.xlane.xlu1 %2757  ;;  %6894 = vmatprep.mubr.msk.bf16.mxu0 %vm7900_vm1, %v10247_v47  ;;  %7517 = vpow2.f32 %v2639_v40 }
 0x570   : > { %v7251_v61 = vpop.f32.mrf.mxu1  ;;  %4826 = vmax.xlane.f32.xlu1 %v4825_v53  ;;  %6904 = vmatprep.subr.bf16.mxu0 %v10247_v47  ;;  %v2760_v12 = vsub.f32 %v8758_v36, %v2758_v48  ;;  %v2999_v21 = vpop.xlane.xlu0 %2998  ;;  %v2638_v36 = vsub.f32 %v8750_v38, %v2636_v28  ;;  %v4947_v53 = vsel %vm498_vm0, %v8976_v32, -inf }
 0x571   : > { %v9014_v52 = vpop.eup %7505  ;;  %v2883_v61 = vmul.f32 1.442695, %v2881_v56 }
 0x572   : > { %v2214_v62 = vsel %vm498_vm0, %v9014_v52, 0.0  ;;  %v9019_v13 = vpop.eup %7507  ;;  %v2763_v18 = vmul.f32 1.442695, %v2760_v12  ;;  %v2641_v44 = vmul.f32 1.442695, %v2638_v36 }
 0x573   : > { %v2880_v54 = vpop.xlane.xlu1 %2879  ;;  %v2396_v41 = vsel %vm498_vm0, %v9019_v13, 0.0  ;;  %v9029_v25 = vpop.eup %7509 }
 0x574   : > { %2215 = vadd.xlane.f32.xlu1 %v2214_v62  ;;  %7519 = vpow2.f32 %v2763_v18  ;;  %v2882_v5 = vsub.f32 %v8765_v10, %v2880_v54  ;;  %v2521_v16 = vsel %vm498_vm0, %v9029_v25, 0.0  ;;  %v3121_v6 = vpop.xlane.xlu0 %3120 }
 0x575   : > { %v9034_v4 = vpop.eup %7511  ;;  %7521 = vpow2.f32 %v2883_v61  ;;  %v3125_v40 = vsub.f32 %v8774_v43, %v3121_v6  ;;  %v3003_v6 = vsub.f32 %v8768_v27, %v2999_v21  ;;  %v5191_v27 = vsel %vm498_vm0, %v8989_v49, -inf }
 0x576   : > { %v2399_v28 = vsel %vm498_vm0, %v9034_v4, 0.0  ;;  %v2885_v12 = vmul.f32 1.442695, %v2882_v5  ;;  %7523 = vpow2.f32 %v2641_v44 }
 0x577   : > { %v9022_v7 = vpop.xlane.xlu1 %3001  ;;  %v3127_v56 = vmul.f32 1.442695, %v3125_v40 }
 0x578   : > { %2397 = vadd.xlane.f32.xlu1 %v2396_v41  ;;  %v4950_v41 = vsel %vm498_vm0, %v8978_v1, -inf  ;;  %7525 = vpow2.f32 %v2885_v12 }
 0x579   : > { %4829 = vmax.xlane.f32.xlu0 %v4828_v29  ;;  %v9039_v62 = vpop.eup %7513  ;;  %v5072_v29 = vsel %vm498_vm0, %v8985_v33, -inf  ;;  %7527 = vpow2.f32 %v3127_v56  ;;  %v3243_v56 = vpop.xlane.xlu0 %3242 }
 0x57a   : > { %v2524_v10 = vsel %vm498_vm0, %v9039_v62, 0.0 }
 0x57b   : > { %v3124_v48 = vpop.xlane.xlu1 %3123  ;;  %v9051_v36 = vpop.eup %7515 }
 0x57c   : > { %4948 = vmax.xlane.f32.xlu1 %v4947_v53  ;;  %v3126_v18 = vsub.f32 %v8778_v42, %v3124_v48  ;;  %v5069_v53 = vsel %vm498_vm0, %v8981_v37, -inf  ;;  %v9055_v61 = vpop.eup %7517  ;;  %v2765_v42 = vsel %vm498_vm0, %v9051_v36, 0.0 }
 0x57d   : > { %2522 = vadd.xlane.f32.xlu0 %v2521_v16 }
 0x57e   : > { %v3129_v5 = vmul.f32 1.442695, %v3126_v18 }
 0x57f   : > { %v3246_v38 = vpop.xlane.xlu1 %3245 }
 0x580   : > { %2400 = vadd.xlane.f32.xlu1 %v2399_v28  ;;  %v3248_v16 = vsub.f32 %v8792_v55, %v3246_v38  ;;  %v2643_v28 = vsel %vm498_vm0, %v9055_v61, 0.0  ;;  %7529 = vpow2.f32 %v3129_v5 }
 0x581   : > { %2525 = vadd.xlane.f32.xlu0 %v2524_v10  ;;  %v9060_v48 = vpop.eup %7519  ;;  %v3005_v10 = vmul.f32 1.442695, %v3003_v6 }
 0x582   : > { %v3251_v12 = vmul.f32 1.442695, %v3248_v16  ;;  %v2768_v55 = vsel %vm498_vm0, %v9060_v48, 0.0  ;;  %v9068_v38 = vpop.eup %7521 }
 0x583   : > { %v3422_v54 = vpop.xlane.xlu1 %3421  ;;  %v9074_v21 = vpop.eup %7523 }
 0x584   : > { %4951 = vmax.xlane.f32.xlu1 %v4950_v41  ;;  %v3426_v40 = vsub.f32 %v8798_v22, %v3422_v54  ;;  %v3004_v41 = vsub.f32 %v8770_v46, %v9022_v7  ;;  %7531 = vpow2.f32 %v3251_v12  ;;  %v2887_v54 = vsel %vm498_vm0, %v9068_v38, 0.0 }
 0x585   : > { %5073 = vmax.xlane.f32.xlu0 %v5072_v29  ;;  %v9079_v29 = vpop.eup %7525  ;;  %7533 = vpow2.f32 %v3005_v10  ;;  %v3247_v7 = vsub.f32 %v8786_v23, %v3243_v56  ;;  %v2646_v5 = vsel %vm498_vm0, %v9074_v21, 0.0  ;;  %v3547_v16 = vpop.xlane.xlu0 %3546 }
 0x586   : > { %v3428_v18 = vmul.f32 1.442695, %v3426_v40  ;;  %v3007_v46 = vmul.f32 1.442695, %v3004_v41  ;;  %v9087_v6 = vpop.eup %7527  ;;  %v3551_v12 = vsub.f32 %v8830_v39, %v3547_v16  ;;  %v5194_v40 = vsel %vm498_vm0, %v8992_v11, -inf }
 0x587   : > { %v3425_v43 = vpop.xlane.xlu1 %3424  ;;  %v5313_v39 = vsel %vm498_vm0, %v8998_v57, -inf }
 0x588   : > { %5070 = vmax.xlane.f32.xlu1 %v5069_v53  ;;  %v3427_v22 = vsub.f32 %v8804_v17, %v3425_v43  ;;  %7535 = vpow2.f32 %v3428_v18  ;;  %v2890_v43 = vsel %vm498_vm0, %v9079_v29, 0.0  ;;  %v3553_v41 = vmul.f32 1.442695, %v3551_v12 }
 0x589   : > { %2766 = vadd.xlane.f32.xlu0 %v2765_v42  ;;  %7537 = vpow2.f32 %v3007_v46 }
 0x58a   : > { %v3430_v42 = vmul.f32 1.442695, %v3427_v22 }
 0x58b   : > { %v3550_v44 = vpop.xlane.xlu1 %3549 }
 0x58c   : > { %2644 = vadd.xlane.f32.xlu1 %v2643_v28  ;;  %v3552_v17 = vsub.f32 %v8836_v8, %v3550_v44  ;;  %v3249_v28 = vmul.f32 1.442695, %v3247_v7  ;;  %7539 = vpow2.f32 %v3430_v42  ;;  %v3131_v8 = vsel %vm498_vm0, %v9087_v6, 0.0 }
 0x58d   : > { %2769 = vadd.xlane.f32.xlu0 %v2768_v55  ;;  %v9095_v44 = vpop.eup %7529 }
 0x58e   : > { %v3555_v55 = vmul.f32 1.442695, %v3552_v17  ;;  %7541 = vpow2.f32 %v3249_v28 }
 0x58f   : > { %v3669_v53 = vpop.xlane.xlu1 %3668 }
 0x590   : > { %5192 = vmax.xlane.f32.xlu1 %v5191_v27  ;;  %v3673_v10 = vsub.f32 %v8840_v35, %v3669_v53  ;;  %7543 = vpow2.f32 %v3555_v55  ;;  %v3134_v35 = vsel %vm498_vm0, %v9095_v44, 0.0  ;;  %v5316_v53 = vsel %vm498_vm0, %v9005_v31, -inf }
 0x591   : > { %2888 = vadd.xlane.f32.xlu0 %v2887_v54  ;;  %v9102_v18 = vpop.eup %7531  ;;  %7545 = vpow2.f32 %v3553_v41 }
 0x592   : > { %v3675_v27 = vmul.f32 1.442695, %v3673_v10  ;;  %v9108_v46 = vpop.eup %7533 }
 0x593   : > { %v3672_v23 = vpop.xlane.xlu1 %3671 }
 0x594   : > { %2647 = vadd.xlane.f32.xlu1 %v2646_v5  ;;  %v3674_v56 = vsub.f32 %v8845_v51, %v3672_v23  ;;  %7547 = vpow2.f32 %v3675_v27  ;;  %v3256_v5 = vsel %vm498_vm0, %v9102_v18, 0.0 }
 0x595   : > { %2891 = vadd.xlane.f32.xlu0 %v2890_v43  ;;  %v9113_v16 = vpop.eup %7535  ;;  %v3009_v43 = vsel %vm498_vm0, %v9108_v46, 0.0 }
 0x596   : > { %v3677_v7 = vmul.f32 1.442695, %v3674_v56  ;;  %v9121_v28 = vpop.eup %7537 }
 0x597   : > { %v9104_v22 = vpop.xlane.xlu1 %3790 }
 0x598   : > { %5195 = vmax.xlane.f32.xlu1 %v5194_v40  ;;  %7549 = vpow2.f32 %v3677_v7 }
 0x599   : > { %3132 = vadd.xlane.f32.xlu0 %v3131_v8  ;;  %v3794_v54 = vpop.xlane.xlu0 %3793  ;;  %v9125_v23 = vpop.eup %7539  ;;  %v3012_v8 = vsel %vm498_vm0, %v9121_v28, 0.0 }
 0x59a   : > { %v3796_v51 = vsub.f32 %v8855_v20, %v3794_v54  ;;  %v3432_v20 = vsel %vm498_vm0, %v9113_v16, 0.0  ;;  %v3435_v27 = vsel %vm498_vm0, %v9125_v23, 0.0 }
 0x59b   : > { %v9130_v41 = vpop.eup %7541 }
 0x59c   : > { %5314 = vmax.xlane.f32.xlu1 %v5313_v39  ;;  %v3799_v12 = vmul.f32 1.442695, %v3796_v51 }
 0x59d   : > { %3135 = vadd.xlane.f32.xlu0 %v3134_v35  ;;  %v9115_v42 = vpop.xlane.xlu1 %3912  ;;  %v9134_v56 = vpop.eup %7543 }
 0x59e   : > { %7551 = vpow2.f32 %v3799_v12  ;;  %v9139_v7 = vpop.eup %7545 }
 0x5a0   : > { %5317 = vmax.xlane.f32.xlu1 %v5316_v53 }
 0x5a1   : > { %3257 = vadd.xlane.f32.xlu0 %v3256_v5  ;;  %v9117_v17 = vpop.xlane.xlu0 %3915  ;;  %v3560_v5 = vsel %vm498_vm0, %v9134_v56, 0.0 }
 0x5a4   : > { %3010 = vadd.xlane.f32.xlu1 %v3009_v43  ;;  %v9143_v43 = vpop.eup %7547 }
 0x5a5   : > { %v4035_v40 = vpop.xlane.xlu1 %4034  ;;  %3433 = vadd.xlane.f32.xlu0 %v3432_v20  ;;  %v1481_v55 = vpop.xlane.xlu0 %1480 }
 0x5a6   : > { %v4039_v10 = vsub.f32 %v8872_v26, %v4035_v40  ;;  %7553 = vrcp.f32 %v1481_v55  ;;  %v3253_v26 = vsel %vm498_vm0, %v9130_v41, 0.0 }
 0x5a8   : > { %v4041_v39 = vmul.f32 1.442695, %v4039_v10  ;;  %3013 = vadd.xlane.f32.xlu1 %v3012_v8  ;;  %v3679_v10 = vsel %vm498_vm0, %v9143_v43, 0.0  ;;  %v9150_v8 = vpop.eup %7549 }
 0x5a9   : > { %v1484_v35 = vpop.xlane.xlu1 %1483  ;;  %3436 = vadd.xlane.f32.xlu0 %v3435_v27  ;;  %v4038_v54 = vpop.xlane.xlu0 %4037 }
 0x5aa   : > { %v4040_v53 = vsub.f32 %v8881_v24, %v4038_v54  ;;  %7555 = vrcp.f32 %v1484_v35  ;;  %v3557_v24 = vsel %vm498_vm0, %v9139_v7, 0.0 }
 0x5ab   : > { %7557 = vpow2.f32 %v4041_v39  ;;  %v9156_v35 = vpop.eup %7551 }
 0x5ac   : > { %v4043_v51 = vmul.f32 1.442695, %v4040_v53  ;;  %3254 = vadd.xlane.f32.xlu1 %v3253_v26  ;;  %10248 = vst [vmem:[#allocation50_spill] sm:$0xff] %v9156_v35 }
 0x5ad   : > { %v4157_v12 = vpop.xlane.xlu1 %4156  ;;  %3561 = vadd.xlane.f32.xlu0 %v3560_v5  ;;  %v1603_v20 = vpop.xlane.xlu0 %1602  ;;  %v3804_v5 = vsel %vm498_vm0, %v9156_v35, 0.0 }
 0x5ae   : > { %v4161_v40 = vsub.f32 %v8890_v60, %v4157_v12  ;;  %7559 = vpow2.f32 %v4043_v51  ;;  %v3682_v60 = vsel %vm498_vm0, %v9150_v8, 0.0 }
 0x5af   : > { %7561 = vrcp.f32 %v1603_v20 }
 0x5b0   : > { %v4163_v55 = vmul.f32 1.442695, %v4161_v40  ;;  %3558 = vadd.xlane.f32.xlu1 %v3557_v24 }
 0x5b1   : > { %v1606_v39 = vpop.xlane.xlu1 %1605  ;;  %3680 = vadd.xlane.f32.xlu0 %v3679_v10  ;;  %v9152_v27 = vpop.xlane.xlu0 %4159 }
 0x5b2   : > { %7563 = vrcp.f32 %v1606_v39 }
 0x5b3   : > { %7565 = vpow2.f32 %v4163_v55  ;;  %v7554_v26 = vpop.eup %7553 }
 0x5b4   : > { %v1487_v40 = vmul.f32 %v7554_v26, %v8870_v58  ;;  %v9177_v58 = vld [vmem:[#allocation2 + $0x58] sm:$0xff]  }
 0x5b5   : > { %v1728_v54 = vpop.xlane.xlu1 %1727  ;;  %3683 = vadd.xlane.f32.xlu0 %v3682_v60  ;;  %v1725_v53 = vpop.xlane.xlu0 %1724 }
 0x5b6   : > { %7567 = vrcp.f32 %v1728_v54 }
 0x5b7   : > { %v7556_v51 = vpop.eup %7555  ;;  %7569 = vrcp.f32 %v1725_v53 }
 0x5b8   : > { %v9160_v12 = vpop.eup %7557  ;;  %v1488_v24 = vmul.f32 %v7556_v51, %v8878_v34 }
 0x5b9   : > { %10249 = vst [vmem:[#allocation51_spill] sm:$0xff] %v9160_v12  ;;  %3805 = vadd.xlane.f32.xlu0 %v3804_v5  ;;  %v4279_v20 = vpop.xlane.xlu0 %4278  ;;  %v4045_v60 = vsel %vm498_vm0, %v9160_v12, 0.0 }
 0x5ba   : > { %v4283_v55 = vsub.f32 %v8911_v30, %v4279_v20  ;;  %v1489_v10 = vpack.c.bf16 %v1488_v24, %v1487_v40 }
 0x5bb   : > { %v9167_v54 = vpop.eup %7559 }
 0x5bc   : > { %v4285_v39 = vmul.f32 1.442695, %v4283_v55  ;;  %6895 = vmatmul.mubr.msk.bf16.vlgmr.msra.gmra.mxu0 %vm498_vm0, %v1489_v10  ;;  %v7562_v35 = vpop.eup %7561  ;;  %v4048_v30 = vsel %vm498_vm0, %v9167_v54, 0.0 }
 0x5bd   : > { %v9170_v53 = vpop.xlane.xlu1 %4457  ;;  %4046 = vadd.xlane.f32.xlu0 %v4045_v60  ;;  %v9172_v5 = vpop.xlane.xlu0 %4281  ;;  %6905 = vmatpush3.bf16.msra.mxu0 %v8579_v63  ;;  %v1609_v63 = vmul.f32 %v7562_v35, %v8888_v19 }
 0x5be   : > { %7571 = vpow2.f32 %v4285_v39  ;;  %6906 = vmatprep.mubr.msk.bf16.mxu0 %vm7900_vm1, %v10247_v47  ;;  %6916 = vmatprep.subr.bf16.mxu0 %v10247_v47 }
 0x5bf   : > { %v7564_v34 = vpop.eup %7563 }
 0x5c0   : > { %v9182_v26 = vpop.eup %7565  ;;  %v1610_v40 = vmul.f32 %v7564_v34, %v8896_v50 }
 0x5c1   : > { %v1850_v51 = vpop.xlane.xlu1 %1849  ;;  %4604 = vrot.lane.b32.xlu1 %v9177_v58, %s7901_s17  ;;  %4049 = vadd.xlane.f32.xlu0 %v4048_v30  ;;  %v1847_v20 = vpop.xlane.xlu0 %1846  ;;  %v4167_v10 = vsel %vm498_vm0, %v9182_v26, 0.0 }
 0x5c2   : > { %v1611_v24 = vpack.c.bf16 %v1610_v40, %v1609_v63  ;;  %7573 = vrcp.f32 %v1850_v51  ;;  %v3795_v51 = vsub.f32 %v8850_v14, %v9104_v22  ;;  %v10250_v14 = vld [vmem:[#allocation34_spill] sm:$0xff] }
 0x5c3   : > { %v7568_v55 = vpop.eup %7567  ;;  %7575 = vrcp.f32 %v1847_v20  ;;  %v3917_v22 = vsub.f32 %v10250_v14, %v9115_v42  ;;  %v10254_v42 = vld [vmem:[#allocation36_spill] sm:$0xff]  ;;  %v10256_v14 = vld [vmem:[#allocation37_spill] sm:$0xff] }
 0x5c4   : > { %v7570_v39 = vpop.eup %7569  ;;  %6907 = vmatmul.mubr.msk.bf16.vlgmr.msra.gmra.mxu0 %vm498_vm0, %v1611_v24  ;;  %v1732_v50 = vmul.f32 %v7568_v55, %v8908_v0  ;;  %v3797_v0 = vmul.f32 1.442695, %v3795_v51  ;;  %v10251_v55 = vld [vmem:[#allocation40_spill] sm:$0xff] }
 0x5c5   : > { %v9191_v60 = vpop.xlane.xlu1 %4460  ;;  %4168 = vadd.xlane.f32.xlu0 %v4167_v10  ;;  %v9193_v12 = vpop.xlane.xlu0 %4582  ;;  %6917 = vmatpush3.bf16.msra.mxu0 %v8577_v2  ;;  %v1731_v19 = vmul.f32 %v7570_v39, %v8901_v59  ;;  %v10252_v39 = vld [vmem:[#allocation35_spill] sm:$0xff] }
 0x5c6   : > { %6918 = vmatprep.mubr.msk.bf16.mxu0 %vm7900_vm1, %v10247_v47  ;;  %6928 = vmatprep.subr.bf16.mxu0 %v10247_v47 }
 0x5c7   : > { %v1733_v20 = vpack.c.bf16 %v1732_v50, %v1731_v19  ;;  %v10253_v19 = vld [vmem:[#allocation39_spill] sm:$0xff] }
 0x5c9   : > { %v1969_v35 = vpop.xlane.xlu1 %1968  ;;  %v2091_v34 = vpop.xlane.xlu0 %2090 }
 0x5ca   : > { %7577 = vrcp.f32 %v1969_v35  ;;  %v3919_v35 = vmul.f32 1.442695, %v3917_v22  ;;  %v4284_v22 = vsub.f32 %v10256_v14, %v9172_v5  ;;  %v10261_v5 = vld [vmem:[#allocation47_spill] sm:$0xff] }
 0x5cb   : > { %v9201_v30 = vpop.eup %7571 }
 0x5cc   : > { %v4289_v2 = vsel %vm498_vm0, %v9201_v30, 0.0  ;;  %6919 = vmatmul.mubr.msk.bf16.vlgmr.msra.gmra.mxu0 %vm498_vm0, %v1733_v20 }
 0x5cd   : > { %v1972_v63 = vpop.xlane.xlu1 %1971  ;;  %4290 = vadd.xlane.f32.xlu0 %v4289_v2  ;;  %6929 = vmatpush3.bf16.msra.mxu0 %v8581_v3  ;;  %v2094_v59 = vpop.xlane.xlu0 %2093  ;;  %v3918_v3 = vsub.f32 %v10252_v39, %v9117_v17  ;;  %v4162_v2 = vsub.f32 %v10254_v42, %v9152_v27  ;;  %v10260_v42 = vld [vmem:[#allocation19_spill] sm:$0xff] }
 0x5ce   : > { %7579 = vrcp.f32 %v1972_v63  ;;  %6930 = vmatprep.mubr.msk.bf16.mxu0 %vm7900_vm1, %v10247_v47  ;;  %6940 = vmatprep.subr.bf16.mxu0 %v10247_v47  ;;  %v10255_v63 = vld [vmem:[#allocation18_spill] sm:$0xff] }
 0x5cf   : > { %v7574_v40 = vpop.eup %7573  ;;  %7581 = vrcp.f32 %v2094_v59  ;;  %v3921_v20 = vmul.f32 1.442695, %v3918_v3 }
 0x5d0   : > { %v7576_v24 = vpop.eup %7575  ;;  %v1854_v10 = vmul.f32 %v7574_v40, %v10251_v55  ;;  %7583 = vpow2.f32 %v3797_v0  ;;  %v10257_v40 = vld [vmem:[#allocation43_spill] sm:$0xff]  ;;  %v10258_v55 = vld [vmem:[#allocation46_spill] sm:$0xff] }
 0x5d1   : > { %v1853_v50 = vmul.f32 %v7576_v24, %v10253_v19  ;;  %7585 = vrcp.f32 %v2091_v34  ;;  %v4586_v59 = vpop.xlane.xlu1 %4585  ;;  %v4165_v34 = vmul.f32 1.442695, %v4162_v2 }
 0x5d2   : > { %7587 = vpow2.f32 %v3919_v35  ;;  %v10259_v35 = vld [vmem:[#allocation41_spill] sm:$0xff] }
 0x5d3   : > { %v1855_v51 = vpack.c.bf16 %v1854_v10, %v1853_v50  ;;  %7589 = vpow2.f32 %v3921_v20  ;;  %v4287_v50 = vmul.f32 1.442695, %v4284_v22 }
 0x5d4   : > { %7591 = vpow2.f32 %v4165_v34  ;;  %v10263_v34 = vld [vmem:[#allocation44_spill] sm:$0xff] }
 0x5d5   : > { %6931 = vmatmul.mubr.msk.bf16.vlgmr.msra.gmra.mxu0 %vm498_vm0, %v1855_v51  ;;  %v4705_v3 = vpop.xlane.xlu1 %4704  ;;  %v4463_v51 = vsub.f32 %v10259_v35, %v9191_v60  ;;  %7593 = vpow2.f32 %v4287_v50 }
 0x5d6   : > { %6941 = vmatpush3.bf16.msra.mxu0 %v10255_v63  ;;  %6942 = vmatprep.mubr.msk.bf16.mxu0 %vm7900_vm1, %v10247_v47 }
 0x5d7   : > { %v7578_v0 = vpop.eup %7577  ;;  %6952 = vmatprep.subr.bf16.mxu0 %v10247_v47  ;;  %v4466_v60 = vmul.f32 1.442695, %v4463_v51  ;;  %v10266_v51 = vld [vmem:[#allocation24_spill] sm:$0xff] }
 0x5d8   : > { %v1975_v24 = vmul.f32 %v7578_v0, %v10257_v40  ;;  %v10262_v0 = vld [vmem:[#allocation45_spill] sm:$0xff] }
 0x5d9   : > { %v4708_v40 = vpop.xlane.xlu1 %4707  ;;  %7595 = vpow2.f32 %v4466_v60 }
 0x5db   : > { %v7580_v17 = vpop.eup %7579 }
 0x5dc   : > { %v1976_v10 = vmul.f32 %v7580_v17, %v10258_v55  ;;  %v7582_v39 = vpop.eup %7581  ;;  %v4588_v17 = vsub.f32 %v10262_v0, %v4586_v59  ;;  %v10265_v59 = vld [vmem:[#allocation38_spill] sm:$0xff] }
 0x5dd   : > { %v9229_v19 = vpop.eup %7583  ;;  %v2098_v2 = vmul.f32 %v7582_v39, %v10261_v5  ;;  %v4462_v35 = vsub.f32 %v10265_v59, %v9170_v53 }
 0x5de   : > { %v1977_v27 = vpack.c.bf16 %v1976_v10, %v1975_v24  ;;  %v7586_v20 = vpop.eup %7585  ;;  %v3801_v63 = vsel %vm498_vm0, %v9229_v19, 0.0  ;;  %v4591_v10 = vmul.f32 1.442695, %v4588_v17 }
 0x5df   : > { %v2097_v14 = vmul.f32 %v7586_v20, %v10263_v34  ;;  %v9245_v22 = vpop.eup %7587  ;;  %v10268_v34 = vld [vmem:[#allocation48_spill] sm:$0xff] }
 0x5e0   : > { %6943 = vmatmul.mubr.msk.bf16.vlgmr.msra.gmra.mxu0 %vm498_vm0, %v1977_v27  ;;  %v9247_v55 = vpop.eup %7589  ;;  %v10264_v27 = vld [vmem:[#allocation49_spill] sm:$0xff]  ;;  %v3923_v50 = vsel %vm498_vm0, %v9245_v22, 0.0  ;;  %7597 = vpow2.f32 %v4591_v10 }
 0x5e1   : > { %6953 = vmatpush3.bf16.msra.mxu0 %v10260_v42  ;;  %6954 = vmatprep.mubr.msk.bf16.mxu0 %vm7900_vm1, %v10247_v47  ;;  %v2099_v24 = vpack.c.bf16 %v2098_v2, %v2097_v14  ;;  %v4710_v39 = vsub.f32 %v10264_v27, %v4708_v40  ;;  %v3926_v42 = vsel %vm498_vm0, %v9247_v55, 0.0  ;;  %v9261_v5 = vpop.eup %7591  ;;  %v4464_v2 = vmul.f32 1.442695, %v4462_v35 }
 0x5e2   : > { %6964 = vmatprep.subr.bf16.mxu0 %v10247_v47  ;;  %v4170_v53 = vsel %vm498_vm0, %v9261_v5, 0.0  ;;  %v9267_v0 = vpop.eup %7593  ;;  %v4709_v14 = vsub.f32 %v10268_v34, %v4705_v3 }
 0x5e3   : > { %4726 = vrot.lane.b32.xlu0 %v9177_v58, %s10186_s22  ;;  %v4713_v20 = vmul.f32 1.442695, %v4710_v39  ;;  %v4292_v40 = vsel %vm498_vm0, %v9267_v0, 0.0 }
 0x5e4   : > { %v4711_v10 = vmul.f32 1.442695, %v4709_v14 }
 0x5e5   : > { %3802 = vadd.xlane.f32.xlu1 %v3801_v63  ;;  %v10267_v63 = vld [vmem:[#allocation42_spill] sm:$0xff]  ;;  %7599 = vpow2.f32 %v4713_v20 }
 0x5e6   : > { %v4587_v60 = vsub.f32 %v10267_v63, %v9193_v12  ;;  %7601 = vpow2.f32 %v4464_v2  ;;  %v9285_v2 = vpop.permute.xlu0 %4300 }
 0x5e8   : > { %6955 = vmatmul.mubr.msk.bf16.vlgmr.msra.gmra.mxu0 %vm498_vm0, %v2099_v24  ;;  %v4589_v17 = vmul.f32 1.442695, %v4587_v60  ;;  %v9272_v24 = vpop.eup %7595 }
 0x5e9   : > { %6965 = vmatpush3.bf16.msra.mxu0 %v10266_v51  ;;  %3924 = vadd.xlane.f32.xlu1 %v3923_v50  ;;  %v4471_v27 = vsel %vm498_vm0, %v9272_v24, 0.0 }
 0x5ea   : > { %6966 = vmatprep.mubr.msk.bf16.mxu0 %vm7900_vm1, %v10247_v47  ;;  %6976 = vmatprep.subr.bf16.mxu0 %v10247_v47  ;;  %7603 = vpow2.f32 %v4589_v17 }
 0x5eb   : > { %7605 = vpow2.f32 %v4711_v10 }
 0x5ed   : > { %3927 = vadd.xlane.f32.xlu1 %v3926_v42  ;;  %v9276_v39 = vpop.eup %7597 }
 0x5ee   : > { %v4596_v35 = vsel %vm498_vm0, %v9276_v39, 0.0 }
 0x5f1   : > { %4171 = vadd.xlane.f32.xlu1 %v4170_v53 }
 0x5f2   : > { %v9281_v51 = vpop.eup %7599 }
 0x5f3   : > { %v9283_v42 = vpop.eup %7601  ;;  %v4718_v63 = vsel %vm498_vm0, %v9281_v51, 0.0 }
 0x5f5   : > { %v2213_v12 = vpop.xlane.xlu1 %2212  ;;  %4293 = vadd.xlane.f32.xlu1 %v4292_v40 }
 0x5f6   : > { %7607 = vrcp.f32 %v2213_v12 }
 0x5f7   : > { %v9291_v53 = vpop.eup %7603 }
 0x5f8   : > { %v4593_v10 = vsel %vm498_vm0, %v9291_v53, 0.0  ;;  %v9296_v12 = vpop.eup %7605 }
 0x5f9   : > { %v4827_v50 = vpop.xlane.xlu1 %4826  ;;  %4472 = vadd.xlane.f32.xlu1 %v4471_v27 }
 0x5fa   : > { %v4831_v3 = vsub.f32 %v8968_v45, %v4827_v50  ;;  %v4468_v45 = vsel %vm498_vm0, %v9283_v42, 0.0 }
 0x5fc   : > { %v4833_v59 = vmul.f32 1.442695, %v4831_v3 }
 0x5fd   : > { %v2216_v20 = vpop.xlane.xlu1 %2215  ;;  %4597 = vadd.xlane.f32.xlu1 %v4596_v35  ;;  %v4715_v35 = vsel %vm498_vm0, %v9296_v12, 0.0 }
 0x5fe   : > { %7609 = vpow2.f32 %v4833_v59 }
 0x5ff   : > { %7611 = vrcp.f32 %v2216_v20 }
 0x601   : > { %v2398_v60 = vpop.xlane.xlu1 %2397  ;;  %4719 = vadd.xlane.f32.xlu1 %v4718_v63 }
 0x602   : > { %4469 = vadd.xlane.f32.xlu0 %v4468_v45  ;;  %v4830_v17 = vpop.xlane.xlu0 %4829 }
 0x603   : > { %v4832_v34 = vsub.f32 %v8972_v15, %v4830_v17  ;;  %v7608_v20 = vpop.eup %7607 }
 0x605   : > { %v4835_v14 = vmul.f32 1.442695, %v4832_v34  ;;  %v4949_v40 = vpop.xlane.xlu1 %4948  ;;  %v2219_v34 = vmul.f32 %v7608_v20, %v8996_v9 }
 0x606   : > { %v4953_v27 = vsub.f32 %v8976_v32, %v4949_v40  ;;  %4594 = vadd.xlane.f32.xlu0 %v4593_v10  ;;  %v2523_v50 = vpop.xlane.xlu0 %2522 }
 0x607   : > { %7613 = vpow2.f32 %v4835_v14 }
 0x608   : > { %v4955_v3 = vmul.f32 1.442695, %v4953_v27  ;;  %7615 = vrcp.f32 %v2398_v60 }
 0x609   : > { %v2401_v59 = vpop.xlane.xlu1 %2400 }
 0x60a   : > { %7617 = vpow2.f32 %v4955_v3  ;;  %4716 = vadd.xlane.f32.xlu0 %v4715_v35  ;;  %v2526_v15 = vpop.xlane.xlu0 %2525  ;;  %v7743_v35 = vld [vmem:[#allocation2 + $0x48] sm:$0xff]  }
 0x60b   : > { %v9301_v63 = vpop.eup %7609  ;;  %7619 = vrcp.f32 %v2401_v59 }
 0x60c   : > { %v7612_v45 = vpop.eup %7611  ;;  %v4837_v32 = vsel %vm498_vm0, %v9301_v63, 0.0  ;;  %7621 = vrcp.f32 %v2526_v15 }
 0x60d   : > { %v4952_v17 = vpop.xlane.xlu1 %4951  ;;  %v2220_v60 = vmul.f32 %v7612_v45, %v9014_v52  ;;  %7623 = vrcp.f32 %v2523_v50 }
 0x60e   : > { %v4954_v14 = vsub.f32 %v8978_v1, %v4952_v17  ;;  %4838 = vadd.xlane.f32.xlu0 %v4837_v32  ;;  %v5074_v40 = vpop.xlane.xlu0 %5073 }
 0x60f   : > { %v2221_v10 = vpack.c.bf16 %v2220_v60, %v2219_v34  ;;  %v5076_v3 = vsub.f32 %v8985_v33, %v5074_v40 }
 0x610   : > { %v4957_v27 = vmul.f32 1.442695, %v4954_v14 }
 0x611   : > { %6967 = vmatmul.mubr.msk.bf16.vlgmr.msra.gmra.mxu0 %vm498_vm0, %v2221_v10  ;;  %v5071_v59 = vpop.xlane.xlu1 %5070  ;;  %v5079_v52 = vmul.f32 1.442695, %v5076_v3 }
 0x612   : > { %7625 = vpow2.f32 %v4957_v27  ;;  %6977 = vmatpush3.bf16.msra.mxu0 %v7743_v35  ;;  %v5075_v9 = vsub.f32 %v8981_v37, %v5071_v59  ;;  %6978 = vmatprep.mubr.msk.bf16.mxu0 %vm7900_vm1, %v10247_v47  ;;  %v2767_v45 = vpop.xlane.xlu0 %2766 }
 0x613   : > { %6988 = vmatprep.subr.bf16.mxu0 %v10247_v47 }
 0x614   : > { %v9314_v1 = vpop.eup %7613  ;;  %v5077_v20 = vmul.f32 1.442695, %v5075_v9 }
 0x615   : > { %v2645_v15 = vpop.xlane.xlu1 %2644  ;;  %v4840_v33 = vsel %vm498_vm0, %v9314_v1, 0.0  ;;  %v7616_v50 = vpop.eup %7615 }
 0x616   : > { %7627 = vpow2.f32 %v5077_v20  ;;  %4841 = vadd.xlane.f32.xlu1 %v4840_v33  ;;  %v2404_v60 = vmul.f32 %v7616_v50, %v9019_v13  ;;  %v2770_v3 = vpop.xlane.xlu0 %2769 }
 0x617   : > { %v9318_v32 = vpop.eup %7617  ;;  %7629 = vpow2.f32 %v5079_v52  ;;  %v10269_v52 = vld [vmem:[#allocation20_spill] sm:$0xff] }
 0x618   : > { %v7620_v37 = vpop.eup %7619  ;;  %v4959_v17 = vsel %vm498_vm0, %v9318_v32, 0.0  ;;  %7631 = vrcp.f32 %v2645_v15 }
 0x619   : > { %v5193_v34 = vpop.xlane.xlu1 %5192  ;;  %v2405_v14 = vmul.f32 %v7620_v37, %v9034_v4  ;;  %v7622_v27 = vpop.eup %7621 }
 0x61a   : > { %v5197_v40 = vsub.f32 %v8989_v49, %v5193_v34  ;;  %4960 = vadd.xlane.f32.xlu1 %v4959_v17  ;;  %v7624_v9 = vpop.eup %7623  ;;  %v2530_v49 = vmul.f32 %v7622_v27, %v9039_v62  ;;  %v2889_v33 = vpop.xlane.xlu0 %2888 }
 0x61b   : > { %v2406_v10 = vpack.c.bf16 %v2405_v14, %v2404_v60  ;;  %v2529_v15 = vmul.f32 %v7624_v9, %v9029_v25  ;;  %v10270_v25 = vld [vmem:[#allocation25_spill] sm:$0xff] }
 0x61c   : > { %v5199_v59 = vmul.f32 1.442695, %v5197_v40 }
 0x61d   : > { %6979 = vmatmul.mubr.msk.bf16.vlgmr.msra.gmra.mxu0 %vm498_vm0, %v2406_v10  ;;  %v2648_v35 = vpop.xlane.xlu1 %2647  ;;  %v2531_v17 = vpack.c.bf16 %v2530_v49, %v2529_v15 }
 0x61e   : > { %7633 = vpow2.f32 %v5199_v59  ;;  %6989 = vmatpush3.bf16.msra.mxu0 %v10269_v52  ;;  %6990 = vmatprep.mubr.msk.bf16.mxu0 %vm7900_vm1, %v10247_v47  ;;  %v2892_v40 = vpop.xlane.xlu0 %2891 }
 0x61f   : > { %v9329_v13 = vpop.eup %7625  ;;  %7635 = vrcp.f32 %v2648_v35  ;;  %7000 = vmatprep.subr.bf16.mxu0 %v10247_v47 }
 0x620   : > { %v4962_v4 = vsel %vm498_vm0, %v9329_v13, 0.0  ;;  %7637 = vrcp.f32 %v2770_v3 }
 0x621   : > { %v5196_v20 = vpop.xlane.xlu1 %5195  ;;  %4963 = vadd.xlane.f32.xlu1 %v4962_v4  ;;  %7639 = vrcp.f32 %v2767_v45 }
 0x622   : > { %v5198_v50 = vsub.f32 %v8992_v11, %v5196_v20  ;;  %v3133_v4 = vpop.xlane.xlu0 %3132 }
 0x623   : > { %v9337_v37 = vpop.eup %7627 }
 0x624   : > { %v5201_v34 = vmul.f32 1.442695, %v5198_v50  ;;  %v5081_v60 = vsel %vm498_vm0, %v9337_v37, 0.0  ;;  %v9341_v14 = vpop.eup %7629 }
 0x625   : > { %6991 = vmatmul.mubr.msk.bf16.vlgmr.msra.gmra.mxu0 %vm498_vm0, %v2531_v17  ;;  %v5315_v62 = vpop.xlane.xlu1 %5314  ;;  %5082 = vadd.xlane.f32.xlu0 %v5081_v60  ;;  %v5084_v27 = vsel %vm498_vm0, %v9341_v14, 0.0  ;;  %v7632_v3 = vpop.eup %7631 }
 0x626   : > { %7641 = vpow2.f32 %v5201_v34  ;;  %7001 = vmatpush3.bf16.msra.mxu0 %v10270_v25  ;;  %v5319_v11 = vsub.f32 %v8998_v57, %v5315_v62  ;;  %7002 = vmatprep.mubr.msk.bf16.mxu0 %vm7900_vm1, %v10247_v47  ;;  %v2651_v52 = vmul.f32 %v7632_v3, %v9055_v61  ;;  %v10271_v62 = vld [vmem:[#allocation21_spill] sm:$0xff] }
 0x627   : > { %7012 = vmatprep.subr.bf16.mxu0 %v10247_v47 }
 0x628   : > { %v5321_v10 = vmul.f32 1.442695, %v5319_v11  ;;  %v3136_v11 = vpop.xlane.xlu0 %3135 }
 0x629   : > { %v9351_v45 = vpop.xlane.xlu1 %5317  ;;  %5085 = vadd.xlane.f32.xlu0 %v5084_v27 }
 0x62a   : > { %7643 = vpow2.f32 %v5321_v10 }
 0x62b   : > { %v9353_v59 = vpop.eup %7633  ;;  %7645 = vrcp.f32 %v2892_v40 }
 0x62c   : > { %v7636_v35 = vpop.eup %7635  ;;  %v5203_v57 = vsel %vm498_vm0, %v9353_v59, 0.0  ;;  %7647 = vrcp.f32 %v2889_v33 }
 0x62d   : > { %v3011_v9 = vpop.xlane.xlu1 %3010  ;;  %5204 = vadd.xlane.f32.xlu1 %v5203_v57  ;;  %v2652_v49 = vmul.f32 %v7636_v35, %v9074_v21  ;;  %v7638_v50 = vpop.eup %7637 }
 0x62e   : > { %v9359_v20 = vpop.f32.mrf.mxu0  ;;  %v7640_v60 = vpop.eup %7639  ;;  %v2774_v33 = vmul.f32 %v7638_v50, %v9060_v48 }
 0x62f   : > { %v2653_v15 = vpack.c.bf16 %v2652_v49, %v2651_v52  ;;  %v2773_v27 = vmul.f32 %v7640_v60, %v9051_v36  ;;  %v3258_v49 = vpop.xlane.xlu0 %3257 }
 0x630   : > { %v6884_v17 = vpop.f32.mrf.mxu0 }
 0x631   : > { %7003 = vmatmul.mubr.msk.bf16.vlgmr.msra.gmra.mxu0 %vm498_vm0, %v2653_v15  ;;  %v3014_v34 = vpop.xlane.xlu1 %3013  ;;  %v2775_v35 = vpack.c.bf16 %v2774_v33, %v2773_v27  ;;  %v10272_v15 = vld [vmem:[#allocation26_spill] sm:$0xff] }
 0x632   : > { %7013 = vmatpush3.bf16.msra.mxu0 %v10271_v62  ;;  %v9363_v25 = vpop.f32.mrf.mxu0  ;;  %7014 = vmatprep.mubr.msk.bf16.mxu0 %vm7900_vm1, %v10247_v47  ;;  %7649 = vrcp.f32 %v3014_v34  ;;  %v10273_v33 = vld [vmem:[#allocation22_spill] sm:$0xff] }
 0x633   : > { %v9367_v61 = vpop.eup %7641  ;;  %v1415_v21 = vpack.c.bf16 %v9363_v25, %v9359_v20  ;;  %7024 = vmatprep.subr.bf16.mxu0 %v10247_v47  ;;  %7651 = vrcp.f32 %v3011_v9  ;;  %v3434_v34 = vpop.xlane.xlu0 %3433 }
 0x634   : > { %v6885_v40 = vpop.f32.mrf.mxu0  ;;  %v5206_v10 = vsel %vm498_vm0, %v9367_v61, 0.0  ;;  %7653 = vrcp.f32 %v3136_v11 }
 0x635   : > { %5207 = vadd.xlane.f32.xlu0 %v5206_v10  ;;  %7655 = vrcp.f32 %v3133_v4  ;;  %v3255_v60 = vpop.xlane.xlu1 %3254  ;;  %v5320_v10 = vsub.f32 %v9005_v31, %v9351_v45 }
 0x636   : > { %7657 = vrcp.f32 %v3255_v60  ;;  %v7744_v60 = vld [vmem:[#allocation2 + $0x50] sm:$0xff]  }
 0x637   : > { %v9376_v3 = vpop.eup %7643  ;;  %7659 = vrcp.f32 %v3258_v49  ;;  %v3437_v4 = vpop.xlane.xlu0 %3436 }
 0x638   : > { %v7646_v57 = vpop.eup %7645  ;;  %v5325_v52 = vsel %vm498_vm0, %v9376_v3, 0.0  ;;  %7661 = vrcp.f32 %v3437_v4 }
 0x639   : > { %7015 = vmatmul.mubr.msk.bf16.vlgmr.msra.gmra.mxu0 %vm498_vm0, %v2775_v35  ;;  %5326 = vadd.xlane.f32.xlu0 %v5325_v52  ;;  %v7648_v48 = vpop.eup %7647  ;;  %v2896_v36 = vmul.f32 %v7646_v57, %v9079_v29  ;;  %v10274_v35 = vld [vmem:[#allocation27_spill] sm:$0xff]  ;;  %v5323_v57 = vmul.f32 1.442695, %v5320_v10  ;;  %7663 = vrcp.f32 %v3434_v34 }
 0x63a   : > { %7025 = vmatpush3.bf16.msra.mxu0 %v10272_v15  ;;  %7026 = vmatprep.mubr.msk.bf16.mxu0 %vm7900_vm1, %v10247_v47  ;;  %v2895_v9 = vmul.f32 %v7648_v48, %v9068_v38  ;;  %v3559_v48 = vpop.xlane.xlu1 %3558 }
 0x63b   : > { %7036 = vmatprep.subr.bf16.mxu0 %v10247_v47  ;;  %7665 = vpow2.f32 %v5323_v57 }
 0x63c   : > { %v2897_v50 = vpack.c.bf16 %v2896_v36, %v2895_v9  ;;  %v10275_v36 = vld [vmem:[#allocation23_spill] sm:$0xff]  ;;  %7667 = vrcp.f32 %v3559_v48 }
 0x63e   : > { %4848 = vrot.lane.b32.xlu1 %v9177_v58, %s10188_s27 }
 0x63f   : > { %v7650_v17 = vpop.eup %7649 }
 0x640   : > { %v7652_v62 = vpop.eup %7651  ;;  %v3018_v38 = vmul.f32 %v7650_v17, %v9121_v28 }
 0x641   : > { %7027 = vmatmul.mubr.msk.bf16.vlgmr.msra.gmra.mxu0 %vm498_vm0, %v2897_v50  ;;  %v3017_v29 = vmul.f32 %v7652_v62, %v9108_v46  ;;  %v7654_v40 = vpop.eup %7653  ;;  %v3562_v46 = vpop.xlane.xlu0 %3561 }
 0x642   : > { %7037 = vmatpush3.bf16.msra.mxu0 %v10273_v33  ;;  %7038 = vmatprep.mubr.msk.bf16.mxu0 %vm7900_vm1, %v10247_v47  ;;  %v7656_v27 = vpop.eup %7655  ;;  %v3140_v28 = vmul.f32 %v7654_v40, %v9095_v44  ;;  %7669 = vrcp.f32 %v3562_v46  ;;  %v10277_v46 = vld [vmem:[#allocation30_spill] sm:$0xff] }
 0x643   : > { %7048 = vmatprep.subr.bf16.mxu0 %v10247_v47  ;;  %v3019_v11 = vpack.c.bf16 %v3018_v38, %v3017_v29  ;;  %v3139_v52 = vmul.f32 %v7656_v27, %v9087_v6  ;;  %v7658_v45 = vpop.eup %7657 }
 0x644   : > { %v7660_v49 = vpop.eup %7659  ;;  %v3261_v6 = vmul.f32 %v7658_v45, %v9130_v41  ;;  %v10278_v45 = vld [vmem:[#allocation29_spill] sm:$0xff] }
 0x645   : > { %v3141_v31 = vpack.c.bf16 %v3140_v28, %v3139_v52  ;;  %v3681_v15 = vpop.xlane.xlu0 %3680  ;;  %v3262_v44 = vmul.f32 %v7660_v49, %v9102_v18  ;;  %v7662_v50 = vpop.eup %7661 }
 0x646   : > { %v7664_v34 = vpop.eup %7663  ;;  %v3441_v18 = vmul.f32 %v7662_v50, %v9125_v23 }
 0x647   : > { %v3263_v9 = vpack.c.bf16 %v3262_v44, %v3261_v6  ;;  %v3440_v41 = vmul.f32 %v7664_v34, %v9113_v16  ;;  %v10279_v44 = vld [vmem:[#allocation50_spill] sm:$0xff] }
 0x648   : > { %v9426_v62 = vpop.eup %7665 }
 0x649   : > { %7039 = vmatmul.mubr.msk.bf16.vlgmr.msra.gmra.mxu0 %vm498_vm0, %v3019_v11  ;;  %v3684_v17 = vpop.xlane.xlu0 %3683  ;;  %v3442_v33 = vpack.c.bf16 %v3441_v18, %v3440_v41  ;;  %v7668_v38 = vpop.eup %7667  ;;  %v5328_v29 = vsel %vm498_vm0, %v9426_v62, 0.0  ;;  %v10276_v11 = vld [vmem:[#allocation28_spill] sm:$0xff] }
 0x64a   : > { %7049 = vmatpush3.bf16.msra.mxu0 %v10274_v35  ;;  %7050 = vmatprep.mubr.msk.bf16.mxu0 %vm7900_vm1, %v10247_v47  ;;  %7671 = vrcp.f32 %v3684_v17  ;;  %v3565_v16 = vmul.f32 %v7668_v38, %v9139_v7  ;;  %v9438_v35 = vpop.permute.xlu1 %4604  ;;  %v10280_v38 = vld [vmem:[#allocation32_spill] sm:$0xff] }
 0x64b   : > { %7060 = vmatprep.subr.bf16.mxu0 %v10247_v47  ;;  %7673 = vrcp.f32 %v3681_v15 }
 0x64d   : > { %v3806_v28 = vpop.xlane.xlu0 %3805 }
 0x64e   : > { %7675 = vrcp.f32 %v3806_v28 }
 0x64f   : > { %4970 = vrot.lane.b32.xlu0 %v9177_v58, %s10190_s23  ;;  %v7670_v4 = vpop.eup %7669 }
 0x650   : > { %v3566_v23 = vmul.f32 %v7670_v4, %v9134_v56 }
 0x651   : > { %7051 = vmatmul.mubr.msk.bf16.vlgmr.msra.gmra.mxu0 %vm498_vm0, %v3141_v31  ;;  %v4047_v31 = vpop.xlane.xlu0 %4046 }
 0x652   : > { %7061 = vmatpush3.bf16.msra.mxu0 %v10275_v36  ;;  %7062 = vmatprep.mubr.msk.bf16.mxu0 %vm7900_vm1, %v10247_v47  ;;  %v3567_v40 = vpack.c.bf16 %v3566_v23, %v3565_v16 }
 0x653   : > { %5092 = vrot.lane.b32.xlu0 %v9177_v58, %s10192_s15  ;;  %7072 = vmatprep.subr.bf16.mxu0 %v10247_v47 }
 0x657   : > { %5214 = vrot.lane.b32.xlu0 %v9177_v58, %s10194_s24  ;;  %v7672_v10 = vpop.eup %7671 }
 0x658   : > { %v7674_v27 = vpop.eup %7673  ;;  %v3688_v57 = vmul.f32 %v7672_v10, %v9150_v8  ;;  %v4050_v8 = vpop.xlane.xlu0 %4049 }
 0x659   : > { %7063 = vmatmul.mubr.msk.bf16.vlgmr.msra.gmra.mxu0 %vm498_vm0, %v3263_v9  ;;  %v3687_v56 = vmul.f32 %v7674_v27, %v9143_v43 }
 0x65a   : > { %7073 = vmatpush3.bf16.msra.mxu0 %v7744_v60  ;;  %7074 = vmatprep.mubr.msk.bf16.mxu0 %vm7900_vm1, %v10247_v47 }
 0x65b   : > { %5336 = vrot.lane.b32.xlu0 %v9177_v58, %s10196_s30  ;;  %7084 = vmatprep.subr.bf16.mxu0 %v10247_v47  ;;  %v3689_v52 = vpack.c.bf16 %v3688_v57, %v3687_v56  ;;  %v7676_v15 = vpop.eup %7675 }
 0x65c   : > { %v3810_v9 = vmul.f32 %v7676_v15, %v10279_v44  ;;  %v4169_v41 = vpop.xlane.xlu0 %4168 }
 0x660   : > { %v4291_v23 = vpop.xlane.xlu0 %4290 }
 0x661   : > { %7075 = vmatmul.mubr.msk.bf16.vlgmr.msra.gmra.mxu0 %vm498_vm0, %v3442_v33 }
 0x662   : > { %7085 = vmatpush3.bf16.msra.mxu0 %v10276_v11  ;;  %5329 = vadd.xlane.f32.xlu1 %v5328_v29 }
 0x663   : > { %7086 = vmatprep.mubr.msk.bf16.mxu0 %vm7900_vm1, %v10247_v47  ;;  %7096 = vmatprep.subr.bf16.mxu0 %v10247_v47 }
 0x669   : > { %7087 = vmatmul.mubr.msk.bf16.vlgmr.msra.gmra.mxu0 %vm498_vm0, %v3567_v40 }
 0x66a   : > { %7097 = vmatpush3.bf16.msra.mxu0 %v10277_v46  ;;  %7098 = vmatprep.mubr.msk.bf16.mxu0 %vm7900_vm1, %v10247_v47 }
 0x66b   : > { %7108 = vmatprep.subr.bf16.mxu0 %v10247_v47 }
 0x66e   : > { %v3803_v7 = vpop.xlane.xlu1 %3802 }
 0x66f   : > { %7677 = vrcp.f32 %v3803_v7  ;;  %v10281_v7 = vld [vmem:[#allocation31_spill] sm:$0xff] }
 0x671   : > { %7099 = vmatmul.mubr.msk.bf16.vlgmr.msra.gmra.mxu0 %vm498_vm0, %v3689_v52 }
 0x672   : > { %7109 = vmatpush3.bf16.msra.mxu0 %v10278_v45  ;;  %v3925_v48 = vpop.xlane.xlu1 %3924  ;;  %7110 = vmatprep.mubr.msk.bf16.mxu0 %vm7900_vm1, %v10247_v47 }
 0x673   : > { %7120 = vmatprep.subr.bf16.mxu0 %v10247_v47  ;;  %7679 = vrcp.f32 %v3925_v48 }
 0x676   : > { %v3928_v49 = vpop.xlane.xlu1 %3927 }
 0x677   : > { %7681 = vrcp.f32 %v3928_v49 }
 0x678   : > { %7683 = vrcp.f32 %v4050_v8 }
 0x679   : > { %7685 = vrcp.f32 %v4047_v31  ;;  %v10282_v31 = vld [vmem:[#allocation51_spill] sm:$0xff] }
 0x67a   : > { %v4172_v34 = vpop.xlane.xlu1 %4171 }
 0x67b   : > { %7687 = vrcp.f32 %v4172_v34 }
 0x67c   : > { %v7678_v43 = vpop.eup %7677  ;;  %v1530_v36 = vpop.f32.mrf.mxu0  ;;  %7689 = vrcp.f32 %v4169_v41 }
 0x67d   : > { %v3809_v6 = vmul.f32 %v7678_v43, %v9229_v19 }
 0x67e   : > { %v6896_v50 = vpop.f32.mrf.mxu0  ;;  %v4294_v28 = vpop.xlane.xlu1 %4293 }
 0x67f   : > { %v3811_v17 = vpack.c.bf16 %v3810_v9, %v3809_v6  ;;  %7691 = vrcp.f32 %v4294_v28  ;;  %v10283_v9 = vld [vmem:[#allocation33_spill] sm:$0xff] }
 0x680   : > { %v1533_v60 = vpop.f32.mrf.mxu0  ;;  %v7680_v18 = vpop.eup %7679  ;;  %7693 = vrcp.f32 %v4291_v23 }
 0x681   : > { %7111 = vmatmul.mubr.msk.bf16.vlgmr.msra.gmra.mxu0 %vm498_vm0, %v3811_v17  ;;  %v1537_v33 = vpack.c.bf16 %v1533_v60, %v1530_v36  ;;  %v3931_v11 = vmul.f32 %v7680_v18, %v9245_v22 }
 0x682   : > { %7121 = vmatpush3.bf16.msra.mxu0 %v10280_v38  ;;  %7122 = vmatprep.mubr.msk.bf16.mxu0 %vm7900_vm1, %v10247_v47  ;;  %v6897_v29 = vpop.f32.mrf.mxu0  ;;  %v4473_v6 = vpop.xlane.xlu1 %4472 }
 0x683   : > { %7132 = vmatprep.subr.bf16.mxu0 %v10247_v47  ;;  %2271 = vrot.lane.b32.xlu1 %v1537_v33, %s10196_s30 }
 0x684   : > { %v7682_v19 = vpop.eup %7681  ;;  %v1652_v4 = vpop.f32.mrf.mxu0 }
 0x685   : > { %v3932_v16 = vmul.f32 %v7682_v19, %v9247_v55  ;;  %v7684_v27 = vpop.eup %7683  ;;  %v9467_v55 = vpop.permute.xlu0 %4726 }
 0x686   : > { %v6908_v40 = vpop.f32.mrf.mxu0  ;;  %v7686_v57 = vpop.eup %7685  ;;  %v4054_v52 = vmul.f32 %v7684_v27, %v9167_v54 }
 0x687   : > { %v3933_v10 = vpack.c.bf16 %v3932_v16, %v3931_v11  ;;  %v4053_v45 = vmul.f32 %v7686_v57, %v10282_v31  ;;  %v4598_v19 = vpop.xlane.xlu1 %4597 }
 0x688   : > { %v1655_v46 = vpop.f32.mrf.mxu0  ;;  %v7688_v15 = vpop.eup %7687 }
 0x689   : > { %7123 = vmatmul.mubr.msk.bf16.vlgmr.msra.gmra.mxu0 %vm498_vm0, %v3933_v10  ;;  %v1659_v56 = vpack.c.bf16 %v1655_v46, %v1652_v4  ;;  %v4055_v49 = vpack.c.bf16 %v4054_v52, %v4053_v45  ;;  %v7690_v54 = vpop.eup %7689  ;;  %v4176_v50 = vmul.f32 %v7688_v15, %v9261_v5 }
 0x68a   : > { %7133 = vmatpush3.bf16.msra.mxu0 %v10281_v7  ;;  %7134 = vmatprep.mubr.msk.bf16.mxu0 %vm7900_vm1, %v10247_v47  ;;  %v6909_v22 = vpop.f32.mrf.mxu0  ;;  %v4175_v34 = vmul.f32 %v7690_v54, %v9182_v26 }
 0x68b   : > { %7144 = vmatprep.subr.bf16.mxu0 %v10247_v47  ;;  %2274 = vrot.lane.b32.xlu0 %v1659_v56, %s10194_s24  ;;  %v4470_v43 = vpop.xlane.xlu0 %4469  ;;  %v4720_v28 = vpop.xlane.xlu1 %4719 }
 0x68c   : > { %v1774_v48 = vpop.f32.mrf.mxu0  ;;  %7695 = vrcp.f32 %v4470_v43  ;;  %v4177_v60 = vpack.c.bf16 %v4176_v50, %v4175_v34  ;;  %v7692_v41 = vpop.eup %7691  ;;  %v7394_v34 = vld [vmem:[%s10147_s5 + $0x70] ss:$8 sps:$4 sm:$0xff]  }
 0x68d   : > { %7697 = vrcp.f32 %v4473_v6  ;;  %v7694_v29 = vpop.eup %7693  ;;  %v4298_v5 = vmul.f32 %v7692_v41, %v9267_v0 }
 0x68e   : > { %v6920_v8 = vpop.f32.mrf.mxu0  ;;  %v4297_v11 = vmul.f32 %v7694_v29, %v9201_v30  ;;  %v7402_v29 = vld [vmem:[%s10147_s5 + $0x54] ss:$8 sps:$4 sm:$0xff]  }
 0x68f   : > { %v4595_v33 = vpop.xlane.xlu0 %4594 }
 0x690   : > { %v1777_v36 = vpop.f32.mrf.mxu0  ;;  %7699 = vrcp.f32 %v4595_v33  ;;  %v4299_v23 = vpack.c.bf16 %v4298_v5, %v4297_v11  ;;  %v7397_v33 = vld [vmem:[%s10147_s5 + $0x60] ss:$8 sps:$4 sm:$0xff]  }
 0x691   : > { %7135 = vmatmul.mubr.msk.bf16.vlgmr.msra.gmra.mxu0 %vm498_vm0, %v4055_v49  ;;  %v1781_v44 = vpack.c.bf16 %v1777_v36, %v1774_v48  ;;  %7701 = vrcp.f32 %v4598_v19 }
 0x692   : > { %7145 = vmatpush3.bf16.msra.mxu0 %v10283_v9  ;;  %7146 = vmatprep.mubr.msk.bf16.mxu0 %vm7900_vm1, %v10247_v47  ;;  %v6921_v17 = vpop.f32.mrf.mxu0 }
 0x693   : > { %7156 = vmatprep.subr.bf16.mxu0 %v10247_v47  ;;  %2277 = vrot.lane.b32.xlu0 %v1781_v44, %s10192_s15  ;;  %v4717_v10 = vpop.xlane.xlu0 %4716  ;;  %s10286_s15 = smov 32  }
 0x694   : > { %7703 = vrcp.f32 %v4717_v10 }
 0x695   : > { %v1896_v18 = vpop.f32.mrf.mxu0  ;;  %7705 = vrcp.f32 %v4720_v28  ;;  %v7408_v28 = vld [vmem:[%s10147_s5 + $0x34] ss:$8 sps:$4 sm:$0xff]  }
 0x697   : > { %v6932_v38 = vpop.f32.mrf.mxu0  ;;  %v4839_v48 = vpop.xlane.xlu0 %4838 }
 0x699   : > { %7147 = vmatmul.mubr.msk.bf16.vlgmr.msra.gmra.mxu0 %vm498_vm0, %v4177_v60  ;;  %v1899_v4 = vpop.f32.mrf.mxu0  ;;  %v7696_v40 = vpop.eup %7695 }
 0x69a   : > { %7157 = vmatpush3.bf16.msra.mxu0 %v9285_v2  ;;  %7158 = vmatprep.mubr.msk.bf16.mxu0 %vm7900_vm1, %v10247_v47  ;;  %v1903_v26 = vpack.c.bf16 %v1899_v4, %v1896_v18  ;;  %v7698_v27 = vpop.eup %7697  ;;  %v4476_v30 = vmul.f32 %v7696_v40, %v9283_v42  ;;  %v7400_v4 = vld [vmem:[%s10147_s5 + $0x50] ss:$8 sps:$4 sm:$0xff]  }
 0x69b   : > { %7168 = vmatprep.subr.bf16.mxu0 %v10247_v47  ;;  %v6933_v16 = vpop.f32.mrf.mxu0  ;;  %v4477_v57 = vmul.f32 %v7698_v27, %v9272_v24  ;;  %v7406_v27 = vld [vmem:[%s10147_s5 + $0x30] ss:$8 sps:$4 sm:$0xff]  }
 0x69c   : > { %2280 = vrot.lane.b32.xlu0 %v1903_v26, %s10190_s23  ;;  %s10285_s23 = smov 16  }
 0x69d   : > { %v4478_v52 = vpack.c.bf16 %v4477_v57, %v4476_v30  ;;  %v7411_v57 = vld [vmem:[%s10147_s5 + $0x24] ss:$8 sps:$4 sm:$0xff]  }
 0x69f   : > { %v4842_v22 = vpop.xlane.xlu1 %4841 }
 0x6a0   : > { %v2018_v2 = vpop.f32.mrf.mxu0  ;;  %7707 = vrcp.f32 %v4842_v22 }
 0x6a1   : > { %7159 = vmatmul.mubr.msk.bf16.vlgmr.msra.gmra.mxu0 %vm498_vm0, %v4299_v23  ;;  %7709 = vrcp.f32 %v4839_v48  ;;  %v7405_v23 = vld [vmem:[%s10147_s5 + $0x44] ss:$8 sps:$4 sm:$0xff]  }
 0x6a2   : > { %7169 = vmatpush3.bf16.msra.mxu0 %v9177_v58  ;;  %v6944_v0 = vpop.f32.mrf.mxu0  ;;  %7170 = vmatprep.mubr.msk.bf16.mxu0 %vm7900_vm1, %v10247_v47  ;;  %v7700_v58 = vpop.eup %7699 }
 0x6a3   : > { %7180 = vmatprep.subr.bf16.mxu0 %v10247_v47  ;;  %v7702_v45 = vpop.eup %7701  ;;  %v4601_v24 = vmul.f32 %v7700_v58, %v9291_v53  ;;  %v4961_v15 = vpop.xlane.xlu1 %4960 }
 0x6a4   : > { %v2021_v46 = vpop.f32.mrf.mxu0  ;;  %v4602_v8 = vmul.f32 %v7702_v45, %v9276_v39 }
 0x6a5   : > { %v2025_v56 = vpack.c.bf16 %v2021_v46, %v2018_v2 }
 0x6a6   : > { %v6945_v7 = vpop.f32.mrf.mxu0  ;;  %v4603_v54 = vpack.c.bf16 %v4602_v8, %v4601_v24 }
 0x6a7   : > { %2283 = vrot.lane.b32.xlu0 %v2025_v56, %s10188_s27  ;;  %v7409_v56 = vld [vmem:[%s10147_s5 + $0x20] ss:$8 sps:$4 sm:$0xff]   ;;  %s10290_s27 = smov 96  }
 0x6a8   : > { %v2140_v31 = vpop.f32.mrf.mxu0 }
 0x6a9   : > { %7171 = vmatmul.mubr.msk.bf16.vlgmr.msra.gmra.mxu0 %vm498_vm0, %v4478_v52  ;;  %v7414_v52 = vld [vmem:[%s10147_s5 + $0x14] ss:$8 sps:$4 sm:$0xff]  }
 0x6aa   : > { %7181 = vmatpush3.bf16.msra.mxu0 %v9438_v35  ;;  %v6956_v42 = vpop.f32.mrf.mxu0  ;;  %7182 = vmatprep.mubr.msk.bf16.mxu0 %vm7900_vm1, %v10247_v47  ;;  %v7704_v35 = vpop.eup %7703 }
 0x6ab   : > { %7192 = vmatprep.subr.bf16.mxu0 %v10247_v47  ;;  %v4964_v6 = vpop.xlane.xlu1 %4963  ;;  %v7706_v44 = vpop.eup %7705  ;;  %v4723_v53 = vmul.f32 %v7704_v35, %v9296_v12  ;;  %v7399_v12 = vld [vmem:[%s10147_s5 + $0x64] ss:$8 sps:$4 sm:$0xff]  }
 0x6ac   : > { %v2143_v49 = vpop.f32.mrf.mxu0  ;;  %7711 = vrcp.f32 %v4964_v6  ;;  %v4724_v9 = vmul.f32 %v7706_v44, %v9281_v51 }
 0x6ad   : > { %v2147_v43 = vpack.c.bf16 %v2143_v49, %v2140_v31  ;;  %7713 = vrcp.f32 %v4961_v15  ;;  %v7708_v60 = vpop.eup %7707  ;;  %v7415_v49 = vld [vmem:[%s10147_s5] ss:$8 sps:$4 sm:$0xff]  }
 0x6ae   : > { %v6957_v36 = vpop.f32.mrf.mxu0  ;;  %v5083_v39 = vpop.xlane.xlu0 %5082  ;;  %v4725_v17 = vpack.c.bf16 %v4724_v9, %v4723_v53  ;;  %v4846_v38 = vmul.f32 %v7708_v60, %v9314_v1 }
 0x6af   : > { %2286 = vrot.lane.b32.xlu1 %v2147_v43, %s10186_s22  ;;  %v7710_v51 = vpop.eup %7709  ;;  %s10289_s22 = smov 80  }
 0x6b0   : > { %v4845_v19 = vmul.f32 %v7710_v51, %v9301_v63  ;;  %v7403_v63 = vld [vmem:[%s10147_s5 + $0x40] ss:$8 sps:$4 sm:$0xff]  }
 0x6b1   : > { %7183 = vmatmul.mubr.msk.bf16.vlgmr.msra.gmra.mxu0 %vm498_vm0, %v4603_v54 }
 0x6b2   : > { %7193 = vmatpush3.bf16.msra.mxu0 %v9467_v55  ;;  %7194 = vmatprep.mubr.msk.bf16.mxu0 %vm7900_vm1, %v10247_v47  ;;  %v7396_v55 = vld [vmem:[%s10147_s5 + $0x74] ss:$8 sps:$4 sm:$0xff]   ;;  %v5086_v18 = vpop.xlane.xlu0 %5085  ;;  %v4847_v26 = vpack.c.bf16 %v4846_v38, %v4845_v19 }
 0x6b3   : > { %7204 = vmatprep.subr.bf16.mxu0 %v10247_v47  ;;  %5557 = vmatprep.subr.bf16.mxu1 %v7396_v55  ;;  %7715 = vrcp.f32 %v5086_v18 }
 0x6b4   : > { %5558 = vmatpush1.bf16.msra.mxu1 %v7394_v34  ;;  %7717 = vrcp.f32 %v5083_v39 }
 0x6b5   : > { %5559 = vmatprep.subr.bf16.mxu1 %v7399_v12 }
 0x6b6   : > { %v5205_v50 = vpop.xlane.xlu1 %5204 }
 0x6b8   : > { %5560 = vmatpush1.bf16.msra.mxu1 %v7397_v33 }
 0x6b9   : > { %7195 = vmatmul.mubr.msk.bf16.vlgmr.msra.gmra.mxu0 %vm498_vm0, %v4725_v17  ;;  %5561 = vmatprep.subr.bf16.mxu1 %v7402_v29  ;;  %v7712_v1 = vpop.eup %7711 }
 0x6ba   : > { %v4849_v41 = vpop.permute.xlu1 %4848  ;;  %7206 = vmatprep.mubr.msk.bf16.mxu0 %vm7900_vm1, %v10247_v47  ;;  %v7714_v16 = vpop.eup %7713  ;;  %v4968_v40 = vmul.f32 %v7712_v1, %v9329_v13 }
 0x6bb   : > { %7205 = vmatpush3.bf16.msra.mxu0 %v4849_v41  ;;  %v4967_v10 = vmul.f32 %v7714_v16, %v9318_v32 }
 0x6bc   : > { %7216 = vmatprep.subr.bf16.mxu0 %v10247_v47  ;;  %5562 = vmatpush1.bf16.msra.mxu1 %v7400_v4 }
 0x6bd   : > { %5563 = vmatprep.subr.bf16.mxu1 %v7405_v23  ;;  %v4969_v0 = vpack.c.bf16 %v4968_v40, %v4967_v10 }
 0x6be   : > { %v5208_v5 = vpop.xlane.xlu0 %5207 }
 0x6bf   : > { %7719 = vrcp.f32 %v5208_v5 }
 0x6c0   : > { %7721 = vrcp.f32 %v5205_v50  ;;  %5564 = vmatpush1.bf16.msra.mxu1 %v7403_v63  ;;  %v7716_v13 = vpop.eup %7715 }
 0x6c1   : > { %7207 = vmatmul.mubr.msk.bf16.vlgmr.msra.gmra.mxu0 %vm498_vm0, %v4847_v26  ;;  %5565 = vmatprep.subr.bf16.mxu1 %v7408_v28  ;;  %v7718_v30 = vpop.eup %7717  ;;  %v5090_v46 = vmul.f32 %v7716_v13, %v9341_v14  ;;  %v7412_v14 = vld [vmem:[%s10147_s5 + $0x10] ss:$8 sps:$4 sm:$0xff]  }
 0x6c2   : > { %v9535_v11 = vpop.xlane.xlu0 %5326  ;;  %7218 = vmatprep.mubr.msk.bf16.mxu0 %vm7900_vm1, %v10247_v47  ;;  %v5089_v7 = vmul.f32 %v7718_v30, %v9337_v37  ;;  %v7417_v37 = vld [vmem:[%s10147_s5 + $0x4] ss:$8 sps:$4 sm:$0xff]  }
 0x6c3   : > { %7723 = vrcp.f32 %v9535_v11 }
 0x6c4   : > { %5566 = vmatpush1.bf16.msra.mxu1 %v7406_v27  ;;  %v5091_v22 = vpack.c.bf16 %v5090_v46, %v5089_v7 }
 0x6c5   : > { %5567 = vmatprep.subr.bf16.mxu1 %v7411_v57 }
 0x6c6   : > { %v4971_v2 = vpop.permute.xlu0 %4970 }
 0x6c7   : > { %7217 = vmatpush3.bf16.msra.mxu0 %v4971_v2 }
 0x6c8   : > { %7228 = vmatprep.subr.bf16.mxu0 %v10247_v47  ;;  %5568 = vmatpush1.bf16.msra.mxu1 %v7409_v56 }
 0x6c9   : > { %5569 = vmatprep.subr.bf16.mxu1 %v7414_v52 }
 0x6ca   : > { %7219 = vmatmul.mubr.msk.bf16.vlgmr.msra.gmra.mxu0 %vm498_vm0, %v4969_v0  ;;  %v5093_v32 = vpop.permute.xlu0 %5092 }
 0x6cb   : > { %7229 = vmatpush3.bf16.msra.mxu0 %v5093_v32  ;;  %7230 = vmatprep.mubr.msk.bf16.mxu0 %vm7900_vm1, %v10247_v47 }
 0x6cc   : > { %7240 = vmatprep.subr.bf16.mxu0 %v10247_v47  ;;  %v7720_v58 = vpop.eup %7719  ;;  %5570 = vmatpush1.bf16.msra.mxu1 %v7412_v14 }
 0x6cd   : > { %v7722_v48 = vpop.eup %7721  ;;  %v5212_v24 = vmul.f32 %v7720_v58, %v9367_v61  ;;  %5571 = vmatprep.subr.bf16.mxu1 %v7417_v37  ;;  %v10284_v61 = vmov 0  }
 0x6ce   : > { %v5215_v45 = vpop.permute.xlu0 %5214  ;;  %v5211_v15 = vmul.f32 %v7722_v48, %v9353_v59 }
 0x6d0   : > { %v5213_v54 = vpack.c.bf16 %v5212_v24, %v5211_v15  ;;  %5572 = vmatpush1.bf16.msra.mxu1 %v7415_v49  ;;  %v7724_v41 = vpop.eup %7723 }
 0x6d1   : > { %v2262_v31 = vpop.f32.mrf.mxu0  ;;  %v5333_v19 = vmul.f32 %v7724_v41, %v9376_v3 }
 0x6d2   : > { %7231 = vmatmul.mubr.msk.bf16.vlgmr.msra.gmra.mxu0 %vm498_vm0, %v5091_v22  ;;  %v5337_v35 = vpop.permute.xlu0 %5336 }
 0x6d3   : > { %v6968_v42 = vpop.f32.mrf.mxu0  ;;  %7241 = vmatpush3.bf16.msra.mxu0 %v5215_v45  ;;  %7242 = vmatprep.mubr.msk.bf16.mxu0 %vm7900_vm1, %v10247_v47 }
 0x6d4   : > { %7252 = vmatprep.subr.bf16.mxu0 %v10247_v47 }
 0x6d5   : > { %v2265_v8 = vpop.f32.mrf.mxu0 }
 0x6d6   : > { %v2269_v43 = vpack.c.bf16 %v2265_v8, %v2262_v31 }
 0x6d7   : > { %v6969_v36 = vpop.f32.mrf.mxu0 }
 0x6d8   : > { %2289 = vrot.lane.b32.xlu0 %v2269_v43, %s7901_s17 }
 0x6da   : > { %7243 = vmatmul.mubr.msk.bf16.vlgmr.msra.gmra.mxu0 %vm498_vm0, %v5213_v54 }
 0x6db   : > { %7253 = vmatpush3.bf16.msra.mxu0 %v5337_v35  ;;  %7254 = vmatprep.mubr.msk.bf16.mxu0 %vm7900_vm1, %v10247_v47 }
 0x6dc   : > { %5989 = vmatprep.subr.bf16.mxu0 %v10284_v61 }
 0x6dd   : > { %v9589_v6 = vpop.f32.mrf.mxu0 }
 0x6df   : > { %v6980_v44 = vpop.f32.mrf.mxu0 }
 0x6e1   : > { %v9591_v53 = vpop.f32.mrf.mxu0 }
 0x6e2   : > { %v2457_v59 = vpack.c.bf16 %v9591_v53, %v9589_v6 }
 0x6e3   : > { %v6981_v39 = vpop.f32.mrf.mxu0 }
 0x6e5   : > { %v2572_v9 = vpop.f32.mrf.mxu0 }
 0x6e7   : > { %v6992_v50 = vpop.f32.mrf.mxu0 }
 0x6e9   : > { %v2575_v17 = vpop.f32.mrf.mxu0 }
 0x6ea   : > { %v2579_v34 = vpack.c.bf16 %v2575_v17, %v2572_v9 }
 0x6eb   : > { %v6993_v55 = vpop.f32.mrf.mxu0  ;;  %v5330_v60 = vpop.xlane.xlu1 %5329 }
 0x6ec   : > { %7725 = vrcp.f32 %v5330_v60  ;;  %3313 = vrot.lane.b32.xlu1 %v2579_v34, %s10285_s23 }
 0x6f1   : > { %v2694_v47 = vpop.f32.mrf.mxu0 }
 0x6f3   : > { %v7004_v12 = vpop.f32.mrf.mxu0 }
 0x6f5   : > { %v2697_v18 = vpop.f32.mrf.mxu0  ;;  %v2272_v17 = vpop.permute.xlu1 %2271 }
 0x6f6   : > { %v2701_v51 = vpack.c.bf16 %v2697_v18, %v2694_v47  ;;  %v2293_v60 = vsel %vm498_vm0, %v1415_v21, %v2272_v17 }
 0x6f7   : > { %v7005_v33 = vpop.f32.mrf.mxu0 }
 0x6f8   : > { %3316 = vrot.lane.b32.xlu0 %v2701_v51, %s10286_s15 }
 0x6f9   : > { %v7726_v38 = vpop.eup %7725  ;;  %v2816_v29 = vpop.f32.mrf.mxu0 }
 0x6fa   : > { %v5334_v5 = vmul.f32 %v7726_v38, %v9426_v62 }
 0x6fb   : > { %v7016_v4 = vpop.f32.mrf.mxu0 }
 0x6fc   : > { %v5335_v26 = vpack.c.bf16 %v5334_v5, %v5333_v19 }
 0x6fd   : > { %v2819_v1 = vpop.f32.mrf.mxu0  ;;  %v2275_v39 = vpop.permute.xlu0 %2274 }
 0x6fe   : > { %v2823_v11 = vpack.c.bf16 %v2819_v1, %v2816_v29  ;;  %7255 = vmatmul.mubr.msk.bf16.vlgmr.msra.gmra.mxu0 %vm498_vm0, %v5335_v26  ;;  %v2296_v12 = vsel %vm2294_vm2, %v2293_v60, %v2275_v39 }
 0x6ff   : > { %v7017_v16 = vpop.f32.mrf.mxu0 }
 0x700   : > { %3319 = vrot.lane.b32.xlu1 %v2823_v11, %s10287_s16 }
 0x701   : > { %v2938_v63 = vpop.f32.mrf.mxu0 }
 0x703   : > { %v7028_v23 = vpop.f32.mrf.mxu0 }
 0x705   : > { %v2941_v40 = vpop.f32.mrf.mxu0  ;;  %v2278_v9 = vpop.permute.xlu0 %2277 }
 0x706   : > { %v2945_v10 = vpack.c.bf16 %v2941_v40, %v2938_v63  ;;  %v2299_v41 = vsel %vm2297_vm3, %v2296_v12, %v2278_v9 }
 0x707   : > { %v7029_v2 = vpop.f32.mrf.mxu0 }
 0x708   : > { %3322 = vrot.lane.b32.xlu0 %v2945_v10, %s10288_s20 }
 0x709   : > { %v3060_v27 = vpop.f32.mrf.mxu0 }
 0x70b   : > { %v7040_v3 = vpop.f32.mrf.mxu0 }
 0x70d   : > { %v3063_v28 = vpop.f32.mrf.mxu0 }
 0x70e   : > { %v3067_v62 = vpack.c.bf16 %v3063_v28, %v3060_v27  ;;  %v2281_v34 = vpop.permute.xlu0 %2280 }
 0x70f   : > { %v7041_v0 = vpop.f32.mrf.mxu0  ;;  %v2302_v29 = vsel %vm2300_vm4, %v2299_v41, %v2281_v34 }
 0x710   : > { %3325 = vrot.lane.b32.xlu1 %v3067_v62, %s10289_s22 }
 0x711   : > { %v3182_v13 = vpop.f32.mrf.mxu0 }
 0x713   : > { %v7052_v32 = vpop.f32.mrf.mxu0 }
 0x715   : > { %v3185_v30 = vpop.f32.mrf.mxu0 }
 0x716   : > { %v3189_v46 = vpack.c.bf16 %v3185_v30, %v3182_v13 }
 0x717   : > { %v7053_v57 = vpop.f32.mrf.mxu0 }
 0x718   : > { %3328 = vrot.lane.b32.xlu0 %v3189_v46, %s10290_s27 }
 0x719   : > { %v3304_v56 = vpop.f32.mrf.mxu0  ;;  %v2284_v18 = vpop.permute.xlu0 %2283 }
 0x71a   : > { %v2305_v20 = vsel %vm2303_vm5, %v2302_v29, %v2284_v18 }
 0x71b   : > { %v7064_v7 = vpop.f32.mrf.mxu0 }
 0x71d   : > { %v3307_v52 = vpop.f32.mrf.mxu0 }
 0x71e   : > { %v3311_v22 = vpack.c.bf16 %v3307_v52, %v3304_v56 }
 0x71f   : > { %v7065_v14 = vpop.f32.mrf.mxu0 }
 0x720   : > { %3331 = vrot.lane.b32.xlu1 %v3311_v22, %s7901_s17 }
 0x721   : > { %v9606_v58 = vpop.f32.mrf.mxu0  ;;  %v2287_v33 = vpop.permute.xlu1 %2286 }
 0x722   : > { %v2308_v21 = vsel %vm2306_vm6, %v2305_v20, %v2287_v33 }
 0x723   : > { %v7076_v31 = vpop.f32.mrf.mxu0 }
 0x725   : > { %v9608_v45 = vpop.f32.mrf.mxu0 }
 0x726   : > { %v3493_v48 = vpack.c.bf16 %v9608_v45, %v9606_v58 }
 0x727   : > { %v7077_v42 = vpop.f32.mrf.mxu0 }
 0x729   : > { %v3608_v37 = vpop.f32.mrf.mxu0 }
 0x72b   : > { %v7088_v24 = vpop.f32.mrf.mxu0 }
 0x72d   : > { %v3611_v49 = vpop.f32.mrf.mxu0 }
 0x72e   : > { %v3615_v8 = vpack.c.bf16 %v3611_v49, %v3608_v37 }
 0x72f   : > { %v7089_v15 = vpop.f32.mrf.mxu0 }
 0x730   : > { %4349 = vrot.lane.b32.xlu0 %v3615_v8, %s10285_s23 }
 0x731   : > { %v3730_v43 = vpop.f32.mrf.mxu0 }
 0x733   : > { %v7100_v36 = vpop.f32.mrf.mxu0 }
 0x735   : > { %v3733_v54 = vpop.f32.mrf.mxu0 }
 0x736   : > { %v3737_v35 = vpack.c.bf16 %v3733_v54, %v3730_v43 }
 0x737   : > { %v7101_v44 = vpop.f32.mrf.mxu0 }
 0x738   : > { %4352 = vrot.lane.b32.xlu1 %v3737_v35, %s10286_s15 }
 0x741   : > { %v3852_v50 = vpop.f32.mrf.mxu0 }
 0x743   : > { %v7112_v55 = vpop.f32.mrf.mxu0 }
 0x745   : > { %v3855_v47 = vpop.f32.mrf.mxu0 }
 0x746   : > { %v3859_v51 = vpack.c.bf16 %v3855_v47, %v3852_v50 }
 0x747   : > { %v7113_v38 = vpop.f32.mrf.mxu0 }
 0x748   : > { %4355 = vrot.lane.b32.xlu0 %v3859_v51, %s10287_s16 }
 0x749   : > { %v3974_v25 = vpop.f32.mrf.mxu0 }
 0x74a   : > { %v2290_v19 = vpop.permute.xlu0 %2289 }
 0x74b   : > { %v2311_v5 = vsel %vm2309_vm7, %v2308_v21, %v2290_v19  ;;  %v7124_v4 = vpop.f32.mrf.mxu0 }
 0x74c   : > { %v6495_v26 = vcombine.low %v2311_v5, %v2311_v5  ;;  %v6496_v1 = vcombine.high %v2311_v5, %v2311_v5 }
 0x74d   : > { %v3977_v11 = vpop.f32.mrf.mxu0 }
 0x74e   : > { %2319 = vst [vmem:[#allocation3] sm:$0xf] %v6495_v26  ;;  %2320 = vst [vmem:[#allocation3 + $0x4] sm:$0xf] %v6496_v1  ;;  %v3981_v16 = vpack.c.bf16 %v3977_v11, %v3974_v25 }
 0x74f   : > { %v7125_v63 = vpop.f32.mrf.mxu0 }
 0x750   : > { %4358 = vrot.lane.b32.xlu1 %v3981_v16, %s10288_s20 }
 0x751   : > { %v4096_v23 = vpop.f32.mrf.mxu0 }
 0x753   : > { %v7136_v40 = vpop.f32.mrf.mxu0 }
 0x755   : > { %v4099_v10 = vpop.f32.mrf.mxu0  ;;  %v7418_v2 = vld [vmem:[#allocation3] sm:$0xff]  }
 0x756   : > { %v4103_v27 = vpack.c.bf16 %v4099_v10, %v4096_v23  ;;  %5590 = vmatmul.mubr.bf16.vlgmr.msra.gmra.mxu1 %v7418_v2 }
 0x757   : > { %v7137_v3 = vpop.f32.mrf.mxu0  ;;  %5599 = vmatprep.mubr.bf16.mxu1 %v10284_v61 }
 0x758   : > { %4361 = vrot.lane.b32.xlu0 %v4103_v27, %s10289_s22 }
 0x759   : > { %v4218_v28 = vpop.f32.mrf.mxu0 }
 0x75b   : > { %v7148_v62 = vpop.f32.mrf.mxu0 }
 0x75d   : > { %v4221_v0 = vpop.f32.mrf.mxu0 }
 0x75e   : > { %v4225_v13 = vpack.c.bf16 %v4221_v0, %v4218_v28  ;;  %v3314_v17 = vpop.permute.xlu1 %3313 }
 0x75f   : > { %v7149_v32 = vpop.f32.mrf.mxu0  ;;  %v3335_v41 = vsel %vm498_vm0, %v2457_v59, %v3314_v17  ;;  %v10291_v17 = vld [vmem:[#allocation17_spill] sm:$0xff] }
 0x760   : > { %4364 = vrot.lane.b32.xlu1 %v4225_v13, %s10290_s27 }
 0x761   : > { %v4340_v30 = vpop.f32.mrf.mxu0 }
 0x763   : > { %v7160_v46 = vpop.f32.mrf.mxu0 }
 0x765   : > { %v4343_v57 = vpop.f32.mrf.mxu0 }
 0x766   : > { %v4347_v56 = vpack.c.bf16 %v4343_v57, %v4340_v30 }
 0x767   : > { %v7161_v7 = vpop.f32.mrf.mxu0 }
 0x768   : > { %4367 = vrot.lane.b32.xlu0 %v4347_v56, %s7901_s17 }
 0x769   : > { %v9630_v52 = vpop.f32.mrf.mxu0 }
 0x76a   : > { %v3317_v55 = vpop.permute.xlu0 %3316 }
 0x76b   : > { %v7172_v22 = vpop.f32.mrf.mxu0  ;;  %v3337_v33 = vsel %vm2294_vm2, %v3335_v41, %v3317_v55 }
 0x76d   : > { %v9632_v14 = vpop.f32.mrf.mxu0 }
 0x76e   : > { %v4529_v31 = vpack.c.bf16 %v9632_v14, %v9630_v52 }
 0x76f   : > { %v7173_v42 = vpop.f32.mrf.mxu0 }
 0x771   : > { %v4644_v37 = vpop.f32.mrf.mxu0 }
 0x772   : > { %v3320_v47 = vpop.permute.xlu1 %3319 }
 0x773   : > { %v7184_v24 = vpop.f32.mrf.mxu0  ;;  %v3339_v20 = vsel %vm2297_vm3, %v3337_v33, %v3320_v47  ;;  %v5633_v33 = vld [vmem:[%s8089_s21 + $0x18] sm:$0xff] }
 0x775   : > { %v4647_v49 = vpop.f32.mrf.mxu0 }
 0x776   : > { %v4651_v8 = vpack.c.bf16 %v4647_v49, %v4644_v37 }
 0x777   : > { %v7185_v15 = vpop.f32.mrf.mxu0 }
 0x778   : > { %5385 = vrot.lane.b32.xlu1 %v4651_v8, %s10285_s23 }
 0x779   : > { %v4766_v43 = vpop.f32.mrf.mxu0 }
 0x77a   : > { %v3323_v18 = vpop.permute.xlu0 %3322 }
 0x77b   : > { %v7196_v36 = vpop.f32.mrf.mxu0  ;;  %v3341_v19 = vsel %vm2300_vm4, %v3339_v20, %v3323_v18 }
 0x77d   : > { %v4769_v54 = vpop.f32.mrf.mxu0 }
 0x77e   : > { %v4773_v35 = vpack.c.bf16 %v4769_v54, %v4766_v43 }
 0x77f   : > { %v7197_v44 = vpop.f32.mrf.mxu0 }
 0x780   : > { %5388 = vrot.lane.b32.xlu0 %v4773_v35, %s10286_s15  ;;  %v5630_v44 = vld [vmem:[%s8089_s21] sm:$0xff]  ;;  %s471_s15 = sand.u32 1, %s7883_s26  }
 0x781   : > { %v4888_v39 = vpop.f32.mrf.mxu0 }
 0x782   : > { %v3326_v38 = vpop.permute.xlu1 %3325 }
 0x783   : > { %v7208_v9 = vpop.f32.mrf.mxu0  ;;  %v3343_v4 = vsel %vm2303_vm5, %v3341_v19, %v3326_v38 }
 0x785   : > { %v4891_v50 = vpop.f32.mrf.mxu0 }
 0x786   : > { %v4895_v34 = vpack.c.bf16 %v4891_v50, %v4888_v39  ;;  %v5662_v39 = vld [vmem:[%s10148_s6] sm:$0x3]  ;;  %v5631_v50 = vld [vmem:[%s8089_s21 + $0x8] sm:$0xff] }
 0x787   : > { %v7209_v60 = vpop.f32.mrf.mxu0 }
 0x788   : > { %5391 = vrot.lane.b32.xlu1 %v4895_v34, %s10287_s16  ;;  %v9671_v34 = vrot.slane %v5662_v39, %v10291_v17  ;;  %v10292_v60 = vld [vmem:[#allocation16_spill] sm:$0xff] }
 0x789   : > { %v9674_v47 = vrot.slane %v5662_v39, %v10292_v60  ;;  %v5639_v39 = vld [vmem:[%s8089_s21 + $0x48] sm:$0xff] }
 0x78a   : > { %v5010_v12 = vpop.f32.mrf.mxu0  ;;  %v3329_v25 = vpop.permute.xlu0 %3328 }
 0x78b   : > { %v3345_v26 = vsel %vm2306_vm6, %v3343_v4, %v3329_v25 }
 0x78c   : > { %v7220_v51 = vpop.f32.mrf.mxu0 }
 0x78d   : > { %v5632_v51 = vld [vmem:[%s8089_s21 + $0x10] sm:$0xff] }
 0x78e   : > { %v5013_v29 = vpop.f32.mrf.mxu0 }
 0x78f   : > { %v5017_v21 = vpack.c.bf16 %v5013_v29, %v5010_v12 }
 0x790   : > { %v7221_v5 = vpop.f32.mrf.mxu0 }
 0x791   : > { %5394 = vrot.lane.b32.xlu0 %v5017_v21, %s10288_s20 }
 0x792   : > { %v3332_v6 = vpop.permute.xlu1 %3331  ;;  %v5132_v53 = vpop.f32.mrf.mxu0 }
 0x793   : > { %v3347_v59 = vsel %vm2309_vm7, %v3345_v26, %v3332_v6 }
 0x794   : > { %v6516_v1 = vcombine.low %v3347_v59, %v3347_v59  ;;  %v6517_v11 = vcombine.high %v3347_v59, %v3347_v59  ;;  %v7232_v16 = vpop.f32.mrf.mxu0 }
 0x796   : > { %3355 = vst [vmem:[#allocation3 + $0x8] sm:$0xf] %v6516_v1  ;;  %3356 = vst [vmem:[#allocation3 + $0xc] sm:$0xf] %v6517_v11  ;;  %v5135_v63 = vpop.f32.mrf.mxu0 }
 0x797   : > { %v5139_v23 = vpack.c.bf16 %v5135_v63, %v5132_v53 }
 0x798   : > { %v7233_v40 = vpop.f32.mrf.mxu0 }
 0x799   : > { %5397 = vrot.lane.b32.xlu1 %v5139_v23, %s10289_s22  ;;  %s6412_s22 = sshll.u32 %s471_s15, 7 }
 0x79a   : > { %v5254_v10 = vpop.f32.mrf.mxu0 }
 0x79c   : > { %v7244_v2 = vpop.f32.mrf.mxu0 }
 0x79d   : > { %v7419_v27 = vld [vmem:[#allocation3 + $0x8] sm:$0xff]  }
 0x79e   : > { %v5257_v3 = vpop.f32.mrf.mxu0  ;;  %5600 = vmatmul.mubr.bf16.gmra.mxu1 %v7419_v27 }
 0x79f   : > { %v5261_v28 = vpack.c.bf16 %v5257_v3, %v5254_v10  ;;  %5609 = vmatprep.mubr.bf16.mxu1 %v10284_v61 }
 0x7a0   : > { %v7245_v62 = vpop.f32.mrf.mxu0 }
 0x7a1   : > { %5400 = vrot.lane.b32.xlu0 %v5261_v28, %s10290_s27  ;;  %s10035_s27 = scalar_lea.vmem [#allocation10], %s6412_s22  ;;  %s7908_s22 = smov [#allocation10]  }
 0x7a2   : > { %v4350_v57 = vpop.permute.xlu0 %4349  ;;  %s6309_s24 = sshll.u32 %s10035_s27, 4  ;;  %s10095_s24 = int_to_ptr.vmem [resolvable:$true] %s6309_s24 }
 0x7a3   : > { %v4371_v42 = vsel %vm498_vm0, %v3493_v48, %v4350_v57  ;;  %s7823_s20 = scalar_lea.vmem %s10095_s24, 2048 }
 0x7a4   : > { %p7824_p12 = scmp.ne.s32.totalorder %s10095_s24, %s7823_s20 }
 0x7a6   : > { %p7825_p9 = pnand %p7824_p12, %p10293_p2 }
 0x7a8   : > { %p7826_p3 = pneg %p7825_p9 }
 0x7aa   : > { %v4353_v56 = vpop.permute.xlu1 %4352 }
 0x7ab   : > { %v4373_v37 = vsel %vm2294_vm2, %v4371_v42, %v4353_v56  ;;  %v5637_v42 = vld [vmem:[%s8089_s21 + $0x38] sm:$0xff] }
 0x7ba   : > { %v4356_v7 = vpop.permute.xlu0 %4355 }
 0x7bb   : > { %v4375_v49 = vsel %vm2297_vm3, %v4373_v37, %v4356_v7  ;;  %v5636_v7 = vld [vmem:[%s8089_s21 + $0x30] sm:$0xff] }
 0x7be   : > { %v5376_v0 = vpop.f32.mrf.mxu0 }
 0x7c0   : > { %v7256_v13 = vpop.f32.mrf.mxu0 }
 0x7c1   : > { %v5634_v13 = vld [vmem:[%s8089_s21 + $0x20] sm:$0xff] }
 0x7c2   : > { %v5379_v32 = vpop.f32.mrf.mxu0  ;;  %v4359_v22 = vpop.permute.xlu1 %4358 }
 0x7c3   : > { %v5383_v30 = vpack.c.bf16 %v5379_v32, %v5376_v0  ;;  %v4377_v15 = vsel %vm2300_vm4, %v4375_v49, %v4359_v22 }
 0x7c4   : > { %v7257_v46 = vpop.f32.mrf.mxu0 }
 0x7c5   : > { %5403 = vrot.lane.b32.xlu1 %v5383_v30, %s7901_s17  ;;  %v5635_v30 = vld [vmem:[%s8089_s21 + $0x28] sm:$0xff]  ;;  %s6640_s17 = sshll.u32 %s8001_s29, 11  ;;  %s10101_s29 = scalar_lea.sflag [#allocation6], %s471_s15 }
 0x7c6   : > { %s10091_s16 = scalar_lea.hbm %s10155_s13, %s6640_s17  ;;  %s7827_s17 = sshll.u32 %s7908_s22, 4  ;;  %s7828_s17 = int_to_ptr.vmem [resolvable:$false] %s7827_s17 }
 0x7c7   : > { %p7830_p4 = scmp.lt.s32.totalorder %s10095_s24, %s7828_s17 }
 0x7ca   : > { %v4362_v24 = vpop.permute.xlu0 %4361 }
 0x7cb   : > { %v4379_v43 = vsel %vm2303_vm5, %v4377_v15, %v4362_v24 }
 0x7d2   : > { %v4365_v8 = vpop.permute.xlu1 %4364 }
 0x7d3   : > { %v4381_v36 = vsel %vm2306_vm6, %v4379_v43, %v4365_v8 }
 0x7da   : > { %v4368_v54 = vpop.permute.xlu0 %4367 }
 0x7db   : > { %v4383_v35 = vsel %vm2309_vm7, %v4381_v36, %v4368_v54 }
 0x7dc   : > { %v6537_v58 = vcombine.low %v4383_v35, %v4383_v35  ;;  %v6538_v45 = vcombine.high %v4383_v35, %v4383_v35 }
 0x7de   : > { %4391 = vst [vmem:[#allocation3 + $0x10] sm:$0xf] %v6537_v58  ;;  %4392 = vst [vmem:[#allocation3 + $0x14] sm:$0xf] %v6538_v45 }
 0x7e5   : > { %v7420_v48 = vld [vmem:[#allocation3 + $0x10] sm:$0xff]  }
 0x7e6   : > { %5610 = vmatmul.mubr.bf16.gmra.mxu1 %v7420_v48  ;;  %v5638_v48 = vld [vmem:[%s8089_s21 + $0x40] sm:$0xff] }
 0x7e7   : > { %5619 = vmatprep.mubr.bf16.mxu1 %v10284_v61 }
 0x7ea   : > { %v5386_v59 = vpop.permute.xlu1 %5385 }
 0x7eb   : > { %v5407_v63 = vsel %vm498_vm0, %v4529_v31, %v5386_v59 }
 0x7f2   : > { %v5389_v1 = vpop.permute.xlu0 %5388 }
 0x7f3   : > { %v5409_v23 = vsel %vm2294_vm2, %v5407_v63, %v5389_v1 }
 0x7fa   : > { %v5392_v11 = vpop.permute.xlu1 %5391 }
 0x7fb   : > { %v5411_v10 = vsel %vm2297_vm3, %v5409_v23, %v5392_v11 }
 0x803   : > { %v5395_v16 = vpop.permute.xlu0 %5394 }
 0x804   : > { %v5413_v27 = vsel %vm2300_vm4, %v5411_v10, %v5395_v16 }
 0x80b   : > { %v5398_v40 = vpop.permute.xlu1 %5397 }
 0x80c   : > { %v5415_v3 = vsel %vm2303_vm5, %v5413_v27, %v5398_v40  ;;  %v5642_v40 = vld [vmem:[%s8089_s21 + $0x60] sm:$0xff]  ;;  %v5643_v27 = vld [vmem:[%s8089_s21 + $0x68] sm:$0xff] }
 0x813   : > { %v5401_v2 = vpop.permute.xlu0 %5400 }
 0x814   : > { %v5417_v28 = vsel %vm2306_vm6, %v5415_v3, %v5401_v2 }
 0x816   : > { %v5591_v9 = vpop.f32.mrf.mxu1 }
 0x817   : > { %v5646_v55 = vadd.f32 %v5630_v44, %v5591_v9 }
 0x818   : > { %v5593_v12 = vpop.f32.mrf.mxu1 }
 0x819   : > { %v5647_v18 = vadd.f32 %v5631_v50, %v5593_v12  ;;  %v9682_v29 = vadd.f32 %v9674_v47, %v5646_v55  ;;  %v5640_v12 = vld [vmem:[%s8089_s21 + $0x50] sm:$0xff] }
 0x81a   : > { %v5595_v41 = vpop.f32.mrf.mxu1 }
 0x81b   : > { %v9679_v38 = vadd.f32 %v9671_v34, %v5647_v18  ;;  %v5648_v20 = vadd.f32 %v5632_v51, %v5595_v41  ;;  %v5641_v51 = vld [vmem:[%s8089_s21 + $0x58] sm:$0xff] }
 0x81c   : > { %v5597_v25 = vpop.f32.mrf.mxu1 }
 0x81d   : > { %v5649_v21 = vadd.f32 %v5633_v33, %v5597_v25  ;;  %v5692_v19 = vsel %vm498_vm0, %v9679_v38, 0.0  ;;  %v9691_v26 = vadd.f32 %v9674_v47, %v5648_v20 }
 0x81e   : > { %v5693_v5 = vadd.f32 %v5692_v19, %v9682_v29 }
 0x81f   : > { %v9688_v4 = vadd.f32 %v9671_v34, %v5649_v21 }
 0x820   : > { %5694 = vadd.xlane.f32.xlu0 %v5693_v5 }
 0x821   : > { %v5696_v6 = vsel %vm498_vm0, %v9688_v4, 0.0 }
 0x822   : > { %v5697_v53 = vadd.f32 %v5696_v6, %v9691_v26 }
 0x824   : > { %5698 = vadd.xlane.f32.xlu1 %v5697_v53 }
 0x837   : > { %v5404_v62 = vpop.permute.xlu1 %5403 }
 0x838   : > { %v5419_v52 = vsel %vm2309_vm7, %v5417_v28, %v5404_v62 }
 0x839   : > { %v6558_v14 = vcombine.low %v5419_v52, %v5419_v52  ;;  %v6559_v31 = vcombine.high %v5419_v52, %v5419_v52 }
 0x83b   : > { %5427 = vst [vmem:[#allocation3 + $0x18] sm:$0xf] %v6558_v14  ;;  %5428 = vst [vmem:[#allocation3 + $0x1c] sm:$0xf] %v6559_v31 }
 0x842   : > { %v7421_v0 = vld [vmem:[#allocation3 + $0x18] sm:$0xff]  }
 0x843   : > { %5620 = vmatmul.mubr.bf16.gmra.mxu1 %v7421_v0 }
 0x844   : > { %6194 = vmatprep.mubr.bf16.mxu1 %v10284_v61 }
 0x85e   : > { %v5601_v32 = vpop.f32.mrf.mxu1 }
 0x85f   : > { %v5650_v46 = vadd.f32 %v5634_v13, %v5601_v32  ;;  %v5644_v13 = vld [vmem:[%s8089_s21 + $0x70] sm:$0xff] }
 0x860   : > { %v5603_v57 = vpop.f32.mrf.mxu1 }
 0x861   : > { %v5651_v56 = vadd.f32 %v5635_v30, %v5603_v57  ;;  %v9715_v24 = vadd.f32 %v9674_v47, %v5650_v46  ;;  %v5645_v46 = vld [vmem:[%s8089_s21 + $0x78] sm:$0xff]  ;;  %s7829_s21 = scalar_lea.vmem %s7828_s17, 4096 }
 0x862   : > { %v5605_v22 = vpop.f32.mrf.mxu1  ;;  %p7831_p5 = scmp.lt.s32.totalorder %s7829_s21, %s7823_s20 }
 0x863   : > { %v9712_v37 = vadd.f32 %v9671_v34, %v5651_v56  ;;  %v5652_v49 = vadd.f32 %v5636_v7, %v5605_v22 }
 0x864   : > { %v5607_v8 = vpop.f32.mrf.mxu1  ;;  %p7832_p6 = por %p7831_p5, %p7830_p4 }
 0x865   : > { %v5653_v15 = vadd.f32 %v5637_v42, %v5607_v8  ;;  %v5700_v43 = vsel %vm498_vm0, %v9712_v37, 0.0  ;;  %v9724_v35 = vadd.f32 %v9674_v47, %v5652_v49 }
 0x866   : > { %v5701_v36 = vadd.f32 %v5700_v43, %v9715_v24  ;;  %p7833_p10 = pnand %p7832_p6, %p7826_p3 }
 0x867   : > { %v9721_v54 = vadd.f32 %v9671_v34, %v5653_v15 }
 0x868   : > { %5702 = vadd.xlane.f32.xlu0 %v5701_v36 }
 0x869   : > { %v5704_v58 = vsel %vm498_vm0, %v9721_v54, 0.0 }
 0x86a   : > { %v5705_v45 = vadd.f32 %v5704_v58, %v9724_v35 }
 0x86c   : > { %5706 = vadd.xlane.f32.xlu0 %v5705_v45 }
 0x8a6   : > { %v5611_v44 = vpop.f32.mrf.mxu1 }
 0x8a7   : > { %v5654_v9 = vadd.f32 %v5638_v48, %v5611_v44 }
 0x8a8   : > { %v5613_v50 = vpop.f32.mrf.mxu1 }
 0x8a9   : > { %v5655_v55 = vadd.f32 %v5639_v39, %v5613_v50  ;;  %v9737_v33 = vadd.f32 %v9674_v47, %v5654_v9  ;;  %v5695_v11 = vpop.xlane.xlu0 %5694 }
 0x8aa   : > { %v5615_v18 = vpop.f32.mrf.mxu1  ;;  %v5724_v16 = vmul.f32 0.0069444445, %v5695_v11 }
 0x8ab   : > { %v9734_v41 = vadd.f32 %v9671_v34, %v5655_v55  ;;  %v5656_v20 = vadd.f32 %v5640_v12, %v5615_v18 }
 0x8ac   : > { %v5617_v25 = vpop.f32.mrf.mxu1  ;;  %v9753_v10 = vsub.f32 %v9679_v38, %v5724_v16  ;;  %v9757_v31 = vsub.f32 %v9682_v29, %v5724_v16 }
 0x8ad   : > { %v5657_v21 = vadd.f32 %v5641_v51, %v5617_v25  ;;  %v5708_v19 = vsel %vm498_vm0, %v9734_v41, 0.0  ;;  %v9746_v53 = vadd.f32 %v9674_v47, %v5656_v20  ;;  %v5699_v23 = vpop.xlane.xlu1 %5698 }
 0x8ae   : > { %v5709_v5 = vadd.f32 %v5708_v19, %v9737_v33  ;;  %v5725_v3 = vmul.f32 0.0069444445, %v5699_v23  ;;  %v5749_v32 = vmul.f32 %v9753_v10, %v9753_v10  ;;  %v5748_v15 = vmul.f32 %v9757_v31, %v9757_v31  ;;  %v7422_v23 = vld [vmem:[%s10151_s9 + $0x38] sm:$0xff]  }
 0x8af   : > { %v9743_v6 = vadd.f32 %v9671_v34, %v5657_v21  ;;  %5990 = vmatpush1.bf16.msra.mxu0 %v7422_v23 }
 0x8b0   : > { %5710 = vadd.xlane.f32.xlu0 %v5709_v5  ;;  %v9764_v57 = vsub.f32 %v9688_v4, %v5725_v3  ;;  %v9780_v58 = vsub.f32 %v9691_v26, %v5725_v3  ;;  %v5764_v44 = vsel %vm498_vm0, %v5749_v32, 0.0  ;;  %5991 = vmatprep.subr.bf16.mxu0 %v10284_v61  ;;  %v7426_v3 = vld [vmem:[%s10151_s9 + $0x18] sm:$0xff]  }
 0x8b1   : > { %v5712_v59 = vsel %vm498_vm0, %v9743_v6, 0.0  ;;  %v5765_v51 = vadd.f32 %v5764_v44, %v5748_v15 }
 0x8b2   : > { %v5713_v1 = vadd.f32 %v5712_v59, %v9746_v53  ;;  %v5751_v39 = vmul.f32 %v9764_v57, %v9764_v57  ;;  %v5750_v20 = vmul.f32 %v9780_v58, %v9780_v58 }
 0x8b4   : > { %5714 = vadd.xlane.f32.xlu1 %v5713_v1  ;;  %v5768_v19 = vsel %vm498_vm0, %v5751_v39, 0.0 }
 0x8b5   : > { %v5769_v1 = vadd.f32 %v5768_v19, %v5750_v20 }
 0x8f1   : > { %v5703_v63 = vpop.xlane.xlu0 %5702 }
 0x8f2   : > { %v5726_v28 = vmul.f32 0.0069444445, %v5703_v63 }
 0x8f4   : > { %v9767_v56 = vsub.f32 %v9712_v37, %v5726_v28  ;;  %v9783_v45 = vsub.f32 %v9715_v24, %v5726_v28  ;;  %v7427_v28 = vld [vmem:[%s10151_s9 + $0x10] sm:$0xff]  }
 0x8f5   : > { %v5707_v62 = vpop.xlane.xlu0 %5706 }
 0x8f6   : > { %v5727_v7 = vmul.f32 0.0069444445, %v5707_v62  ;;  %v5753_v9 = vmul.f32 %v9767_v56, %v9767_v56  ;;  %v5752_v25 = vmul.f32 %v9783_v45, %v9783_v45  ;;  %v7428_v62 = vld [vmem:[%s10151_s9 + $0x8] sm:$0xff]  }
 0x8f8   : > { %v9792_v50 = vsub.f32 %v9721_v54, %v5727_v7  ;;  %v9807_v21 = vsub.f32 %v9724_v35, %v5727_v7  ;;  %v5772_v5 = vsel %vm498_vm0, %v5753_v9, 0.0 }
 0x8f9   : > { %v5773_v11 = vadd.f32 %v5772_v5, %v5752_v25 }
 0x8fa   : > { %v5754_v59 = vmul.f32 %v9807_v21, %v9807_v21 }
 0x903   : > { %v5621_v2 = vpop.f32.mrf.mxu1 }
 0x904   : > { %v5658_v52 = vadd.f32 %v5642_v40, %v5621_v2  ;;  %v7423_v40 = vld [vmem:[%s10151_s9 + $0x30] sm:$0xff]   ;;  %v7424_v2 = vld [vmem:[%s10151_s9 + $0x28] sm:$0xff]  }
 0x905   : > { %v5623_v14 = vpop.f32.mrf.mxu1  ;;  %5992 = vmatpush1.bf16.msra.mxu0 %v7423_v40 }
 0x906   : > { %v5659_v0 = vadd.f32 %v5643_v27, %v5623_v14  ;;  %v9773_v42 = vadd.f32 %v9674_v47, %v5658_v52  ;;  %5993 = vmatprep.subr.bf16.mxu0 %v10284_v61  ;;  %v7425_v27 = vld [vmem:[%s10151_s9 + $0x20] sm:$0xff]  }
 0x907   : > { %v5625_v30 = vpop.f32.mrf.mxu1  ;;  %v7429_v52 = vld [vmem:[%s10151_s9] sm:$0xff]  }
 0x908   : > { %v9770_v22 = vadd.f32 %v9671_v34, %v5659_v0  ;;  %v5660_v49 = vadd.f32 %v5644_v13, %v5625_v30  ;;  %v7430_v14 = vld [vmem:[%s10151_s9 + $0x40] sm:$0xff]  }
 0x909   : > { %v5627_v8 = vpop.f32.mrf.mxu1  ;;  %5994 = vmatpush1.bf16.msra.mxu0 %v7424_v2 }
 0x90a   : > { %v5661_v43 = vadd.f32 %v5645_v46, %v5627_v8  ;;  %v5716_v36 = vsel %vm498_vm0, %v9770_v22, 0.0  ;;  %v9798_v12 = vadd.f32 %v9674_v47, %v5660_v49  ;;  %v5755_v47 = vmul.f32 %v9792_v50, %v9792_v50  ;;  %5995 = vmatprep.subr.bf16.mxu0 %v10284_v61 }
 0x90b   : > { %v5717_v48 = vadd.f32 %v5716_v36, %v9773_v42 }
 0x90c   : > { %v9795_v55 = vadd.f32 %v9671_v34, %v5661_v43  ;;  %v5776_v16 = vsel %vm498_vm0, %v5755_v47, 0.0 }
 0x90d   : > { %5718 = vadd.xlane.f32.xlu0 %v5717_v48  ;;  %v5777_v63 = vadd.f32 %v5776_v16, %v5754_v59  ;;  %5996 = vmatpush1.bf16.msra.mxu0 %v7425_v27 }
 0x90e   : > { %v5720_v18 = vsel %vm498_vm0, %v9795_v55, 0.0  ;;  %5997 = vmatprep.subr.bf16.mxu0 %v10284_v61 }
 0x90f   : > { %v5721_v34 = vadd.f32 %v5720_v18, %v9798_v12 }
 0x911   : > { %5722 = vadd.xlane.f32.xlu1 %v5721_v34  ;;  %5766 = vadd.xlane.f32.xlu0 %v5765_v51 }
 0x912   : > { %5998 = vmatpush1.bf16.msra.mxu0 %v7426_v3 }
 0x913   : > { %5999 = vmatprep.subr.bf16.mxu0 %v10284_v61 }
 0x915   : > { %5770 = vadd.xlane.f32.xlu1 %v5769_v1  ;;  %5774 = vadd.xlane.f32.xlu0 %v5773_v11 }
 0x916   : > { %6000 = vmatpush1.bf16.msra.mxu0 %v7427_v28 }
 0x917   : > { %6001 = vmatprep.subr.bf16.mxu0 %v10284_v61 }
 0x919   : > { %5778 = vadd.xlane.f32.xlu1 %v5777_v63 }
 0x91a   : > { %6002 = vmatpush1.bf16.msra.mxu0 %v7428_v62 }
 0x91b   : > { %6003 = vmatprep.subr.bf16.mxu0 %v10284_v61 }
 0x91e   : > { %6004 = vmatpush1.bf16.msra.mxu0 %v7429_v52 }
 0x91f   : > { %6019 = vmatprep.subr.bf16.mxu0 %v10284_v61 }
 0x922   : > { %6020 = vmatpush2.bf16.msra.mxu0 %v7430_v14 }
 0x939   : > { %v5711_v0 = vpop.xlane.xlu0 %5710 }
 0x93a   : > { %v5728_v13 = vmul.f32 0.0069444445, %v5711_v0 }
 0x93c   : > { %v9853_v32 = vsub.f32 %v9737_v33, %v5728_v13  ;;  %v9856_v30 = vsub.f32 %v9734_v41, %v5728_v13 }
 0x93d   : > { %v5715_v46 = vpop.xlane.xlu1 %5714 }
 0x93e   : > { %v5756_v7 = vmul.f32 %v9853_v32, %v9853_v32  ;;  %v5757_v49 = vmul.f32 %v9856_v30, %v9856_v30  ;;  %v5729_v8 = vmul.f32 0.0069444445, %v5715_v46 }
 0x940   : > { %v9863_v15 = vsub.f32 %v9746_v53, %v5729_v8  ;;  %v9866_v43 = vsub.f32 %v9743_v6, %v5729_v8  ;;  %v5780_v36 = vsel %vm498_vm0, %v5757_v49, 0.0 }
 0x941   : > { %v5781_v48 = vadd.f32 %v5780_v36, %v5756_v7 }
 0x942   : > { %v5758_v44 = vmul.f32 %v9863_v15, %v9863_v15  ;;  %v5759_v39 = vmul.f32 %v9866_v43, %v9866_v43 }
 0x943   : > { %5782 = vadd.xlane.f32.xlu0 %v5781_v48  ;;  %v5690_v48 = vld [vmem:[%s10149_s7] sm:$0x3] }
 0x944   : > { %v5784_v9 = vsel %vm498_vm0, %v5759_v39, 0.0  ;;  %v9900_v39 = vrot.slane %v5690_v48, %v10292_v60 }
 0x945   : > { %v5785_v18 = vadd.f32 %v5784_v9, %v5758_v44  ;;  %v9903_v9 = vrot.slane %v5690_v48, %v10291_v17 }
 0x947   : > { %5786 = vadd.xlane.f32.xlu1 %v5785_v18 }
 0x996   : > { %v5719_v51 = vpop.xlane.xlu0 %5718 }
 0x997   : > { %v5730_v20 = vmul.f32 0.0069444445, %v5719_v51  ;;  %v5691_v51 = vld [vmem:[%s10150_s8] sm:$0x3] }
 0x999   : > { %v9875_v25 = vsub.f32 %v9773_v42, %v5730_v20  ;;  %v9878_v34 = vsub.f32 %v9770_v22, %v5730_v20 }
 0x99a   : > { %v5723_v47 = vpop.xlane.xlu1 %5722  ;;  %v5767_v19 = vpop.xlane.xlu0 %5766 }
 0x99b   : > { %v5760_v5 = vmul.f32 %v9875_v25, %v9875_v25  ;;  %v5761_v59 = vmul.f32 %v9878_v34, %v9878_v34  ;;  %v5731_v1 = vmul.f32 0.0069444445, %v5723_v47  ;;  %v5796_v11 = vmul.f32 0.0069444445, %v5767_v19 }
 0x99d   : > { %v9885_v16 = vsub.f32 %v9798_v12, %v5731_v1  ;;  %v9888_v63 = vsub.f32 %v9795_v55, %v5731_v1  ;;  %v5804_v23 = vadd.f32 1e-05, %v5796_v11  ;;  %v5788_v40 = vsel %vm498_vm0, %v5761_v59, 0.0 }
 0x99e   : > { %v5771_v2 = vpop.xlane.xlu1 %5770  ;;  %v5775_v27 = vpop.xlane.xlu0 %5774  ;;  %v5789_v3 = vadd.f32 %v5788_v40, %v5760_v5  ;;  %v9912_v5 = vrot.slane %v5691_v51, %v10292_v60  ;;  %v9915_v59 = vrot.slane %v5691_v51, %v10291_v17  ;;  %v7436_v51 = vld [vmem:[%s10153_s11 + $0x64] ss:$8 sps:$4 sm:$0xff]  }
 0x99f   : > { %v5762_v28 = vmul.f32 %v9885_v16, %v9885_v16  ;;  %v5763_v62 = vmul.f32 %v9888_v63, %v9888_v63  ;;  %7727 = vrsqrt.f32 %v5804_v23  ;;  %v5797_v52 = vmul.f32 0.0069444445, %v5771_v2 }
 0x9a0   : > { %v5798_v14 = vmul.f32 0.0069444445, %v5775_v27  ;;  %5790 = vadd.xlane.f32.xlu0 %v5789_v3 }
 0x9a1   : > { %v5805_v0 = vadd.f32 1e-05, %v5797_v52  ;;  %v5792_v13 = vsel %vm498_vm0, %v5763_v62, 0.0 }
 0x9a2   : > { %v5806_v46 = vadd.f32 1e-05, %v5798_v14  ;;  %v5779_v7 = vpop.xlane.xlu1 %5778  ;;  %v5793_v49 = vadd.f32 %v5792_v13, %v5762_v28 }
 0x9a3   : > { %7729 = vrsqrt.f32 %v5805_v0  ;;  %v5799_v8 = vmul.f32 0.0069444445, %v5779_v7 }
 0x9a4   : > { %7731 = vrsqrt.f32 %v5806_v46  ;;  %5794 = vadd.xlane.f32.xlu1 %v5793_v49 }
 0x9a5   : > { %v5807_v36 = vadd.f32 1e-05, %v5799_v8 }
 0x9a7   : > { %7733 = vrsqrt.f32 %v5807_v36 }
 0x9ac   : > { %v7728_v44 = vpop.eup %7727 }
 0x9ad   : > { %v5820_v18 = vmul.f32 %v7728_v44, %v9757_v31  ;;  %v5821_v20 = vmul.f32 %v7728_v44, %v9753_v10  ;;  %v7431_v44 = vld [vmem:[%s10153_s11 + $0x70] ss:$8 sps:$4 sm:$0xff]  }
 0x9af   : > { %v5848_v19 = vmul.f32 %v9903_v9, %v5821_v20  ;;  %v5847_v1 = vmul.f32 %v9900_v39, %v5820_v18  ;;  %v7433_v18 = vld [vmem:[%s10153_s11 + $0x74] ss:$8 sps:$4 sm:$0xff]  }
 0x9b0   : > { %v7730_v47 = vpop.eup %7729  ;;  %6162 = vmatprep.subr.bf16.mxu1 %v7433_v18 }
 0x9b1   : > { %v7732_v11 = vpop.eup %7731  ;;  %v5822_v31 = vmul.f32 %v7730_v47, %v9780_v58  ;;  %v5823_v23 = vmul.f32 %v7730_v47, %v9764_v57  ;;  %v5875_v3 = vadd.f32 %v9915_v59, %v5848_v19  ;;  %v5874_v28 = vadd.f32 %v9912_v5, %v5847_v1  ;;  %6163 = vmatpush1.bf16.msra.mxu1 %v7431_v44  ;;  %v7434_v47 = vld [vmem:[%s10153_s11 + $0x60] ss:$8 sps:$4 sm:$0xff]   ;;  %v7439_v1 = vld [vmem:[%s10153_s11 + $0x54] ss:$8 sps:$4 sm:$0xff]   ;;  %v7454_v44 = vld [vmem:[%s10153_s11 + $0x4] ss:$8 sps:$4 sm:$0xff]  }
 0x9b2   : > { %v5825_v40 = vmul.f32 %v7732_v11, %v9767_v56  ;;  %v5824_v56 = vmul.f32 %v7732_v11, %v9783_v45  ;;  %6164 = vmatprep.subr.bf16.mxu1 %v7436_v51 }
 0x9b3   : > { %v5850_v10 = vmul.f32 %v9903_v9, %v5823_v23  ;;  %v5849_v2 = vmul.f32 %v9900_v39, %v5822_v31  ;;  %v7437_v23 = vld [vmem:[%s10153_s11 + $0x50] ss:$8 sps:$4 sm:$0xff]  }
 0x9b4   : > { %v7734_v27 = vpop.eup %7733  ;;  %v5852_v62 = vmul.f32 %v9903_v9, %v5825_v40  ;;  %v5851_v36 = vmul.f32 %v9900_v39, %v5824_v56 }
 0x9b5   : > { %v5877_v52 = vadd.f32 %v9915_v59, %v5850_v10  ;;  %v5876_v14 = vadd.f32 %v9912_v5, %v5849_v2  ;;  %v5827_v58 = vmul.f32 %v7734_v27, %v9792_v50  ;;  %v5826_v57 = vmul.f32 %v7734_v27, %v9807_v21  ;;  %6165 = vmatpush1.bf16.msra.mxu1 %v7434_v47  ;;  %v7442_v10 = vld [vmem:[%s10153_s11 + $0x44] ss:$8 sps:$4 sm:$0xff]   ;;  %v7440_v27 = vld [vmem:[%s10153_s11 + $0x40] ss:$8 sps:$4 sm:$0xff]  }
 0x9b6   : > { %v5879_v49 = vadd.f32 %v9915_v59, %v5852_v62  ;;  %v5878_v45 = vadd.f32 %v9912_v5, %v5851_v36  ;;  %6166 = vmatprep.subr.bf16.mxu1 %v7439_v1  ;;  %v7448_v62 = vld [vmem:[%s10153_s11 + $0x24] ss:$8 sps:$4 sm:$0xff]  }
 0x9b7   : > { %v5891_v0 = vpack.c.bf16 %v5877_v52, %v5875_v3  ;;  %v5890_v13 = vpack.c.bf16 %v5876_v14, %v5874_v28  ;;  %v5854_v46 = vmul.f32 %v9903_v9, %v5827_v58  ;;  %v5853_v7 = vmul.f32 %v9900_v39, %v5826_v57  ;;  %v7445_v3 = vld [vmem:[%s10153_s11 + $0x34] ss:$8 sps:$4 sm:$0xff]   ;;  %v7443_v28 = vld [vmem:[%s10153_s11 + $0x30] ss:$8 sps:$4 sm:$0xff]   ;;  %v7446_v52 = vld [vmem:[%s10153_s11 + $0x20] ss:$8 sps:$4 sm:$0xff]  }
 0x9b9   : > { %6590 = vmatprep.mubr.msk.bf16.mxu0 %vm498_vm0, %v5891_v0  ;;  %v5881_v8 = vadd.f32 %v9915_v59, %v5854_v46  ;;  %v5880_v21 = vadd.f32 %v9912_v5, %v5853_v7  ;;  %6167 = vmatpush1.bf16.msra.mxu1 %v7437_v23 }
 0x9ba   : > { %6022 = vmatmul.mubr.bf16.vlgmr.msra.gmra.mxu0 %v5890_v13  ;;  %6168 = vmatprep.subr.bf16.mxu1 %v7442_v10 }
 0x9bb   : > { %v5893_v50 = vpack.c.bf16 %v5881_v8, %v5879_v49  ;;  %v5892_v48 = vpack.c.bf16 %v5880_v21, %v5878_v45  ;;  %v7451_v45 = vld [vmem:[%s10153_s11 + $0x14] ss:$8 sps:$4 sm:$0xff]  }
 0x9bd   : > { %6591 = vmatprep.mubr.msk.bf16.mxu0 %vm498_vm0, %v5893_v50  ;;  %6169 = vmatpush1.bf16.msra.mxu1 %v7440_v27 }
 0x9be   : > { %6170 = vmatprep.subr.bf16.mxu1 %v7445_v3 }
 0x9c1   : > { %6171 = vmatpush1.bf16.msra.mxu1 %v7443_v28 }
 0x9c2   : > { %6030 = vmatmul.mubr.bf16.gmra.mxu0 %v5892_v48  ;;  %6172 = vmatprep.subr.bf16.mxu1 %v7448_v62  ;;  %v7452_v48 = vld [vmem:[%s10153_s11] ss:$8 sps:$4 sm:$0xff]  }
 0x9c5   : > { %6173 = vmatpush1.bf16.msra.mxu1 %v7446_v52 }
 0x9c6   : > { %6174 = vmatprep.subr.bf16.mxu1 %v7451_v45 }
 0x9cc   : > { %v5783_v20 = vpop.xlane.xlu0 %5782 }
 0x9cd   : > { %v5800_v19 = vmul.f32 0.0069444445, %v5783_v20 }
 0x9cf   : > { %v5808_v11 = vadd.f32 1e-05, %v5800_v19 }
 0x9d0   : > { %v5787_v31 = vpop.xlane.xlu1 %5786 }
 0x9d1   : > { %7735 = vrsqrt.f32 %v5808_v11  ;;  %v5801_v40 = vmul.f32 0.0069444445, %v5787_v31 }
 0x9d3   : > { %v5809_v2 = vadd.f32 1e-05, %v5801_v40 }
 0x9d5   : > { %7737 = vrsqrt.f32 %v5809_v2 }
 0x9de   : > { %v7736_v14 = vpop.eup %7735 }
 0x9df   : > { %v5829_v58 = vmul.f32 %v7736_v14, %v9856_v30  ;;  %v5828_v57 = vmul.f32 %v7736_v14, %v9853_v32 }
 0x9e1   : > { %v5856_v13 = vmul.f32 %v9903_v9, %v5829_v58  ;;  %v5855_v7 = vmul.f32 %v9900_v39, %v5828_v57 }
 0x9e2   : > { %v7738_v56 = vpop.eup %7737 }
 0x9e3   : > { %v5831_v0 = vmul.f32 %v7738_v56, %v9866_v43  ;;  %v5830_v46 = vmul.f32 %v7738_v56, %v9863_v15  ;;  %v5883_v36 = vadd.f32 %v9915_v59, %v5856_v13  ;;  %v5882_v32 = vadd.f32 %v9912_v5, %v5855_v7  ;;  %v7449_v15 = vld [vmem:[%s10153_s11 + $0x10] ss:$8 sps:$4 sm:$0xff]  }
 0x9e4   : > { %6175 = vmatpush1.bf16.msra.mxu1 %v7449_v15 }
 0x9e5   : > { %v5858_v49 = vmul.f32 %v9903_v9, %v5831_v0  ;;  %v5857_v8 = vmul.f32 %v9900_v39, %v5830_v46  ;;  %6176 = vmatprep.subr.bf16.mxu1 %v7454_v44 }
 0x9e7   : > { %v5885_v30 = vadd.f32 %v9915_v59, %v5858_v49  ;;  %v5884_v50 = vadd.f32 %v9912_v5, %v5857_v8 }
 0x9e8   : > { %6177 = vmatpush1.bf16.msra.mxu1 %v7452_v48 }
 0x9e9   : > { %v5895_v21 = vpack.c.bf16 %v5885_v30, %v5883_v36  ;;  %v5894_v43 = vpack.c.bf16 %v5884_v50, %v5882_v32 }
 0x9eb   : > { %6592 = vmatprep.mubr.msk.bf16.mxu0 %vm498_vm0, %v5895_v21 }
 0x9ec   : > { %6038 = vmatmul.mubr.bf16.gmra.mxu0 %v5894_v43 }
 0xa29   : > { %v5791_v18 = vpop.xlane.xlu0 %5790 }
 0xa2a   : > { %v5802_v51 = vmul.f32 0.0069444445, %v5791_v18 }
 0xa2c   : > { %v5810_v20 = vadd.f32 1e-05, %v5802_v51 }
 0xa2d   : > { %v5795_v47 = vpop.xlane.xlu1 %5794 }
 0xa2e   : > { %7739 = vrsqrt.f32 %v5810_v20  ;;  %v5803_v19 = vmul.f32 0.0069444445, %v5795_v47 }
 0xa30   : > { %v5811_v1 = vadd.f32 1e-05, %v5803_v19 }
 0xa32   : > { %7741 = vrsqrt.f32 %v5811_v1 }
 0xa3b   : > { %v7740_v11 = vpop.eup %7739 }
 0xa3c   : > { %v5833_v31 = vmul.f32 %v7740_v11, %v9878_v34  ;;  %v5832_v23 = vmul.f32 %v7740_v11, %v9875_v25 }
 0xa3e   : > { %v5860_v2 = vmul.f32 %v9903_v9, %v5833_v31  ;;  %v5859_v3 = vmul.f32 %v9900_v39, %v5832_v23 }
 0xa3f   : > { %v7742_v40 = vpop.eup %7741 }
 0xa40   : > { %v5835_v10 = vmul.f32 %v7742_v40, %v9888_v63  ;;  %v5834_v27 = vmul.f32 %v7742_v40, %v9885_v16  ;;  %v5887_v52 = vadd.f32 %v9915_v59, %v5860_v2  ;;  %v5886_v34 = vadd.f32 %v9912_v5, %v5859_v3  ;;  %v6580_v16 = vld [vmem:[%s10152_s10] ss:$0 sm:$0xff] }
 0xa42   : > { %v5862_v28 = vmul.f32 %v9903_v9, %v5835_v10  ;;  %v5861_v62 = vmul.f32 %v9900_v39, %v5834_v27 }
 0xa44   : > { %v5889_v14 = vadd.f32 %v9915_v59, %v5862_v28  ;;  %v5888_v25 = vadd.f32 %v9912_v5, %v5861_v62  ;;  %v6251_v28 = vld [vmem:[%s10154_s12] sm:$0x3] }
 0xa45   : > { %v10027_v62 = vrot.slane %v6251_v28, %v10292_v60 }
 0xa46   : > { %v5897_v58 = vpack.c.bf16 %v5889_v14, %v5887_v52  ;;  %v5896_v63 = vpack.c.bf16 %v5888_v25, %v5886_v34  ;;  %v10031_v14 = vrot.slane %v6251_v28, %v10291_v17 }
 0xa48   : > { %6593 = vmatprep.mubr.msk.bf16.mxu0 %vm498_vm0, %v5897_v58 }
 0xa49   : > { %6046 = vmatmul.mubr.bf16.gmra.mxu0 %v5896_v63 }
 0xa7a   : > { %v6023_v9 = vpop.f32.mrf.mxu0 }
 0xa7b   : > { %v6024_v39 = vadd.f32 %v6580_v16, %v6023_v9 }
 0xa7c   : > { %v6025_v57 = vpop.f32.mrf.mxu0 }
 0xa7d   : > { %v6054_v59 = vmax.f32 %v6024_v39, 0.0 }
 0xa7e   : > { %v6026_v56 = vpop.f32.mrf.mxu0 }
 0xa7f   : > { %v6027_v0 = vadd.f32 %v6580_v16, %v6026_v56 }
 0xa80   : > { %v6028_v13 = vpop.f32.mrf.mxu0 }
 0xa81   : > { %v6055_v46 = vmax.f32 %v6027_v0, 0.0 }
 0xa82   : > { %v6031_v7 = vpop.f32.mrf.mxu0 }
 0xa83   : > { %v6062_v49 = vpack.c.bf16 %v6055_v46, %v6054_v59  ;;  %v6032_v8 = vadd.f32 %v6580_v16, %v6031_v7 }
 0xa84   : > { %v6033_v5 = vpop.f32.mrf.mxu0 }
 0xa85   : > { %6195 = vmatmul.mubr.bf16.vlgmr.msra.gmra.mxu1 %v6062_v49  ;;  %v6056_v50 = vmax.f32 %v6032_v8, 0.0 }
 0xa86   : > { %v6034_v36 = vpop.f32.mrf.mxu0  ;;  %6204 = vmatprep.mubr.bf16.mxu1 %v10284_v61 }
 0xa87   : > { %v6035_v30 = vadd.f32 %v6580_v16, %v6034_v36 }
 0xa88   : > { %v6036_v32 = vpop.f32.mrf.mxu0 }
 0xa89   : > { %v6057_v21 = vmax.f32 %v6035_v30, 0.0 }
 0xa8b   : > { %v6063_v43 = vpack.c.bf16 %v6057_v21, %v6056_v50 }
 0xa8d   : > { %6205 = vmatmul.mubr.bf16.gmra.mxu1 %v6063_v43 }
 0xa8e   : > { %6214 = vmatprep.mubr.bf16.mxu1 %v10284_v61 }
 0xaac   : > { %v6039_v15 = vpop.f32.mrf.mxu0 }
 0xaad   : > { %v6040_v48 = vadd.f32 %v6580_v16, %v6039_v15 }
 0xaae   : > { %v6041_v45 = vpop.f32.mrf.mxu0 }
 0xaaf   : > { %v6058_v20 = vmax.f32 %v6040_v48, 0.0 }
 0xab0   : > { %v6042_v44 = vpop.f32.mrf.mxu0 }
 0xab1   : > { %v6043_v18 = vadd.f32 %v6580_v16, %v6042_v44 }
 0xab2   : > { %v6044_v51 = vpop.f32.mrf.mxu0 }
 0xab3   : > { %v6059_v47 = vmax.f32 %v6043_v18, 0.0 }
 0xab5   : > { %v6064_v19 = vpack.c.bf16 %v6059_v47, %v6058_v20 }
 0xab7   : > { %6215 = vmatmul.mubr.bf16.gmra.mxu1 %v6064_v19 }
 0xab8   : > { %6224 = vmatprep.mubr.bf16.mxu1 %v10284_v61 }
 0xb09   : > { %v6047_v1 = vpop.f32.mrf.mxu0 }
 0xb0a   : > { %v6048_v31 = vadd.f32 %v6580_v16, %v6047_v1 }
 0xb0b   : > { %v6049_v11 = vpop.f32.mrf.mxu0 }
 0xb0c   : > { %v6060_v2 = vmax.f32 %v6048_v31, 0.0 }
 0xb0d   : > { %v6050_v23 = vpop.f32.mrf.mxu0 }
 0xb0e   : > { %v6051_v40 = vadd.f32 %v6580_v16, %v6050_v23 }
 0xb0f   : > { %v6052_v10 = vpop.f32.mrf.mxu0 }
 0xb10   : > { %v6061_v27 = vmax.f32 %v6051_v40, 0.0 }
 0xb12   : > { %v6065_v3 = vpack.c.bf16 %v6061_v27, %v6060_v2 }
 0xb14   : > { %6225 = vmatmul.mubr.bf16.gmra.mxu1 %v6065_v3 }
 0xb45   : > { %v6196_v61 = vpop.f32.mrf.mxu1 }
 0xb46   : > { %v6235_v52 = vadd.f32 %v6196_v61, %v9682_v29 }
 0xb47   : > { %v6198_v34 = vpop.f32.mrf.mxu1 }
 0xb48   : > { %v6263_v25 = vadd.f32 %v10027_v62, %v6235_v52  ;;  %v6236_v58 = vadd.f32 %v6198_v34, %v9679_v38 }
 0xb49   : > { %v6200_v63 = vpop.f32.mrf.mxu1 }
 0xb4a   : > { %6279 = vst [vmem:[%s10035_s27] sm:$0xff] %v6263_v25  ;;  %v6264_v60 = vadd.f32 %v10031_v14, %v6236_v58  ;;  %v6237_v29 = vadd.f32 %v6200_v63, %v9691_v26 }
 0xb4b   : > { %v6202_v17 = vpop.f32.mrf.mxu1 }
 0xb4c   : > { %6280 = vst.msk [vmem:[%s10035_s27 + $0x8] sm:$0xff] %vm498_vm0, %v6264_v60  ;;  %v6265_v16 = vadd.f32 %v10027_v62, %v6237_v29  ;;  %v6238_v38 = vadd.f32 %v6202_v17, %v9688_v4 }
 0xb4d   : > { %v6206_v9 = vpop.f32.mrf.mxu1 }
 0xb4e   : > { %6281 = vst [vmem:[%s10035_s27 + $0x10] sm:$0xff] %v6265_v16  ;;  %v6266_v57 = vadd.f32 %v10031_v14, %v6238_v38  ;;  %v6239_v39 = vadd.f32 %v6206_v9, %v9715_v24 }
 0xb4f   : > { %v6208_v56 = vpop.f32.mrf.mxu1 }
 0xb50   : > { %6282 = vst.msk [vmem:[%s10035_s27 + $0x18] sm:$0xff] %vm498_vm0, %v6266_v57  ;;  %v6267_v26 = vadd.f32 %v10027_v62, %v6239_v39  ;;  %v6240_v0 = vadd.f32 %v6208_v56, %v9712_v37 }
 0xb51   : > { %v6210_v13 = vpop.f32.mrf.mxu1 }
 0xb52   : > { %6283 = vst [vmem:[%s10035_s27 + $0x20] sm:$0xff] %v6267_v26  ;;  %v6268_v4 = vadd.f32 %v10031_v14, %v6240_v0  ;;  %v6241_v59 = vadd.f32 %v6210_v13, %v9724_v35 }
 0xb53   : > { %v6212_v46 = vpop.f32.mrf.mxu1 }
 0xb54   : > { %6284 = vst.msk [vmem:[%s10035_s27 + $0x28] sm:$0xff] %vm498_vm0, %v6268_v4  ;;  %v6269_v24 = vadd.f32 %v10027_v62, %v6241_v59  ;;  %v6242_v7 = vadd.f32 %v6212_v46, %v9721_v54 }
 0xb56   : > { %6285 = vst [vmem:[%s10035_s27 + $0x30] sm:$0xff] %v6269_v24  ;;  %v6270_v49 = vadd.f32 %v10031_v14, %v6242_v7 }
 0xb58   : > { %6286 = vst.msk [vmem:[%s10035_s27 + $0x38] sm:$0xff] %vm498_vm0, %v6270_v49 }
 0xb77   : > { %v6216_v37 = vpop.f32.mrf.mxu1 }
 0xb78   : > { %v6243_v5 = vadd.f32 %v6216_v37, %v9737_v33 }
 0xb79   : > { %v6218_v8 = vpop.f32.mrf.mxu1 }
 0xb7a   : > { %v6271_v35 = vadd.f32 %v10027_v62, %v6243_v5  ;;  %v6244_v36 = vadd.f32 %v6218_v8, %v9734_v41 }
 0xb7b   : > { %v6220_v30 = vpop.f32.mrf.mxu1 }
 0xb7c   : > { %6287 = vst [vmem:[%s10035_s27 + $0x40] sm:$0xff] %v6271_v35  ;;  %v6272_v54 = vadd.f32 %v10031_v14, %v6244_v36  ;;  %v6245_v32 = vadd.f32 %v6220_v30, %v9746_v53 }
 0xb7d   : > { %v6222_v50 = vpop.f32.mrf.mxu1 }
 0xb7e   : > { %6288 = vst.msk [vmem:[%s10035_s27 + $0x48] sm:$0xff] %vm498_vm0, %v6272_v54  ;;  %v6273_v21 = vadd.f32 %v10027_v62, %v6245_v32  ;;  %v6246_v33 = vadd.f32 %v6222_v50, %v9743_v6 }
 0xb80   : > { %6289 = vst [vmem:[%s10035_s27 + $0x50] sm:$0xff] %v6273_v21  ;;  %v6274_v41 = vadd.f32 %v10031_v14, %v6246_v33 }
 0xb82   : > { %6290 = vst.msk [vmem:[%s10035_s27 + $0x58] sm:$0xff] %vm498_vm0, %v6274_v41 }
 0xbd4   : > { %v6226_v43 = vpop.f32.mrf.mxu1 }
 0xbd5   : > { %v6247_v15 = vadd.f32 %v6226_v43, %v9773_v42 }
 0xbd6   : > { %v6228_v53 = vpop.f32.mrf.mxu1 }
 0xbd7   : > { %v6275_v45 = vadd.f32 %v10027_v62, %v6247_v15  ;;  %v6248_v48 = vadd.f32 %v6228_v53, %v9770_v22 }
 0xbd8   : > { %v6230_v44 = vpop.f32.mrf.mxu1 }
 0xbd9   : > { %6291 = vst [vmem:[%s10035_s27 + $0x60] sm:$0xff] %v6275_v45  ;;  %v6276_v6 = vadd.f32 %v10031_v14, %v6248_v48  ;;  %v6249_v18 = vadd.f32 %v6230_v44, %v9798_v12 }
 0xbda   : > { %v6232_v51 = vpop.f32.mrf.mxu1 }
 0xbdb   : > { %6292 = vst.msk [vmem:[%s10035_s27 + $0x68] sm:$0xff] %vm498_vm0, %v6276_v6  ;;  %v6277_v42 = vadd.f32 %v10027_v62, %v6249_v18  ;;  %v6250_v20 = vadd.f32 %v6232_v51, %v9795_v55 }
 0xbdd   : > { %6293 = vst [vmem:[%s10035_s27 + $0x70] sm:$0xff] %v6277_v42  ;;  %v6278_v22 = vadd.f32 %v10031_v14, %v6250_v20 }
 0xbdf   : > { %6294 = vst.msk [vmem:[%s10035_s27 + $0x78] sm:$0xff] %vm498_vm0, %v6278_v22 }
 0xbe0   : > { %7836 = shalt.err (!%p7833_p10)
}
 0xbe1   : > { %s7837_s15 = scalar_lea.hbm %s10091_s16, 2048  ;;  %s7841_s22 = scalar_lea.hbm %s10155_s13, 4096 }
 0xbe2   : > { %p7838_p7 = scmp.ne.s32.totalorder %s10091_s16, %s7837_s15  ;;  %p7842_p11 = scmp.lt.s32.totalorder %s10091_s16, %s10155_s13 }
 0xbe3   : > { %p7843_p0 = scmp.lt.s32.totalorder %s7841_s22, %s7837_s15 }
 0xbe4   : > { %p7839_p13 = pnand %p7838_p7, %p10293_p2 }
 0xbe5   : > { %p7844_p1 = por %p7843_p0, %p7842_p11 }
 0xbe6   : > { %p7840_p8 = pneg %p7839_p13 }
 0xbe8   : > { %p7845_p12 = pnand %p7844_p1, %p7840_p8 }
 0xbea   : > { %7848 = shalt.err (!%p7845_p12)
}
 0xbeb   : > { %s7909_s20 = smov 256  }
 0xbec   : > { %7270 = dma.vmem_to_hbm [thread:$0]  (%p10293_p2), %s10095_s24, 2048, %s10091_s16, %s10101_s29, %s7909_s20, %s7909_s20, %s10285_s23  }
 0xbed PF: > { %p7292_p9 = scmp.ge.s32.totalorder %s7891_s28, 2  ;;  %s6324_s17 = sand.u32 1, %s7879_s25  }
 0xbee   : > { %p10294_p3 = scmp.ne.s32.totalorder %s10203_s19, 0  ;;  %s6325_s0 = scalar_lea.sflag [#allocation6], %s6324_s17 }
 0xbf0   : > { %p7283_p4 = pnand %p7292_p9, %p10294_p3 }
 0xbf2   : > { %p7284_p5 = pneg %p7283_p4 }
 0xbf4   : > { %7874 = dma.done.wait (%p7284_p5), %s6325_s0, 2048  }
 0xbf5   : > { %7876 = vsyncadd (%p7284_p5), %s6325_s0, 4294965248  ;;  %s10295_s1 = sld [smem:[#allocation14_spill]]  ;;  %p25_p6 = scmp.ge.s32.totalorder %s8005_s14, 4  }
 0xbf6   : > { %s10296_s27 = sld [smem:[#allocation15_spill]]  ;;  %s10297_s25 = smov %s7883_s26 }
 0xbf7   : > { %s10299_s28 = smov %s8005_s14  ;;  %27 = sbr.rel (!%p25_p6) target bundleno = 8 (0x8), region = 122 }
 0xbfb   : > { %s10298_s26 = smov %s10295_s1 }
 0xbfc   :  { %6330 = vsyncpa [#allocation5], 1 }
 0xbfd   :  { %6332 = vsyncpa [#allocation5 + $0x1], 1 }
 0xbfe   :  { %6333 = vsyncpa [#allocation8], 1 }
 0xbff   :  { %6334 = vsyncpa [#allocation6], 1 }
 0xc00   :  { %6336 = vsyncpa [#allocation6 + $0x1], 1 }

</bundles_post_ra>
